<compile_context>
chip_gen: v5e
topology: v5e:2x2
jax: 0.10.0
libtpu: 0.0.40
codegen_flags: <defaults>
</compile_context>

<pallas_src>
import jax
import jax.numpy as jnp
from jax import lax
from jax.experimental import pallas as pl
from jax.experimental.pallas import tpu as pltpu

K = 3       # conv kernel size
R = 2       # pixel (un)shuffle factor
EPS = 1e-5  # BatchNorm eps (PyTorch default)


# --------------------------------------------------------------------------
# Fused Pallas kernel: Conv2d -> BN -> BN -> ConvTranspose2d, all in VMEM
# --------------------------------------------------------------------------
def _fused_scriptae_kernel(x_ref, ew_ref, eb_ref, g1_ref, b1_ref,
                           g2_ref, b2_ref, dw_ref, db_ref,
                           o_ref, pm1_ref, pm2_ref):
    """x_ref  : (N, H, W, Cin)          pixel-unshuffled input, NHWC (Cin=16)
       ew_ref : (K*K*Cin, Ce)           encoder conv weight, im2col layout
       eb_ref : (1, Ce)                 encoder conv bias
       g1/b1  : (1, Ce)                 encoder BatchNorm gamma/beta
       g2/b2  : (1, Ce)                 decoder BatchNorm gamma/beta
       dw_ref : (K*K*Ce, Cd)            decoder convT weight (flipped), im2col
       db_ref : (1, Cd)                 decoder convT bias
       o_ref  : (N, H, W, Cd)           decoder output, NHWC (Cd=16)
       pm1_ref: (N, Ho, Wo, K*K*Cin)    encoder im2col scratch
       pm2_ref: (N, H,  W,  K*K*Ce)     decoder im2col scratch
    """
    x = x_ref[...]
    N, H, W, Cin = x.shape
    Ho, Wo = H - K + 1, W - K + 1
    Ce = eb_ref.shape[-1]

    # ---- encoder Conv2d(Cin -> Ce, K, VALID) as one im2col matmul ---------
    # Assemble the (N, Ho, Wo, K*K*Cin) patch matrix in VMEM scratch
    # (9 static lane-offset stores), then a single 144-deep MXU contraction.
    for ky in range(K):
        for kx in range(K):
            t = ky * K + kx
            pm1_ref[:, :, :, t * Cin:(t + 1) * Cin] = \
                x[:, ky:ky + Ho, kx:kx + Wo, :]
    enc = jnp.einsum("nhwk,ko->nhwo", pm1_ref[...], ew_ref[...],
                     preferred_element_type=jnp.float32) + eb_ref[...]

    # ---- BatchNorm2d(Ce) x2, training mode (batch stats, biased variance) --
    cnt = float(N * Ho * Wo)
    m1 = jnp.sum(enc, axis=(0, 1, 2), keepdims=True) / cnt
    c1 = enc - m1
    v1 = jnp.sum(c1 * c1, axis=(0, 1, 2), keepdims=True) / cnt
    y = c1 * lax.rsqrt(v1 + EPS) * g1_ref[...] + b1_ref[...]

    m2 = jnp.sum(y, axis=(0, 1, 2), keepdims=True) / cnt
    c2 = y - m2
    v2 = jnp.sum(c2 * c2, axis=(0, 1, 2), keepdims=True) / cnt
    z = c2 * lax.rsqrt(v2 + EPS) * g2_ref[...] + b2_ref[...]    # (N,Ho,Wo,Ce)

    # ---- decoder ConvTranspose2d(Ce -> Cd, K) ------------------------------
    # == VALID cross-correlation of the (K-1)-zero-padded activation with the
    # spatially-flipped, in/out-swapped kernel.  The padding is realised
    # implicitly by scattering z into the zero-initialised decoder patch
    # matrix at per-tap offsets; then one 72-deep MXU contraction.
    pm2_ref[...] = jnp.zeros_like(pm2_ref)
    for ky in range(K):
        for kx in range(K):
            t = ky * K + kx
            oy, ox = K - 1 - ky, K - 1 - kx
            pm2_ref[:, oy:oy + Ho, ox:ox + Wo, t * Ce:(t + 1) * Ce] = z
    dec = jnp.einsum("nhwk,ko->nhwo", pm2_ref[...], dw_ref[...],
                     preferred_element_type=jnp.float32) + db_ref[...]
    o_ref[...] = dec.astype(o_ref.dtype)


def _vmem():
    return pl.BlockSpec(memory_space=pltpu.MemorySpace.VMEM)


def _fused_forward_nhwc(x_nhwc, p):
    """Single pallas_call for conv -> BN -> BN -> convT on NHWC data."""
    N, H, W, Cin = x_nhwc.shape
    Ho, Wo = H - K + 1, W - K + 1
    Ce = p["enc_b"].shape[0]
    Cd = p["dec_b"].shape[0]
    # HWIO -> im2col weight layout is a pure row-major collapse (free).
    ew = p["enc_w_hwio"].reshape(K * K * Cin, Ce)
    dw = p["dec_w_hwio_flip"].reshape(K * K * Ce, Cd)
    return pl.pallas_call(
        _fused_scriptae_kernel,
        out_shape=jax.ShapeDtypeStruct((N, H, W, Cd), x_nhwc.dtype),
        in_specs=[_vmem()] * 9,
        out_specs=_vmem(),
        scratch_shapes=[
            pltpu.VMEM((N, Ho, Wo, K * K * Cin), jnp.float32),  # enc im2col
            pltpu.VMEM((N, H, W, K * K * Ce), jnp.float32),     # dec im2col
        ],
    )(x_nhwc, ew, p["enc_b"].reshape(1, Ce),
      p["bn_enc_g"].reshape(1, Ce), p["bn_enc_b"].reshape(1, Ce),
      p["bn_dec_g"].reshape(1, Ce), p["bn_dec_b"].reshape(1, Ce),
      dw, p["dec_b"].reshape(1, Cd))


# --------------------------------------------------------------------------
# Full forward: layout plumbing (one fused transpose each side) + fused kernel
# --------------------------------------------------------------------------
@jax.jit
def scriptae_forward(x_nchw, p):
    """ScriptAE forward: decode(encode(x)).  x_nchw: (N, 4, 16, 16)."""
    N, C, Hr, Wr = x_nchw.shape
    H, W = Hr // R, Wr // R
    # PixelUnshuffle(2) + NCHW->NHWC, fused into one reshape/transpose copy.
    x_nhwc = (x_nchw.reshape(N, C, H, R, W, R)
              .transpose(0, 2, 4, 1, 3, 5)
              .reshape(N, H, W, C * R * R))
    y_nhwc = _fused_forward_nhwc(x_nhwc, p)             # (N, H, W, C*R*R)
    # NHWC->NCHW + PixelShuffle(2), fused into one reshape/transpose copy.
    # TODO(synk): the final store is channel-minor (16 lanes); a lane-dense
    # (N, 1024) output would need an in-kernel minor-dim reshape of uncertain
    # Mosaic support -- skipped since the output is only 8 KiB.
    y = (y_nhwc.reshape(N, H, W, C, R, R)
         .transpose(0, 3, 1, 4, 2, 5)
         .reshape(N, C, Hr, Wr))
    return y


# --------------------------------------------------------------------------
# Pure-JAX reference (for correctness check)
# --------------------------------------------------------------------------
def _bn_ref(x, g, b):
    mean = jnp.mean(x, axis=(0, 1, 2), keepdims=True)
    var = jnp.mean((x - mean) ** 2, axis=(0, 1, 2), keepdims=True)
    return (x - mean) * lax.rsqrt(var + EPS) * g + b


def scriptae_forward_ref(x_nchw, p):
    dn = ("NHWC", "HWIO", "NHWC")
    N, C, Hr, Wr = x_nchw.shape
    H, W = Hr // R, Wr // R
    y = (x_nchw.reshape(N, C, H, R, W, R).transpose(0, 2, 4, 1, 3, 5)
         .reshape(N, H, W, C * R * R))
    y = lax.conv_general_dilated(y, p["enc_w_hwio"], (1, 1), "VALID",
                                 dimension_numbers=dn) + p["enc_b"]
    y = _bn_ref(y, p["bn_enc_g"], p["bn_enc_b"])
    y = _bn_ref(y, p["bn_dec_g"], p["bn_dec_b"])
    y = jnp.pad(y, ((0, 0), (K - 1, K - 1), (K - 1, K - 1), (0, 0)))
    y = lax.conv_general_dilated(y, p["dec_w_hwio_flip"], (1, 1), "VALID",
                                 dimension_numbers=dn) + p["dec_b"]
    y = (y.reshape(N, H, W, C, R, R).transpose(0, 3, 1, 4, 2, 5)
         .reshape(N, C, Hr, Wr))
    return y


# --------------------------------------------------------------------------
# Deterministic parameter construction (shapes match the nn.Module __init__)
# --------------------------------------------------------------------------
def make_params():
    key = jax.random.PRNGKey(0)
    k1, k2, k3, k4 = jax.random.split(key, 4)
    # Conv2d(16, 8, 3): weight (8,16,3,3), bias (8,)
    b_enc = 1.0 / (16 * 9) ** 0.5
    enc_w = jax.random.uniform(k1, (8, 16, 3, 3), jnp.float32, -b_enc, b_enc)
    enc_b = jax.random.uniform(k2, (8,), jnp.float32, -b_enc, b_enc)
    # ConvTranspose2d(8, 16, 3): weight (8,16,3,3) = (Cin,Cout,K,K), bias (16,)
    b_dec = 1.0 / (8 * 9) ** 0.5
    dec_w = jax.random.uniform(k3, (8, 16, 3, 3), jnp.float32, -b_dec, b_dec)
    dec_b = jax.random.uniform(k4, (16,), jnp.float32, -b_dec, b_dec)
    return {
        # Conv2d weight (Cout,Cin,K,K) -> HWIO
        "enc_w_hwio": jnp.transpose(enc_w, (2, 3, 1, 0)),
        "enc_b": enc_b,
        # ConvTranspose2d weight (Cin,Cout,K,K) -> HWIO + spatial flip
        "dec_w_hwio_flip": jnp.transpose(dec_w, (2, 3, 0, 1))[::-1, ::-1, :, :],
        "dec_b": dec_b,
        # BatchNorm2d(8) default affine params (weight=1, bias=0) for both BNs.
        "bn_enc_g": jnp.ones((8,), jnp.float32),
        "bn_enc_b": jnp.zeros((8,), jnp.float32),
        "bn_dec_g": jnp.ones((8,), jnp.float32),
        "bn_dec_b": jnp.zeros((8,), jnp.float32),
    }


if __name__ == "__main__":
    params = make_params()
    x = jax.random.normal(jax.random.fold_in(jax.random.PRNGKey(0), 123),
                          (2, 4, 16, 16), jnp.float32)

    out = jax.block_until_ready(scriptae_forward(x, params))
    ref = jax.block_until_ready(scriptae_forward_ref(x, params))

    assert out.shape == (2, 4, 16, 16), out.shape
    assert jnp.allclose(out, ref, atol=1e-4, rtol=1e-4), float(
        jnp.max(jnp.abs(out - ref)))
    print("KERNEL_OK")
</pallas_src>

<mosaic_0001>
module attributes {stable_mosaic.version = 11 : i64} {
  func.func @_fused_scriptae_kernel(%arg0: memref<2x8x8x16xf32, #tpu.memory_space<vmem>>, %arg1: memref<144x8xf32, #tpu.memory_space<vmem>>, %arg2: memref<1x8xf32, #tpu.memory_space<vmem>>, %arg3: memref<1x8xf32, #tpu.memory_space<vmem>>, %arg4: memref<1x8xf32, #tpu.memory_space<vmem>>, %arg5: memref<1x8xf32, #tpu.memory_space<vmem>>, %arg6: memref<1x8xf32, #tpu.memory_space<vmem>>, %arg7: memref<72x16xf32, #tpu.memory_space<vmem>>, %arg8: memref<1x16xf32, #tpu.memory_space<vmem>>, %arg9: memref<2x8x8x16xf32, #tpu.memory_space<vmem>>, %arg10: memref<2x6x6x144xf32, #tpu.memory_space<vmem>>, %arg11: memref<2x8x8x72xf32, #tpu.memory_space<vmem>>) attributes {dimension_semantics = [], scalar_prefetch = 0 : i64, scratch_operands = 2 : i64, tpu.core_type = #tpu.core_type<tc>} {
    %c0 = arith.constant 0 : index
    %c0_0 = arith.constant 0 : index
    %c0_1 = arith.constant 0 : index
    %c0_2 = arith.constant 0 : index
    %0 = vector.load %arg0[%c0, %c0_0, %c0_1, %c0_2] : memref<2x8x8x16xf32, #tpu.memory_space<vmem>>, vector<2x8x8x16xf32>
    %1 = vector.extract_strided_slice %0 {offsets = [0, 0, 0, 0], sizes = [2, 6, 6, 16], strides = [1, 1, 1, 1]} : vector<2x8x8x16xf32> to vector<2x6x6x16xf32>
    %c0_3 = arith.constant 0 : index
    %c0_4 = arith.constant 0 : index
    %c0_5 = arith.constant 0 : index
    %c0_6 = arith.constant 0 : index
    %2 = vector.load %arg10[%c0_3, %c0_4, %c0_5, %c0_6] : memref<2x6x6x144xf32, #tpu.memory_space<vmem>>, vector<2x6x6x16xf32>
    tpu.vector_store %arg10[%c0_3, %c0_4, %c0_5, %c0_6], %1 {strides = array<i32>} : memref<2x6x6x144xf32, #tpu.memory_space<vmem>>, vector<2x6x6x16xf32>,
    %3 = vector.extract_strided_slice %0 {offsets = [0, 0, 1, 0], sizes = [2, 6, 6, 16], strides = [1, 1, 1, 1]} : vector<2x8x8x16xf32> to vector<2x6x6x16xf32>
    %c0_7 = arith.constant 0 : index
    %c0_8 = arith.constant 0 : index
    %c0_9 = arith.constant 0 : index
    %c16 = arith.constant 16 : index
    %4 = vector.load %arg10[%c0_7, %c0_8, %c0_9, %c16] : memref<2x6x6x144xf32, #tpu.memory_space<vmem>>, vector<2x6x6x16xf32>
    tpu.vector_store %arg10[%c0_7, %c0_8, %c0_9, %c16], %3 {strides = array<i32>} : memref<2x6x6x144xf32, #tpu.memory_space<vmem>>, vector<2x6x6x16xf32>,
    %5 = vector.extract_strided_slice %0 {offsets = [0, 0, 2, 0], sizes = [2, 6, 6, 16], strides = [1, 1, 1, 1]} : vector<2x8x8x16xf32> to vector<2x6x6x16xf32>
    %c0_10 = arith.constant 0 : index
    %c0_11 = arith.constant 0 : index
    %c0_12 = arith.constant 0 : index
    %c32 = arith.constant 32 : index
    %6 = vector.load %arg10[%c0_10, %c0_11, %c0_12, %c32] : memref<2x6x6x144xf32, #tpu.memory_space<vmem>>, vector<2x6x6x16xf32>
    tpu.vector_store %arg10[%c0_10, %c0_11, %c0_12, %c32], %5 {strides = array<i32>} : memref<2x6x6x144xf32, #tpu.memory_space<vmem>>, vector<2x6x6x16xf32>,
    %7 = vector.extract_strided_slice %0 {offsets = [0, 1, 0, 0], sizes = [2, 6, 6, 16], strides = [1, 1, 1, 1]} : vector<2x8x8x16xf32> to vector<2x6x6x16xf32>
    %c0_13 = arith.constant 0 : index
    %c0_14 = arith.constant 0 : index
    %c0_15 = arith.constant 0 : index
    %c48 = arith.constant 48 : index
    %8 = vector.load %arg10[%c0_13, %c0_14, %c0_15, %c48] : memref<2x6x6x144xf32, #tpu.memory_space<vmem>>, vector<2x6x6x16xf32>
    tpu.vector_store %arg10[%c0_13, %c0_14, %c0_15, %c48], %7 {strides = array<i32>} : memref<2x6x6x144xf32, #tpu.memory_space<vmem>>, vector<2x6x6x16xf32>,
    %9 = vector.extract_strided_slice %0 {offsets = [0, 1, 1, 0], sizes = [2, 6, 6, 16], strides = [1, 1, 1, 1]} : vector<2x8x8x16xf32> to vector<2x6x6x16xf32>
    %c0_16 = arith.constant 0 : index
    %c0_17 = arith.constant 0 : index
    %c0_18 = arith.constant 0 : index
    %c64 = arith.constant 64 : index
    %10 = vector.load %arg10[%c0_16, %c0_17, %c0_18, %c64] : memref<2x6x6x144xf32, #tpu.memory_space<vmem>>, vector<2x6x6x16xf32>
    tpu.vector_store %arg10[%c0_16, %c0_17, %c0_18, %c64], %9 {strides = array<i32>} : memref<2x6x6x144xf32, #tpu.memory_space<vmem>>, vector<2x6x6x16xf32>,
    %11 = vector.extract_strided_slice %0 {offsets = [0, 1, 2, 0], sizes = [2, 6, 6, 16], strides = [1, 1, 1, 1]} : vector<2x8x8x16xf32> to vector<2x6x6x16xf32>
    %c0_19 = arith.constant 0 : index
    %c0_20 = arith.constant 0 : index
    %c0_21 = arith.constant 0 : index
    %c80 = arith.constant 80 : index
    %12 = vector.load %arg10[%c0_19, %c0_20, %c0_21, %c80] : memref<2x6x6x144xf32, #tpu.memory_space<vmem>>, vector<2x6x6x16xf32>
    tpu.vector_store %arg10[%c0_19, %c0_20, %c0_21, %c80], %11 {strides = array<i32>} : memref<2x6x6x144xf32, #tpu.memory_space<vmem>>, vector<2x6x6x16xf32>,
    %13 = vector.extract_strided_slice %0 {offsets = [0, 2, 0, 0], sizes = [2, 6, 6, 16], strides = [1, 1, 1, 1]} : vector<2x8x8x16xf32> to vector<2x6x6x16xf32>
    %c0_22 = arith.constant 0 : index
    %c0_23 = arith.constant 0 : index
    %c0_24 = arith.constant 0 : index
    %c96 = arith.constant 96 : index
    %14 = vector.load %arg10[%c0_22, %c0_23, %c0_24, %c96] : memref<2x6x6x144xf32, #tpu.memory_space<vmem>>, vector<2x6x6x16xf32>
    tpu.vector_store %arg10[%c0_22, %c0_23, %c0_24, %c96], %13 {strides = array<i32>} : memref<2x6x6x144xf32, #tpu.memory_space<vmem>>, vector<2x6x6x16xf32>,
    %15 = vector.extract_strided_slice %0 {offsets = [0, 2, 1, 0], sizes = [2, 6, 6, 16], strides = [1, 1, 1, 1]} : vector<2x8x8x16xf32> to vector<2x6x6x16xf32>
    %c0_25 = arith.constant 0 : index
    %c0_26 = arith.constant 0 : index
    %c0_27 = arith.constant 0 : index
    %c112 = arith.constant 112 : index
    %16 = vector.load %arg10[%c0_25, %c0_26, %c0_27, %c112] : memref<2x6x6x144xf32, #tpu.memory_space<vmem>>, vector<2x6x6x16xf32>
    tpu.vector_store %arg10[%c0_25, %c0_26, %c0_27, %c112], %15 {strides = array<i32>} : memref<2x6x6x144xf32, #tpu.memory_space<vmem>>, vector<2x6x6x16xf32>,
    %17 = vector.extract_strided_slice %0 {offsets = [0, 2, 2, 0], sizes = [2, 6, 6, 16], strides = [1, 1, 1, 1]} : vector<2x8x8x16xf32> to vector<2x6x6x16xf32>
    %c0_28 = arith.constant 0 : index
    %c0_29 = arith.constant 0 : index
    %c0_30 = arith.constant 0 : index
    %c128 = arith.constant 128 : index
    %18 = vector.load %arg10[%c0_28, %c0_29, %c0_30, %c128] : memref<2x6x6x144xf32, #tpu.memory_space<vmem>>, vector<2x6x6x16xf32>
    tpu.vector_store %arg10[%c0_28, %c0_29, %c0_30, %c128], %17 {strides = array<i32>} : memref<2x6x6x144xf32, #tpu.memory_space<vmem>>, vector<2x6x6x16xf32>,
    %c0_31 = arith.constant 0 : index
    %c0_32 = arith.constant 0 : index
    %c0_33 = arith.constant 0 : index
    %c0_34 = arith.constant 0 : index
    %19 = vector.load %arg10[%c0_31, %c0_32, %c0_33, %c0_34] : memref<2x6x6x144xf32, #tpu.memory_space<vmem>>, vector<2x6x6x144xf32>
    %c0_35 = arith.constant 0 : index
    %c0_36 = arith.constant 0 : index
    %20 = vector.load %arg1[%c0_35, %c0_36] : memref<144x8xf32, #tpu.memory_space<vmem>>, vector<144x8xf32>
    "tpu.trace_start"() <{level = 10 : i32, message = "nhwk,ko->nhwo"}> : () -> ()
    %cst = arith.constant dense<0.000000e+00> : vector<2x6x6x8xf32>
    %21 = tpu.matmul %19, %20, %cst {dimension_numbers = #tpu.dot_dimension_numbers<[3], [0], [0, 1, 2], [1], [0, 0, 0, 1, 0, 2, 1, 1], [], []>} : vector<2x6x6x144xf32>, vector<144x8xf32>, vector<2x6x6x8xf32> -> vector<2x6x6x8xf32>
    "tpu.trace_stop"() : () -> ()
    %c0_37 = arith.constant 0 : index
    %c0_38 = arith.constant 0 : index
    %22 = vector.load %arg2[%c0_37, %c0_38] : memref<1x8xf32, #tpu.memory_space<vmem>>, vector<1x8xf32>
    %23 = vector.shape_cast %22 : vector<1x8xf32> to vector<1x1x1x8xf32>
    %24 = vector.broadcast %23 : vector<1x1x1x8xf32> to vector<2x6x6x8xf32>
    %25 = arith.addf %21, %24 : vector<2x6x6x8xf32>
    %cst_39 = arith.constant dense<0.000000e+00> : vector<8xf32>
    %26 = vector.multi_reduction <add>, %25, %cst_39 [0, 1, 2] : vector<2x6x6x8xf32> to vector<8xf32>
    %27 = vector.shape_cast %26 : vector<8xf32> to vector<1x1x1x8xf32>
    %cst_40 = arith.constant 7.200000e+01 : f32
    %28 = vector.broadcast %cst_40 : f32 to vector<1x1x1x8xf32>
    %29 = arith.divf %27, %28 : vector<1x1x1x8xf32>
    %30 = vector.broadcast %29 : vector<1x1x1x8xf32> to vector<2x6x6x8xf32>
    %31 = arith.subf %25, %30 : vector<2x6x6x8xf32>
    %32 = arith.mulf %31, %31 : vector<2x6x6x8xf32>
    %cst_41 = arith.constant dense<0.000000e+00> : vector<8xf32>
    %33 = vector.multi_reduction <add>, %32, %cst_41 [0, 1, 2] : vector<2x6x6x8xf32> to vector<8xf32>
    %34 = vector.shape_cast %33 : vector<8xf32> to vector<1x1x1x8xf32>
    %cst_42 = arith.constant 7.200000e+01 : f32
    %35 = vector.broadcast %cst_42 : f32 to vector<1x1x1x8xf32>
    %36 = arith.divf %34, %35 : vector<1x1x1x8xf32>
    %cst_43 = arith.constant 9.99999974E-6 : f32
    %37 = vector.broadcast %cst_43 : f32 to vector<1x1x1x8xf32>
    %38 = arith.addf %36, %37 : vector<1x1x1x8xf32>
    %39 = math.rsqrt %38 : vector<1x1x1x8xf32>
    %40 = vector.broadcast %39 : vector<1x1x1x8xf32> to vector<2x6x6x8xf32>
    %41 = arith.mulf %31, %40 : vector<2x6x6x8xf32>
    %c0_44 = arith.constant 0 : index
    %c0_45 = arith.constant 0 : index
    %42 = vector.load %arg3[%c0_44, %c0_45] : memref<1x8xf32, #tpu.memory_space<vmem>>, vector<1x8xf32>
    %43 = vector.shape_cast %42 : vector<1x8xf32> to vector<1x1x1x8xf32>
    %44 = vector.broadcast %43 : vector<1x1x1x8xf32> to vector<2x6x6x8xf32>
    %45 = arith.mulf %41, %44 : vector<2x6x6x8xf32>
    %c0_46 = arith.constant 0 : index
    %c0_47 = arith.constant 0 : index
    %46 = vector.load %arg4[%c0_46, %c0_47] : memref<1x8xf32, #tpu.memory_space<vmem>>, vector<1x8xf32>
    %47 = vector.shape_cast %46 : vector<1x8xf32> to vector<1x1x1x8xf32>
    %48 = vector.broadcast %47 : vector<1x1x1x8xf32> to vector<2x6x6x8xf32>
    %49 = arith.addf %45, %48 : vector<2x6x6x8xf32>
    %cst_48 = arith.constant dense<0.000000e+00> : vector<8xf32>
    %50 = vector.multi_reduction <add>, %49, %cst_48 [0, 1, 2] : vector<2x6x6x8xf32> to vector<8xf32>
    %51 = vector.shape_cast %50 : vector<8xf32> to vector<1x1x1x8xf32>
    %cst_49 = arith.constant 7.200000e+01 : f32
    %52 = vector.broadcast %cst_49 : f32 to vector<1x1x1x8xf32>
    %53 = arith.divf %51, %52 : vector<1x1x1x8xf32>
    %54 = vector.broadcast %53 : vector<1x1x1x8xf32> to vector<2x6x6x8xf32>
    %55 = arith.subf %49, %54 : vector<2x6x6x8xf32>
    %56 = arith.mulf %55, %55 : vector<2x6x6x8xf32>
    %cst_50 = arith.constant dense<0.000000e+00> : vector<8xf32>
    %57 = vector.multi_reduction <add>, %56, %cst_50 [0, 1, 2] : vector<2x6x6x8xf32> to vector<8xf32>
    %58 = vector.shape_cast %57 : vector<8xf32> to vector<1x1x1x8xf32>
    %cst_51 = arith.constant 7.200000e+01 : f32
    %59 = vector.broadcast %cst_51 : f32 to vector<1x1x1x8xf32>
    %60 = arith.divf %58, %59 : vector<1x1x1x8xf32>
    %cst_52 = arith.constant 9.99999974E-6 : f32
    %61 = vector.broadcast %cst_52 : f32 to vector<1x1x1x8xf32>
    %62 = arith.addf %60, %61 : vector<1x1x1x8xf32>
    %63 = math.rsqrt %62 : vector<1x1x1x8xf32>
    %64 = vector.broadcast %63 : vector<1x1x1x8xf32> to vector<2x6x6x8xf32>
    %65 = arith.mulf %55, %64 : vector<2x6x6x8xf32>
    %c0_53 = arith.constant 0 : index
    %c0_54 = arith.constant 0 : index
    %66 = vector.load %arg5[%c0_53, %c0_54] : memref<1x8xf32, #tpu.memory_space<vmem>>, vector<1x8xf32>
    %67 = vector.shape_cast %66 : vector<1x8xf32> to vector<1x1x1x8xf32>
    %68 = vector.broadcast %67 : vector<1x1x1x8xf32> to vector<2x6x6x8xf32>
    %69 = arith.mulf %65, %68 : vector<2x6x6x8xf32>
    %c0_55 = arith.constant 0 : index
    %c0_56 = arith.constant 0 : index
    %70 = vector.load %arg6[%c0_55, %c0_56] : memref<1x8xf32, #tpu.memory_space<vmem>>, vector<1x8xf32>
    %71 = vector.shape_cast %70 : vector<1x8xf32> to vector<1x1x1x8xf32>
    %72 = vector.broadcast %71 : vector<1x1x1x8xf32> to vector<2x6x6x8xf32>
    %73 = arith.addf %69, %72 : vector<2x6x6x8xf32>
    %cst_57 = arith.constant 0.000000e+00 : f32
    %74 = vector.broadcast %cst_57 : f32 to vector<2x8x8x72xf32>
    %c0_58 = arith.constant 0 : index
    %c0_59 = arith.constant 0 : index
    %c0_60 = arith.constant 0 : index
    %c0_61 = arith.constant 0 : index
    %75 = vector.load %arg11[%c0_58, %c0_59, %c0_60, %c0_61] : memref<2x8x8x72xf32, #tpu.memory_space<vmem>>, vector<2x8x8x72xf32>
    tpu.vector_store %arg11[%c0_58, %c0_59, %c0_60, %c0_61], %74 {strides = array<i32>} : memref<2x8x8x72xf32, #tpu.memory_space<vmem>>, vector<2x8x8x72xf32>,
    %c0_62 = arith.constant 0 : index
    %c2 = arith.constant 2 : index
    %c2_63 = arith.constant 2 : index
    %c0_64 = arith.constant 0 : index
    %76 = vector.load %arg11[%c0_62, %c2, %c2_63, %c0_64] : memref<2x8x8x72xf32, #tpu.memory_space<vmem>>, vector<2x6x6x8xf32>
    tpu.vector_store %arg11[%c0_62, %c2, %c2_63, %c0_64], %73 {strides = array<i32>} : memref<2x8x8x72xf32, #tpu.memory_space<vmem>>, vector<2x6x6x8xf32>,
    %c0_65 = arith.constant 0 : index
    %c2_66 = arith.constant 2 : index
    %c1 = arith.constant 1 : index
    %c8 = arith.constant 8 : index
    %77 = vector.load %arg11[%c0_65, %c2_66, %c1, %c8] : memref<2x8x8x72xf32, #tpu.memory_space<vmem>>, vector<2x6x6x8xf32>
    tpu.vector_store %arg11[%c0_65, %c2_66, %c1, %c8], %73 {strides = array<i32>} : memref<2x8x8x72xf32, #tpu.memory_space<vmem>>, vector<2x6x6x8xf32>,
    %c0_67 = arith.constant 0 : index
    %c2_68 = arith.constant 2 : index
    %c0_69 = arith.constant 0 : index
    %c16_70 = arith.constant 16 : index
    %78 = vector.load %arg11[%c0_67, %c2_68, %c0_69, %c16_70] : memref<2x8x8x72xf32, #tpu.memory_space<vmem>>, vector<2x6x6x8xf32>
    tpu.vector_store %arg11[%c0_67, %c2_68, %c0_69, %c16_70], %73 {strides = array<i32>} : memref<2x8x8x72xf32, #tpu.memory_space<vmem>>, vector<2x6x6x8xf32>,
    %c0_71 = arith.constant 0 : index
    %c1_72 = arith.constant 1 : index
    %c2_73 = arith.constant 2 : index
    %c24 = arith.constant 24 : index
    %79 = vector.load %arg11[%c0_71, %c1_72, %c2_73, %c24] : memref<2x8x8x72xf32, #tpu.memory_space<vmem>>, vector<2x6x6x8xf32>
    tpu.vector_store %arg11[%c0_71, %c1_72, %c2_73, %c24], %73 {strides = array<i32>} : memref<2x8x8x72xf32, #tpu.memory_space<vmem>>, vector<2x6x6x8xf32>,
    %c0_74 = arith.constant 0 : index
    %c1_75 = arith.constant 1 : index
    %c1_76 = arith.constant 1 : index
    %c32_77 = arith.constant 32 : index
    %80 = vector.load %arg11[%c0_74, %c1_75, %c1_76, %c32_77] : memref<2x8x8x72xf32, #tpu.memory_space<vmem>>, vector<2x6x6x8xf32>
    tpu.vector_store %arg11[%c0_74, %c1_75, %c1_76, %c32_77], %73 {strides = array<i32>} : memref<2x8x8x72xf32, #tpu.memory_space<vmem>>, vector<2x6x6x8xf32>,
    %c0_78 = arith.constant 0 : index
    %c1_79 = arith.constant 1 : index
    %c0_80 = arith.constant 0 : index
    %c40 = arith.constant 40 : index
    %81 = vector.load %arg11[%c0_78, %c1_79, %c0_80, %c40] : memref<2x8x8x72xf32, #tpu.memory_space<vmem>>, vector<2x6x6x8xf32>
    tpu.vector_store %arg11[%c0_78, %c1_79, %c0_80, %c40], %73 {strides = array<i32>} : memref<2x8x8x72xf32, #tpu.memory_space<vmem>>, vector<2x6x6x8xf32>,
    %c0_81 = arith.constant 0 : index
    %c0_82 = arith.constant 0 : index
    %c2_83 = arith.constant 2 : index
    %c48_84 = arith.constant 48 : index
    %82 = vector.load %arg11[%c0_81, %c0_82, %c2_83, %c48_84] : memref<2x8x8x72xf32, #tpu.memory_space<vmem>>, vector<2x6x6x8xf32>
    tpu.vector_store %arg11[%c0_81, %c0_82, %c2_83, %c48_84], %73 {strides = array<i32>} : memref<2x8x8x72xf32, #tpu.memory_space<vmem>>, vector<2x6x6x8xf32>,
    %c0_85 = arith.constant 0 : index
    %c0_86 = arith.constant 0 : index
    %c1_87 = arith.constant 1 : index
    %c56 = arith.constant 56 : index
    %83 = vector.load %arg11[%c0_85, %c0_86, %c1_87, %c56] : memref<2x8x8x72xf32, #tpu.memory_space<vmem>>, vector<2x6x6x8xf32>
    tpu.vector_store %arg11[%c0_85, %c0_86, %c1_87, %c56], %73 {strides = array<i32>} : memref<2x8x8x72xf32, #tpu.memory_space<vmem>>, vector<2x6x6x8xf32>,
    %c0_88 = arith.constant 0 : index
    %c0_89 = arith.constant 0 : index
    %c0_90 = arith.constant 0 : index
    %c64_91 = arith.constant 64 : index
    %84 = vector.load %arg11[%c0_88, %c0_89, %c0_90, %c64_91] : memref<2x8x8x72xf32, #tpu.memory_space<vmem>>, vector<2x6x6x8xf32>
    tpu.vector_store %arg11[%c0_88, %c0_89, %c0_90, %c64_91], %73 {strides = array<i32>} : memref<2x8x8x72xf32, #tpu.memory_space<vmem>>, vector<2x6x6x8xf32>,
    %c0_92 = arith.constant 0 : index
    %c0_93 = arith.constant 0 : index
    %c0_94 = arith.constant 0 : index
    %c0_95 = arith.constant 0 : index
    %85 = vector.load %arg11[%c0_92, %c0_93, %c0_94, %c0_95] : memref<2x8x8x72xf32, #tpu.memory_space<vmem>>, vector<2x8x8x72xf32>
    %c0_96 = arith.constant 0 : index
    %c0_97 = arith.constant 0 : index
    %86 = vector.load %arg7[%c0_96, %c0_97] : memref<72x16xf32, #tpu.memory_space<vmem>>, vector<72x16xf32>
    "tpu.trace_start"() <{level = 10 : i32, message = "nhwk,ko->nhwo"}> : () -> ()
    %cst_98 = arith.constant dense<0.000000e+00> : vector<2x8x8x16xf32>
    %87 = tpu.matmul %85, %86, %cst_98 {dimension_numbers = #tpu.dot_dimension_numbers<[3], [0], [0, 1, 2], [1], [0, 0, 0, 1, 0, 2, 1, 1], [], []>} : vector<2x8x8x72xf32>, vector<72x16xf32>, vector<2x8x8x16xf32> -> vector<2x8x8x16xf32>
    "tpu.trace_stop"() : () -> ()
    %c0_99 = arith.constant 0 : index
    %c0_100 = arith.constant 0 : index
    %88 = vector.load %arg8[%c0_99, %c0_100] : memref<1x16xf32, #tpu.memory_space<vmem>>, vector<1x16xf32>
    %89 = vector.shape_cast %88 : vector<1x16xf32> to vector<1x1x1x16xf32>
    %90 = vector.broadcast %89 : vector<1x1x1x16xf32> to vector<2x8x8x16xf32>
    %91 = arith.addf %87, %90 : vector<2x8x8x16xf32>
    %c0_101 = arith.constant 0 : index
    %c0_102 = arith.constant 0 : index
    %c0_103 = arith.constant 0 : index
    %c0_104 = arith.constant 0 : index
    %92 = vector.load %arg9[%c0_101, %c0_102, %c0_103, %c0_104] : memref<2x8x8x16xf32, #tpu.memory_space<vmem>>, vector<2x8x8x16xf32>
    tpu.vector_store %arg9[%c0_101, %c0_102, %c0_103, %c0_104], %91 {strides = array<i32>} : memref<2x8x8x16xf32, #tpu.memory_space<vmem>>, vector<2x8x8x16xf32>,
    return
  }
}

</mosaic_0001>

<bundles_post_ra>
// kernel: scriptae_forward.1
= control target key start
LH: loop header
LB: loop body
LE: loop exit
PB: predicated region body
PF: predicated region fallthrough
CT: control target
= control target key end

     0   :  { %vm48_vm0 = vcmask 128000   ;;  %s3022_s15 = smov 16   ;;  %s3023_s16 = smov 32   ;;  %vm121_vm1 = vcmask 259200   ;;  %vm182_vm2 = vcmask 390400   ;;  %vm233_vm3 = vcmask 521600   ;;  %s5455_s0 = inlined_call_operand.vmem [shape: f32[2,8,8,16], index: 0, kind: input, shape index: {}]   ;;  %s5456_s1 = inlined_call_operand.vmem [shape: f32[144,8], index: 1, kind: input, shape index: {}]   ;;  %s5457_s3 = inlined_call_operand.vmem [shape: f32[1,8], index: 3, kind: input, shape index: {}]   ;;  %s5458_s4 = inlined_call_operand.vmem [shape: f32[1,8], index: 4, kind: input, shape index: {}]   ;;  %s5459_s5 = inlined_call_operand.vmem [shape: f32[1,8], index: 5, kind: input, shape index: {}]   ;;  %s5460_s6 = inlined_call_operand.vmem [shape: f32[1,8], index: 6, kind: input, shape index: {}]   ;;  %s5461_s2 = inlined_call_operand.vmem [shape: f32[1,8], index: 2, kind: input, shape index: {}]   ;;  %s5462_s7 = inlined_call_operand.vmem [shape: f32[72,16], index: 7, kind: input, shape index: {}]   ;;  %s5463_s8 = inlined_call_operand.vmem [shape: f32[1,16], index: 8, kind: input, shape index: {}]   ;;  %s5464_s9 = inlined_call_operand.vmem [shape: f32[2,8,8,16], index: 9, kind: output, shape index: {}]  }
   0x1   :  { %v33_v0 = vld [vmem:[%s5455_s0 + $0x8] sm:$0xff]  ;;  %v32_v1 = vld [vmem:[%s5455_s0] sm:$0xff]  ;;  %v34_v4 = vld [vmem:[%s5455_s0 + $0x10] sm:$0xff]  ;;  %s3024_s19 = smov 48   ;;  %s3025_s22 = smov 64   ;;  %vm284_vm4 = vcmask 652800  }
   0x2   :  { %v74_v2 = vrot.slane %v33_v0, 1  ;;  %v73_v3 = vrot.slane %v32_v1, 1  ;;  %49 = vst.msk [vmem:[#allocation2] sm:$0x3f] %vm48_vm0, %v32_v1  ;;  %v135_v5 = vrot.slane %v33_v0, 2  ;;  %v136_v6 = vrot.slane %v34_v4, 2 }
   0x3   :  { %50 = vst.msk [vmem:[#allocation2 + $0x10] sm:$0x3f] %vm48_vm0, %v33_v0  ;;  %v35_v7 = vld [vmem:[%s5455_s0 + $0x18] sm:$0xff]  ;;  %v134_v8 = vrot.slane %v32_v1, 2  ;;  %v36_v9 = vld [vmem:[%s5455_s0 + $0x20] sm:$0xff]  ;;  %v75_v11 = vrot.slane %v34_v4, 1 }
   0x4   :  { %87 = vrot.lane.b32.xlu1 %v74_v2, %s3022_s15  ;;  %85 = vrot.lane.b32.xlu0 %v73_v3, %s3022_s15  ;;  %51 = vst.msk [vmem:[#allocation2 + $0x20] sm:$0x3f] %vm48_vm0, %v34_v4  ;;  %v137_v10 = vrot.slane %v35_v7, 2  ;;  %s3026_s23 = smov 80   ;;  %s3027_s24 = smov 96   ;;  %v138_v12 = vrot.slane %v36_v9, 2 }
   0x5   :  { %464 = vst.msk [vmem:[#allocation2 + $0x8] sm:$0x3f] %vm48_vm0, %v136_v6  ;;  %148 = vrot.lane.b32.xlu2 %v135_v5, %s3023_s16  ;;  %s3028_s25 = smov 112   ;;  %v76_v13 = vrot.slane %v35_v7, 1  ;;  %v37_v14 = vld [vmem:[%s5455_s0 + $0x28] sm:$0xff]  ;;  %v77_v15 = vrot.slane %v36_v9, 1 }
   0x6   :  { %52 = vst.msk [vmem:[#allocation2 + $0x30] sm:$0x3f] %vm48_vm0, %v35_v7  ;;  %v39_v16 = vld [vmem:[%s5455_s0 + $0x38] sm:$0xff]  ;;  %v78_v18 = vrot.slane %v37_v14, 1  ;;  %v139_v19 = vrot.slane %v37_v14, 2  ;;  %v40_v20 = vld [vmem:[%s5455_s0 + $0x40] sm:$0xff] }
   0x7   :  { %53 = vst.msk [vmem:[#allocation2 + $0x40] sm:$0x3f] %vm48_vm0, %v36_v9  ;;  %v450_v17 = vrot.slane %v39_v16, 2  ;;  %v38_v21 = vld [vmem:[%s5455_s0 + $0x30] sm:$0xff]  ;;  %v3160_v22 = vld [vmem:[%s5455_s0 + $0x48] sm:$0xff]  ;;  %v79_v28 = vrot.slane %v40_v20, 1 }
   0x8   :  { %465 = vst.msk [vmem:[#allocation2 + $0x18] sm:$0x3f] %vm48_vm0, %v137_v10  ;;  %v297_v23 = vrot.slane %v38_v21, 2  ;;  %v246_v25 = vrot.slane %v38_v21, 1  ;;  %v3171_v26 = vld [vmem:[%s5455_s0 + $0x50] sm:$0xff]  ;;  %v515_v29 = vld [vmem:[%s5456_s1 + $0x78] sm:$0xff] }
   0x9   :  { %466 = vst.msk [vmem:[#allocation2 + $0x28] sm:$0x3f] %vm48_vm0, %v138_v12  ;;  %772 = vmatpush.msra.mxu0 %v515_v29  ;;  %v514_v30 = vld [vmem:[%s5456_s1 + $0x70] sm:$0xff]  ;;  %v513_v31 = vld [vmem:[%s5456_s1 + $0x68] sm:$0xff]  ;;  %v140_v33 = vrot.slane %v40_v20, 2  ;;  %v399_v34 = vrot.slane %v39_v16, 1 }
   0xa   :  { %54 = vst.msk [vmem:[#allocation2 + $0x50] sm:$0x3f] %vm48_vm0, %v37_v14  ;;  %v512_v35 = vld [vmem:[%s5456_s1 + $0x60] sm:$0xff]  ;;  %v511_v36 = vld [vmem:[%s5456_s1 + $0x58] sm:$0xff]  ;;  %v510_v38 = vld [vmem:[%s5456_s1 + $0x50] sm:$0xff]  ;;  %v141_v43 = vrot.slane %v3160_v22, 2 }
   0xb   :  { %469 = vst.msk [vmem:[#allocation2 + $0x58] sm:$0x3f] %vm48_vm0, %v450_v17  ;;  %773 = vmatpush.msra.mxu0 %v514_v30  ;;  %v3201_v37 = vld [vmem:[%s5455_s0 + $0x58] sm:$0xff]  ;;  %v509_v41 = vld [vmem:[%s5456_s1 + $0x48] sm:$0xff]  ;;  %v80_v44 = vrot.slane %v3160_v22, 1  ;;  %v508_v45 = vld [vmem:[%s5456_s1 + $0x40] sm:$0xff] }
   0xc   :  { %197 = vrot.lane.b32.xlu1 %v33_v0, %s3024_s19  ;;  %146 = vrot.lane.b32.xlu0 %v134_v8, %s3023_s16  ;;  %55 = vst.msk [vmem:[#allocation2 + $0x60] sm:$0x3f] %vm48_vm0, %v40_v20  ;;  %v507_v46 = vld [vmem:[%s5456_s1 + $0x38] sm:$0xff]  ;;  %v3229_v47 = vrot.slane %v3171_v26, 2  ;;  %v506_v48 = vld [vmem:[%s5456_s1 + $0x30] sm:$0xff]  ;;  %v81_v53 = vrot.slane %v3171_v26, 1 }
   0xd   :  { %248 = vrot.lane.b32.xlu2 %v74_v2, %s3025_s22  ;;  %467 = vst.msk [vmem:[#allocation2 + $0x38] sm:$0x3f] %vm48_vm0, %v139_v19  ;;  %774 = vmatpush.msra.mxu0 %v513_v31  ;;  %v505_v51 = vld [vmem:[%s5456_s1 + $0x28] sm:$0xff]  ;;  %v504_v54 = vld [vmem:[%s5456_s1 + $0x20] sm:$0xff]  ;;  %v503_v55 = vld [vmem:[%s5456_s1 + $0x18] sm:$0xff]  ;;  %v3256_v56 = vrot.slane %v3201_v37, 2 }
   0xe   :  { %56 = vst.msk [vmem:[#allocation2 + $0x70] sm:$0x3f] %vm48_vm0, %v3160_v22  ;;  %vm335_vm5 = vcmask 784000   ;;  %v502_v57 = vld [vmem:[%s5456_s1 + $0x10] sm:$0xff]  ;;  %v501_v60 = vld [vmem:[%s5456_s1 + $0x8] sm:$0xff]  ;;  %v500_v63 = vld [vmem:[%s5456_s1] sm:$0xff] }
   0xf   :  { %468 = vst.msk [vmem:[#allocation2 + $0x48] sm:$0x3f] %vm48_vm0, %v297_v23  ;;  %775 = vmatpush.msra.mxu0 %v512_v35  ;;  %v517_v61 = vld [vmem:[%s5456_s1 + $0x88] sm:$0xff]  ;;  %v516_v0 = vld [vmem:[%s5456_s1 + $0x80] sm:$0xff]  ;;  %vm386_vm6 = vcmask 915200   ;;  %vm437_vm7 = vcmask 1046400  }
  0x10   :  { %57 = vst.msk [vmem:[#allocation2 + $0x80] sm:$0x3f] %vm48_vm0, %v3171_v26  ;;  %830 = vmatpush.msra.mxu1 %v517_v61  ;;  %v3287_v1 = vld [vmem:[%s5455_s0 + $0x60] sm:$0xff]  ;;  %vm557_vm8 = vcmask 1041408   ;;  %vm559_vm9 = vcmask 1043458   ;;  %vm562_vm10 = vcmask 1045508  }
  0x11   :  { %776 = vmatpush.msra.mxu0 %v511_v36  ;;  %58 = vst.msk [vmem:[#allocation2 + $0x90] sm:$0x3f] %vm48_vm0, %v3201_v37  ;;  %v3327_v20 = vld [vmem:[%s5455_s0 + $0x68] sm:$0xff]  ;;  %vm753_vm11 = vcmask 130048   ;;  %v481_v36 = vld [vmem:[#allocation2 + $0x28] sm:$0x3f] }
  0x12   :  { %470 = vst.msk [vmem:[#allocation2 + $0x68] sm:$0x3f] %vm48_vm0, %v3229_v47  ;;  %831 = vmatpush.msra.mxu1 %v516_v0  ;;  %vm988_vm12 = vcmask 62464   ;;  %s3033_s30 = smov 40   ;;  %s3034_s10 = smov 56  }
  0x13   :  { %777 = vmatpush.msra.mxu0 %v510_v38  ;;  %471 = vst.msk [vmem:[#allocation2 + $0x78] sm:$0x3f] %vm48_vm0, %v3256_v56 }
  0x14   :  { %299 = vrot.lane.b32.xlu1 %v135_v5, %s3026_s23  ;;  %199 = vrot.lane.b32.xlu0 %v34_v4, %s3024_s19  ;;  %59 = vst.msk [vmem:[#allocation2 + $0xa0] sm:$0x3f] %vm48_vm0, %v3287_v1  ;;  %v82_v5 = vrot.slane %v3201_v37, 1  ;;  %v483_v61 = vld [vmem:[#allocation2 + $0x38] sm:$0x3f] }
  0x15   :  { %250 = vrot.lane.b32.xlu2 %v75_v11, %s3025_s22  ;;  %778 = vmatpush.msra.mxu0 %v509_v41  ;;  %60 = vst.msk [vmem:[#allocation2 + $0xb0] sm:$0x3f] %vm48_vm0, %v3327_v20 }
  0x17   :  { %779 = vmatpush.msra.mxu0 %v508_v45 }
  0x19   :  { %780 = vmatpush.msra.mxu0 %v507_v46 }
  0x1b   :  { %781 = vmatpush.msra.mxu0 %v506_v48 }
  0x1c   :  { %301 = vrot.lane.b32.xlu1 %v136_v6, %s3026_s23  ;;  %350 = vrot.lane.b32.xlu0 %v34_v4, %s3027_s24 }
  0x1d   :  { %401 = vrot.lane.b32.xlu2 %v75_v11, %s3028_s25  ;;  %782 = vmatpush.msra.mxu0 %v505_v51  ;;  %v3377_v51 = vld [vmem:[%s5455_s0 + $0x70] sm:$0xff] }
  0x1f   :  { %783 = vmatpush.msra.mxu0 %v504_v54 }
  0x21   :  { %784 = vmatpush.msra.mxu0 %v503_v55 }
  0x23   :  { %785 = vmatpush.msra.mxu0 %v502_v57 }
  0x24   :  { %89 = vrot.lane.b32.xlu1 %v75_v11, %s3022_s15  ;;  %352 = vrot.lane.b32.xlu0 %v35_v7, %s3027_s24 }
  0x25   :  { %403 = vrot.lane.b32.xlu2 %v76_v13, %s3028_s25  ;;  %786 = vmatpush.msra.mxu0 %v501_v60 }
  0x27   :  { %787 = vmatpush.msra.mxu0 %v500_v63 }
  0x2c   :  { %201 = vrot.lane.b32.xlu1 %v35_v7, %s3024_s19  ;;  %150 = vrot.lane.b32.xlu0 %v136_v6, %s3023_s16  ;;  %v477_v6 = vld [vmem:[#allocation2 + $0x8] sm:$0x3f]  ;;  %v3307_v7 = vrot.slane %v3287_v1, 2 }
  0x2d   :  { %252 = vrot.lane.b32.xlu2 %v76_v13, %s3025_s22  ;;  %v545_v8 = vrot.slane %v477_v6, 6  ;;  %v247_v6 = vrot.slane %v3377_v51, 1 }
  0x2e   :  { %472 = vst.msk [vmem:[#allocation2 + $0x88] sm:$0x3f] %vm48_vm0, %v3307_v7 }
  0x34   :  { %354 = vrot.lane.b32.xlu1 %v36_v9, %s3027_s24  ;;  %303 = vrot.lane.b32.xlu0 %v137_v10, %s3026_s23 }
  0x35   :  { %405 = vrot.lane.b32.xlu2 %v77_v15, %s3028_s25 }
  0x3c   :  { %152 = vrot.lane.b32.xlu1 %v137_v10, %s3023_s16  ;;  %91 = vrot.lane.b32.xlu0 %v76_v13, %s3022_s15 }
  0x3d   :  { %203 = vrot.lane.b32.xlu2 %v36_v9, %s3024_s19 }
  0x44   :  { %305 = vrot.lane.b32.xlu1 %v138_v12, %s3026_s23  ;;  %254 = vrot.lane.b32.xlu0 %v77_v15, %s3025_s22 }
  0x45   :  { %356 = vrot.lane.b32.xlu2 %v37_v14, %s3027_s24 }
  0x4c   :  { %93 = vrot.lane.b32.xlu1 %v77_v15, %s3022_s15  ;;  %407 = vrot.lane.b32.xlu0 %v78_v18, %s3028_s25 }
  0x4d   :  { %154 = vrot.lane.b32.xlu2 %v138_v12, %s3023_s16 }
  0x54   :  { %205 = vrot.lane.b32.xlu1 %v37_v14, %s3024_s19  ;;  %95 = vrot.lane.b32.xlu0 %v78_v18, %s3022_s15 }
  0x55   :  { %156 = vrot.lane.b32.xlu2 %v139_v19, %s3023_s16 }
  0x5c   :  { %207 = vrot.lane.b32.xlu1 %v38_v21, %s3024_s19  ;;  %256 = vrot.lane.b32.xlu0 %v78_v18, %s3025_s22 }
  0x5d   :  { %307 = vrot.lane.b32.xlu2 %v139_v19, %s3026_s23 }
  0x5f   :  { %v149_v24 = vpop.permute.xlu2 %148 }
  0x64   :  { %358 = vrot.lane.b32.xlu1 %v38_v21, %s3027_s24  ;;  %258 = vrot.lane.b32.xlu0 %v246_v25, %s3025_s22 }
  0x65   :  { %309 = vrot.lane.b32.xlu2 %v297_v23, %s3026_s23 }
  0x67   :  { %v249_v27 = vpop.permute.xlu2 %248 }
  0x6c   :  { %360 = vrot.lane.b32.xlu1 %v39_v16, %s3027_s24  ;;  %409 = vrot.lane.b32.xlu0 %v246_v25, %s3028_s25  ;;  %v479_v16 = vld [vmem:[#allocation2 + $0x18] sm:$0x3f] }
  0x6d   :  { %97 = vrot.lane.b32.xlu2 %v79_v28, %s3022_s15  ;;  %v546_v19 = vrot.slane %v479_v16, 6 }
  0x6f   :  { %v3190_v32 = vpop.permute.xlu2 %250 }
  0x74   :  { %158 = vrot.lane.b32.xlu1 %v140_v33, %s3023_s16  ;;  %411 = vrot.lane.b32.xlu0 %v399_v34, %s3028_s25  ;;  %v83_v33 = vrot.slane %v3287_v1, 1 }
  0x75   :  { %209 = vrot.lane.b32.xlu2 %v3160_v22, %s3024_s19 }
  0x76   :  { %v88_v39 = vpop.permute.xlu1 %87  ;;  %v86_v40 = vpop.permute.xlu0 %85 }
  0x77   :  { %123 = vst.msk [vmem:[#allocation2 + $0x10] sm:$0x3f] %vm121_vm1, %v88_v39  ;;  %v3216_v42 = vpop.permute.xlu2 %401 }
  0x78   :  { %122 = vst.msk [vmem:[#allocation2] sm:$0x3f] %vm121_vm1, %v86_v40 }
  0x79   :  { %184 = vst.msk [vmem:[#allocation2 + $0x10] sm:$0x3f] %vm182_vm2, %v149_v24 }
  0x7c   :  { %311 = vrot.lane.b32.xlu1 %v141_v43, %s3026_s23  ;;  %260 = vrot.lane.b32.xlu0 %v80_v44, %s3025_s22 }
  0x7d   :  { %362 = vrot.lane.b32.xlu2 %v3171_v26, %s3027_s24 }
  0x7e   :  { %v198_v49 = vpop.permute.xlu1 %197  ;;  %v147_v50 = vpop.permute.xlu0 %146 }
  0x7f   :  { %183 = vst.msk [vmem:[#allocation2] sm:$0x3f] %vm182_vm2, %v147_v50  ;;  %v3244_v52 = vpop.permute.xlu2 %403  ;;  %v84_v50 = vrot.slane %v3327_v20, 1 }
  0x80   :  { %234 = vst.msk [vmem:[#allocation2] sm:$0x3f] %vm233_vm3, %v198_v49 }
  0x81   :  { %285 = vst.msk [vmem:[#allocation2] sm:$0x3f] %vm284_vm4, %v249_v27 }
  0x84   :  { %99 = vrot.lane.b32.xlu1 %v80_v44, %s3022_s15  ;;  %413 = vrot.lane.b32.xlu0 %v81_v53, %s3028_s25 }
  0x85   :  { %160 = vrot.lane.b32.xlu2 %v141_v43, %s3023_s16 }
  0x86   :  { %v300_v58 = vpop.permute.xlu1 %299  ;;  %v200_v59 = vpop.permute.xlu0 %199 }
  0x87   :  { %336 = vst.msk [vmem:[#allocation2] sm:$0x3f] %vm335_vm5, %v300_v58  ;;  %v3273_v62 = vpop.permute.xlu2 %252 }
  0x88   :  { %235 = vst.msk [vmem:[#allocation2 + $0x10] sm:$0x3f] %vm233_vm3, %v200_v59 }
  0x89   :  { %286 = vst.msk [vmem:[#allocation2 + $0x10] sm:$0x3f] %vm284_vm4, %v3190_v32 }
  0x8c   :  { %262 = vrot.lane.b32.xlu1 %v81_v53, %s3025_s22  ;;  %211 = vrot.lane.b32.xlu0 %v3171_v26, %s3024_s19 }
  0x8d   :  { %313 = vrot.lane.b32.xlu2 %v3229_v47, %s3026_s23 }
  0x8e   :  { %v302_v2 = vpop.permute.xlu1 %301  ;;  %v351_v3 = vpop.permute.xlu0 %350 }
  0x8f   :  { %337 = vst.msk [vmem:[#allocation2 + $0x10] sm:$0x3f] %vm335_vm5, %v302_v2  ;;  %v3297_v4 = vpop.permute.xlu2 %405 }
  0x90   :  { %387 = vst.msk [vmem:[#allocation2] sm:$0x3f] %vm386_vm6, %v351_v3 }
  0x91   :  { %438 = vst.msk [vmem:[#allocation2] sm:$0x3f] %vm437_vm7, %v3216_v42 }
  0x94   :  { %415 = vrot.lane.b32.xlu1 %v82_v5, %s3028_s25  ;;  %364 = vrot.lane.b32.xlu0 %v3201_v37, %s3027_s24 }
  0x95   :  { %101 = vrot.lane.b32.xlu2 %v81_v53, %s3022_s15  ;;  %v298_v53 = vrot.slane %v3377_v51, 2 }
  0x96   :  { %v90_v9 = vpop.permute.xlu1 %89  ;;  %v353_v10 = vpop.permute.xlu0 %352 }
  0x97   :  { %124 = vst.msk [vmem:[#allocation2 + $0x20] sm:$0x3f] %vm121_vm1, %v90_v9  ;;  %v204_v11 = vpop.permute.xlu2 %203 }
  0x98   :  { %v476_v12 = vld [vmem:[#allocation2] sm:$0x3f]  ;;  %388 = vst.msk [vmem:[#allocation2 + $0x10] sm:$0x3f] %vm386_vm6, %v353_v10 }
  0x99   :  { %v558_v13 = vsel %vm557_vm8, %v476_v12, %v545_v8  ;;  %v560_v14 = vsel %vm559_vm9, %v476_v12, %v545_v8  ;;  %v563_v15 = vsel %vm562_vm10, %v476_v12, %v545_v8  ;;  %439 = vst.msk [vmem:[#allocation2 + $0x10] sm:$0x3f] %vm437_vm7, %v3244_v52  ;;  %v145_v52 = vrot.slane %v3327_v20, 2 }
  0x9a   :  { %v561_v17 = vrot.slane %v560_v14, 2  ;;  %v564_v18 = vrot.slane %v563_v15, 4  ;;  %622 = vst [vmem:[#allocation1] ss:$4 sm:$0xff] %v558_v13 }
  0x9b   :  { %473 = vst.msk [vmem:[#allocation2 + $0x98] sm:$0x3f] %vm48_vm0, %v145_v52 }
  0x9c   :  { %624 = vst [vmem:[#allocation1 + $0x1] ss:$4 sm:$0xff] %v561_v17  ;;  %103 = vrot.lane.b32.xlu1 %v82_v5, %s3022_s15  ;;  %162 = vrot.lane.b32.xlu0 %v3229_v47, %s3023_s16 }
  0x9d   :  { %626 = vst [vmem:[#allocation1 + $0x2] ss:$4 sm:$0xff] %v564_v18  ;;  %213 = vrot.lane.b32.xlu2 %v3201_v37, %s3024_s19  ;;  %v547_v37 = vrot.slane %v481_v36, 6 }
  0x9e   :  { %v202_v21 = vpop.permute.xlu1 %201  ;;  %v151_v22 = vpop.permute.xlu0 %150  ;;  %474 = vst.msk [vmem:[#allocation2 + $0xa8] sm:$0x3f] %vm48_vm0, %v298_v53 }
  0x9f   :  { %185 = vst.msk [vmem:[#allocation2 + $0x20] sm:$0x3f] %vm182_vm2, %v151_v22  ;;  %v3332_v23 = vpop.permute.xlu2 %356 }
  0xa0   :  { %v478_v24 = vld [vmem:[#allocation2 + $0x10] sm:$0x3f]  ;;  %236 = vst.msk [vmem:[#allocation2 + $0x20] sm:$0x3f] %vm233_vm3, %v202_v21  ;;  %v485_v21 = vld [vmem:[#allocation2 + $0x48] sm:$0x3f] }
  0xa1   :  { %v565_v25 = vsel %vm557_vm8, %v478_v24, %v546_v19  ;;  %v566_v26 = vsel %vm559_vm9, %v478_v24, %v546_v19  ;;  %v568_v27 = vsel %vm562_vm10, %v478_v24, %v546_v19  ;;  %287 = vst.msk [vmem:[#allocation2 + $0x20] sm:$0x3f] %vm284_vm4, %v3273_v62  ;;  %v548_v62 = vrot.slane %v483_v61, 6 }
  0xa2   :  { %v567_v28 = vrot.slane %v566_v26, 2  ;;  %v569_v29 = vrot.slane %v568_v27, 4  ;;  %628 = vst [vmem:[#allocation1 + $0x3] ss:$4 sm:$0xff] %v565_v25  ;;  %v549_v22 = vrot.slane %v485_v21, 6 }
  0xa3   :  { %v493_v21 = vld [vmem:[#allocation2 + $0x88] sm:$0x3f] }
  0xa4   :  { %630 = vst [vmem:[#allocation1 + $0x20] ss:$4 sm:$0xff] %v567_v28  ;;  %264 = vrot.lane.b32.xlu1 %v82_v5, %s3025_s22  ;;  %164 = vrot.lane.b32.xlu0 %v3256_v56, %s3023_s16 }
  0xa5   :  { %632 = vst [vmem:[#allocation1 + $0x21] ss:$4 sm:$0xff] %v569_v29  ;;  %215 = vrot.lane.b32.xlu2 %v3287_v1, %s3024_s19 }
  0xa6   :  { %v355_v30 = vpop.permute.xlu1 %354  ;;  %v304_v31 = vpop.permute.xlu0 %303 }
  0xa7   :  { %338 = vst.msk [vmem:[#allocation2 + $0x20] sm:$0x3f] %vm335_vm5, %v304_v31  ;;  %v3346_v32 = vpop.permute.xlu2 %154 }
  0xa8   :  { %389 = vst.msk [vmem:[#allocation2 + $0x20] sm:$0x3f] %vm386_vm6, %v355_v30  ;;  %v487_v30 = vld [vmem:[#allocation2 + $0x58] sm:$0x3f] }
  0xa9   :  { %v637_v34 = vld.sshfl [vmem:[#allocation1] sm:$0xff pattern:$0x73625140]  ;;  %v638_v35 = vld.sshfl [vmem:[#allocation1 + $0x8] sm:$0xff pattern:$0x73625140] }
  0xaa   :  { %440 = vst.msk [vmem:[#allocation2 + $0x20] sm:$0x3f] %vm437_vm7, %v3297_v4  ;;  %788 = vmatmul.f32.vlgmr.msra.gmra.mxu0 %v637_v34  ;;  %2963 = vmatmul.msk.f32.vlgmr.msra.gmra.mxu1 %vm753_vm11, %v638_v35 }
  0xac   :  { %266 = vrot.lane.b32.xlu1 %v83_v33, %s3025_s22  ;;  %315 = vrot.lane.b32.xlu0 %v3256_v56, %s3026_s23  ;;  %v47_v56 = vld [vmem:[%s5455_s0 + $0x78] sm:$0xff] }
  0xad   :  { %366 = vrot.lane.b32.xlu2 %v3287_v1, %s3027_s24  ;;  %v451_v59 = vrot.slane %v47_v56, 2  ;;  %v400_v17 = vrot.slane %v47_v56, 1 }
  0xae   :  { %v153_v38 = vpop.permute.xlu1 %152  ;;  %v92_v39 = vpop.permute.xlu0 %91 }
  0xaf   :  { %125 = vst.msk [vmem:[#allocation2 + $0x30] sm:$0x3f] %vm121_vm1, %v92_v39  ;;  %v3359_v40 = vpop.permute.xlu2 %156 }
  0xb0   :  { %186 = vst.msk [vmem:[#allocation2 + $0x30] sm:$0x3f] %vm182_vm2, %v153_v38 }
  0xb1   :  { %v480_v41 = vld [vmem:[#allocation2 + $0x20] sm:$0x3f]  ;;  %237 = vst.msk [vmem:[#allocation2 + $0x30] sm:$0x3f] %vm233_vm3, %v204_v11 }
  0xb2   :  { %v570_v42 = vsel %vm557_vm8, %v480_v41, %v547_v37  ;;  %v571_v43 = vsel %vm559_vm9, %v480_v41, %v547_v37  ;;  %v573_v44 = vsel %vm562_vm10, %v480_v41, %v547_v37  ;;  %475 = vst.msk [vmem:[#allocation2 + $0xb8] sm:$0x3f] %vm48_vm0, %v451_v59 }
  0xb3   :  { %v572_v45 = vrot.slane %v571_v43, 2  ;;  %v574_v46 = vrot.slane %v573_v44, 4  ;;  %634 = vst [vmem:[#allocation1 + $0x22] ss:$4 sm:$0xff] %v570_v42 }
  0xb4   :  { %417 = vrot.lane.b32.xlu1 %v83_v33, %s3028_s25  ;;  %317 = vrot.lane.b32.xlu0 %v3307_v7, %s3026_s23 }
  0xb5   :  { %636 = vst [vmem:[#allocation1 + $0x23] ss:$4 sm:$0xff] %v572_v45  ;;  %368 = vrot.lane.b32.xlu2 %v3327_v20, %s3027_s24 }
  0xb6   :  { %641 = vst [vmem:[#allocation1] ss:$4 sm:$0xff] %v574_v46  ;;  %v306_v47 = vpop.permute.xlu1 %305  ;;  %v255_v48 = vpop.permute.xlu0 %254 }
  0xb7   :  { %288 = vst.msk [vmem:[#allocation2 + $0x30] sm:$0x3f] %vm284_vm4, %v255_v48  ;;  %v308_v49 = vpop.permute.xlu2 %307  ;;  %v489_v48 = vld [vmem:[#allocation2 + $0x68] sm:$0x3f] }
  0xb8   :  { %339 = vst.msk [vmem:[#allocation2 + $0x30] sm:$0x3f] %vm335_vm5, %v306_v47 }
  0xb9   :  { %390 = vst.msk [vmem:[#allocation2 + $0x30] sm:$0x3f] %vm386_vm6, %v3332_v23 }
  0xbc   :  { %v639_v54 = vld.sshfl [vmem:[#allocation1 + $0x20] sm:$0xff pattern:$0x73625140]  ;;  %v640_v55 = vld.sshfl [vmem:[#allocation1 + $0x28] sm:$0xff pattern:$0x73625140]  ;;  %419 = vrot.lane.b32.xlu1 %v84_v50, %s3028_s25  ;;  %105 = vrot.lane.b32.xlu0 %v83_v33, %s3022_s15 }
  0xbd   :  { %791 = vmatmul.f32.gmra.mxu0 %v639_v54  ;;  %2964 = vmatmul.msk.f32.gmra.mxu1 %vm753_vm11, %v640_v55  ;;  %v550_v33 = vrot.slane %v487_v30, 6  ;;  %v495_v30 = vld [vmem:[#allocation2 + $0x98] sm:$0x3f] }
  0xbe   :  { %v94_v57 = vpop.permute.xlu1 %93  ;;  %v408_v58 = vpop.permute.xlu0 %407  ;;  %166 = vrot.lane.b32.xlu2 %v3307_v7, %s3023_s16 }
  0xbf   :  { %126 = vst.msk [vmem:[#allocation2 + $0x40] sm:$0x3f] %vm121_vm1, %v94_v57  ;;  %v310_v60 = vpop.permute.xlu2 %309 }
  0xc0   :  { %441 = vst.msk [vmem:[#allocation2 + $0x30] sm:$0x3f] %vm437_vm7, %v408_v58 }
  0xc1   :  { %187 = vst.msk [vmem:[#allocation2 + $0x40] sm:$0x3f] %vm182_vm2, %v3346_v32 }
  0xc4   :  { %217 = vrot.lane.b32.xlu0 %v3327_v20, %s3024_s19  ;;  %268 = vrot.lane.b32.xlu1 %v84_v50, %s3025_s22 }
  0xc6   :  { %v206_v63 = vpop.permute.xlu1 %205  ;;  %v96_v0 = vpop.permute.xlu0 %95  ;;  %319 = vrot.lane.b32.xlu2 %v145_v52, %s3026_s23 }
  0xc7   :  { %v482_v1 = vld [vmem:[#allocation2 + $0x30] sm:$0x3f]  ;;  %238 = vst.msk [vmem:[#allocation2 + $0x40] sm:$0x3f] %vm233_vm3, %v206_v63  ;;  %v98_v2 = vpop.permute.xlu2 %97 }
  0xc8   :  { %v575_v3 = vsel %vm557_vm8, %v482_v1, %v548_v62  ;;  %v576_v4 = vsel %vm559_vm9, %v482_v1, %v548_v62  ;;  %v578_v5 = vsel %vm562_vm10, %v482_v1, %v548_v62  ;;  %127 = vst.msk [vmem:[#allocation2 + $0x50] sm:$0x3f] %vm121_vm1, %v96_v0  ;;  %v491_v62 = vld [vmem:[#allocation2 + $0x78] sm:$0x3f] }
  0xc9   :  { %v577_v7 = vrot.slane %v576_v4, 2  ;;  %v579_v8 = vrot.slane %v578_v5, 4  ;;  %642 = vst [vmem:[#allocation1 + $0x1] ss:$4 sm:$0xff] %v575_v3  ;;  %v552_v1 = vrot.slane %v491_v62, 6 }
  0xca   :  { %188 = vst.msk [vmem:[#allocation2 + $0x50] sm:$0x3f] %vm182_vm2, %v3359_v40 }
  0xcb   :  { %643 = vst [vmem:[#allocation1 + $0x2] ss:$4 sm:$0xff] %v577_v7 }
  0xcc   :  { %644 = vst [vmem:[#allocation1 + $0x3] ss:$4 sm:$0xff] %v579_v8  ;;  %370 = vrot.lane.b32.xlu0 %v3377_v51, %s3027_s24  ;;  %421 = vrot.lane.b32.xlu1 %v247_v6, %s3028_s25 }
  0xcd   :  { %128 = vst.msk [vmem:[#allocation2 + $0x60] sm:$0x3f] %vm121_vm1, %v98_v2 }
  0xce   :  { %v208_v9 = vpop.permute.xlu1 %207  ;;  %v257_v10 = vpop.permute.xlu0 %256  ;;  %107 = vrot.lane.b32.xlu2 %v84_v50, %s3022_s15 }
  0xcf   :  { %239 = vst.msk [vmem:[#allocation2 + $0x50] sm:$0x3f] %vm233_vm3, %v208_v9  ;;  %v210_v11 = vpop.permute.xlu2 %209 }
  0xd0   :  { %289 = vst.msk [vmem:[#allocation2 + $0x40] sm:$0x3f] %vm284_vm4, %v257_v10 }
  0xd1   :  { %340 = vst.msk [vmem:[#allocation2 + $0x40] sm:$0x3f] %vm335_vm5, %v308_v49  ;;  %v551_v49 = vrot.slane %v489_v48, 6 }
  0xd3   :  { %v649_v12 = vld.sshfl [vmem:[#allocation1] sm:$0xff pattern:$0x73625140]  ;;  %v650_v13 = vld.sshfl [vmem:[#allocation1 + $0x8] sm:$0xff pattern:$0x73625140] }
  0xd4   :  { %794 = vmatmul.f32.gmra.mxu0 %v649_v12  ;;  %2965 = vmatmul.msk.f32.gmra.mxu1 %vm753_vm11, %v650_v13 }
  0xd5   :  { %168 = vrot.lane.b32.xlu0 %v145_v52, %s3023_s16  ;;  %219 = vrot.lane.b32.xlu1 %v3377_v51, %s3024_s19 }
  0xd6   :  { %v359_v14 = vpop.permute.xlu1 %358  ;;  %v259_v15 = vpop.permute.xlu0 %258  ;;  %270 = vrot.lane.b32.xlu2 %v247_v6, %s3025_s22 }
  0xd7   :  { %391 = vst.msk [vmem:[#allocation2 + $0x40] sm:$0x3f] %vm386_vm6, %v359_v14  ;;  %v363_v16 = vpop.permute.xlu2 %362 }
  0xd8   :  { %290 = vst.msk [vmem:[#allocation2 + $0x50] sm:$0x3f] %vm284_vm4, %v259_v15 }
  0xd9   :  { %341 = vst.msk [vmem:[#allocation2 + $0x50] sm:$0x3f] %vm335_vm5, %v310_v60 }
  0xdd   :  { %321 = vrot.lane.b32.xlu0 %v298_v53, %s3026_s23  ;;  %372 = vrot.lane.b32.xlu1 %v47_v56, %s3027_s24 }
  0xde   :  { %v361_v18 = vpop.permute.xlu1 %360  ;;  %v410_v19 = vpop.permute.xlu0 %409  ;;  %423 = vrot.lane.b32.xlu2 %v400_v17, %s3028_s25 }
  0xdf   :  { %392 = vst.msk [vmem:[#allocation2 + $0x50] sm:$0x3f] %vm386_vm6, %v361_v18  ;;  %v161_v20 = vpop.permute.xlu2 %160 }
  0xe0   :  { %442 = vst.msk [vmem:[#allocation2 + $0x40] sm:$0x3f] %vm437_vm7, %v410_v19 }
  0xe6   :  { %v159_v23 = vpop.permute.xlu1 %158  ;;  %v412_v24 = vpop.permute.xlu0 %411 }
  0xe7   :  { %v484_v25 = vld [vmem:[#allocation2 + $0x40] sm:$0x3f]  ;;  %189 = vst.msk [vmem:[#allocation2 + $0x60] sm:$0x3f] %vm182_vm2, %v159_v23  ;;  %v314_v26 = vpop.permute.xlu2 %313 }
  0xe8   :  { %v580_v27 = vsel %vm557_vm8, %v484_v25, %v549_v22  ;;  %v581_v28 = vsel %vm559_vm9, %v484_v25, %v549_v22  ;;  %v583_v29 = vsel %vm562_vm10, %v484_v25, %v549_v22  ;;  %443 = vst.msk [vmem:[#allocation2 + $0x50] sm:$0x3f] %vm437_vm7, %v412_v24  ;;  %v553_v22 = vrot.slane %v493_v21, 6 }
  0xe9   :  { %v582_v31 = vrot.slane %v581_v28, 2  ;;  %v584_v32 = vrot.slane %v583_v29, 4  ;;  %645 = vst [vmem:[#allocation1 + $0x20] ss:$4 sm:$0xff] %v580_v27 }
  0xea   :  { %240 = vst.msk [vmem:[#allocation2 + $0x60] sm:$0x3f] %vm233_vm3, %v210_v11 }
  0xeb   :  { %646 = vst [vmem:[#allocation1 + $0x21] ss:$4 sm:$0xff] %v582_v31 }
  0xec   :  { %647 = vst [vmem:[#allocation1 + $0x22] ss:$4 sm:$0xff] %v584_v32 }
  0xee   :  { %v312_v34 = vpop.permute.xlu1 %311  ;;  %v261_v35 = vpop.permute.xlu0 %260 }
  0xef   :  { %v486_v36 = vld [vmem:[#allocation2 + $0x50] sm:$0x3f]  ;;  %291 = vst.msk [vmem:[#allocation2 + $0x60] sm:$0x3f] %vm284_vm4, %v261_v35  ;;  %v102_v37 = vpop.permute.xlu2 %101 }
  0xf0   :  { %v585_v38 = vsel %vm557_vm8, %v486_v36, %v550_v33  ;;  %v586_v39 = vsel %vm559_vm9, %v486_v36, %v550_v33  ;;  %v588_v40 = vsel %vm562_vm10, %v486_v36, %v550_v33  ;;  %342 = vst.msk [vmem:[#allocation2 + $0x60] sm:$0x3f] %vm335_vm5, %v312_v34  ;;  %v554_v33 = vrot.slane %v495_v30, 6 }
  0xf1   :  { %v587_v41 = vrot.slane %v586_v39, 2  ;;  %v589_v42 = vrot.slane %v588_v40, 4  ;;  %648 = vst [vmem:[#allocation1 + $0x23] ss:$4 sm:$0xff] %v585_v38 }
  0xf2   :  { %393 = vst.msk [vmem:[#allocation2 + $0x60] sm:$0x3f] %vm386_vm6, %v363_v16 }
  0xf3   :  { %653 = vst [vmem:[#allocation1] ss:$4 sm:$0xff] %v587_v41 }
  0xf4   :  { %654 = vst [vmem:[#allocation1 + $0x1] ss:$4 sm:$0xff] %v589_v42 }
  0xf5   :  { %130 = vst.msk [vmem:[#allocation2 + $0x80] sm:$0x3f] %vm121_vm1, %v102_v37 }
  0xf6   :  { %v100_v43 = vpop.permute.xlu1 %99  ;;  %v414_v44 = vpop.permute.xlu0 %413 }
  0xf7   :  { %129 = vst.msk [vmem:[#allocation2 + $0x70] sm:$0x3f] %vm121_vm1, %v100_v43  ;;  %v214_v45 = vpop.permute.xlu2 %213 }
  0xf8   :  { %v651_v46 = vld.sshfl [vmem:[#allocation1 + $0x20] sm:$0xff pattern:$0x73625140]  ;;  %v652_v47 = vld.sshfl [vmem:[#allocation1 + $0x28] sm:$0xff pattern:$0x73625140] }
  0xf9   :  { %444 = vst.msk [vmem:[#allocation2 + $0x60] sm:$0x3f] %vm437_vm7, %v414_v44  ;;  %797 = vmatmul.f32.gmra.mxu0 %v651_v46  ;;  %2966 = vmatmul.msk.f32.gmra.mxu1 %vm753_vm11, %v652_v47  ;;  %v497_v46 = vld [vmem:[#allocation2 + $0xa8] sm:$0x3f] }
  0xfa   :  { %190 = vst.msk [vmem:[#allocation2 + $0x70] sm:$0x3f] %vm182_vm2, %v161_v20  ;;  %v555_v48 = vrot.slane %v497_v46, 6 }
  0xfe   :  { %v263_v50 = vpop.permute.xlu1 %262  ;;  %v212_v51 = vpop.permute.xlu0 %211 }
  0xff   :  { %241 = vst.msk [vmem:[#allocation2 + $0x70] sm:$0x3f] %vm233_vm3, %v212_v51  ;;  %v216_v52 = vpop.permute.xlu2 %215 }
 0x100   :  { %v488_v53 = vld [vmem:[#allocation2 + $0x60] sm:$0x3f]  ;;  %292 = vst.msk [vmem:[#allocation2 + $0x70] sm:$0x3f] %vm284_vm4, %v263_v50 }
 0x101   :  { %v590_v54 = vsel %vm557_vm8, %v488_v53, %v551_v49  ;;  %v591_v55 = vsel %vm559_vm9, %v488_v53, %v551_v49  ;;  %v593_v56 = vsel %vm562_vm10, %v488_v53, %v551_v49  ;;  %343 = vst.msk [vmem:[#allocation2 + $0x70] sm:$0x3f] %vm335_vm5, %v314_v26 }
 0x102   :  { %v592_v57 = vrot.slane %v591_v55, 2  ;;  %v594_v58 = vrot.slane %v593_v56, 4  ;;  %655 = vst [vmem:[#allocation1 + $0x2] ss:$4 sm:$0xff] %v590_v54 }
 0x104   :  { %656 = vst [vmem:[#allocation1 + $0x3] ss:$4 sm:$0xff] %v592_v57  ;;  %v3502_v57 = vld [vmem:[%s5461_s2] ss:$0 sm:$0xff] }
 0x105   :  { %657 = vst [vmem:[#allocation1 + $0x20] ss:$4 sm:$0xff] %v594_v58  ;;  %v3509_v62 = vrot.slane %v3502_v57, 4 }
 0x106   :  { %v416_v59 = vpop.permute.xlu1 %415  ;;  %v365_v60 = vpop.permute.xlu0 %364 }
 0x107   :  { %394 = vst.msk [vmem:[#allocation2 + $0x70] sm:$0x3f] %vm386_vm6, %v365_v60  ;;  %v367_v61 = vpop.permute.xlu2 %366 }
 0x108   :  { %445 = vst.msk [vmem:[#allocation2 + $0x70] sm:$0x3f] %vm437_vm7, %v416_v59 }
 0x10b   :  { %v661_v63 = vld.sshfl [vmem:[#allocation1] sm:$0xff pattern:$0x73625140]  ;;  %v662_v0 = vld.sshfl [vmem:[#allocation1 + $0x8] sm:$0xff pattern:$0x73625140] }
 0x10c   :  { %800 = vmatmul.f32.gmra.mxu0 %v661_v63  ;;  %2967 = vmatmul.msk.f32.gmra.mxu1 %vm753_vm11, %v662_v0  ;;  %v499_v63 = vld [vmem:[#allocation2 + $0xb8] sm:$0x3f] }
 0x10e   :  { %v104_v2 = vpop.permute.xlu1 %103  ;;  %v163_v3 = vpop.permute.xlu0 %162 }
 0x10f   :  { %v490_v4 = vld [vmem:[#allocation2 + $0x70] sm:$0x3f]  ;;  %131 = vst.msk [vmem:[#allocation2 + $0x90] sm:$0x3f] %vm121_vm1, %v104_v2  ;;  %v369_v5 = vpop.permute.xlu2 %368  ;;  %v556_v2 = vrot.slane %v499_v63, 6 }
 0x110   :  { %v595_v6 = vsel %vm557_vm8, %v490_v4, %v552_v1  ;;  %v596_v7 = vsel %vm559_vm9, %v490_v4, %v552_v1  ;;  %v598_v8 = vsel %vm562_vm10, %v490_v4, %v552_v1  ;;  %191 = vst.msk [vmem:[#allocation2 + $0x80] sm:$0x3f] %vm182_vm2, %v163_v3 }
 0x111   :  { %v597_v9 = vrot.slane %v596_v7, 2  ;;  %v599_v10 = vrot.slane %v598_v8, 4  ;;  %658 = vst [vmem:[#allocation1 + $0x21] ss:$4 sm:$0xff] %v595_v6 }
 0x112   :  { %242 = vst.msk [vmem:[#allocation2 + $0x80] sm:$0x3f] %vm233_vm3, %v214_v45 }
 0x113   :  { %659 = vst [vmem:[#allocation1 + $0x22] ss:$4 sm:$0xff] %v597_v9 }
 0x114   :  { %660 = vst [vmem:[#allocation1 + $0x23] ss:$4 sm:$0xff] %v599_v10 }
 0x116   :  { %v265_v11 = vpop.permute.xlu1 %264  ;;  %v165_v12 = vpop.permute.xlu0 %164 }
 0x117   :  { %293 = vst.msk [vmem:[#allocation2 + $0x80] sm:$0x3f] %vm284_vm4, %v265_v11 }
 0x118   :  { %192 = vst.msk [vmem:[#allocation2 + $0x90] sm:$0x3f] %vm182_vm2, %v165_v12  ;;  %v167_v13 = vpop.permute.xlu2 %166 }
 0x119   :  { %243 = vst.msk [vmem:[#allocation2 + $0x90] sm:$0x3f] %vm233_vm3, %v216_v52 }
 0x11b   :  { %v663_v14 = vld.sshfl [vmem:[#allocation1 + $0x20] sm:$0xff pattern:$0x73625140]  ;;  %v664_v15 = vld.sshfl [vmem:[#allocation1 + $0x28] sm:$0xff pattern:$0x73625140] }
 0x11c   :  { %803 = vmatmul.f32.gmra.mxu0 %v663_v14  ;;  %2968 = vmatmul.msk.f32.gmra.mxu1 %vm753_vm11, %v664_v15 }
 0x11e   :  { %v267_v16 = vpop.permute.xlu1 %266  ;;  %v316_v17 = vpop.permute.xlu0 %315 }
 0x11f   :  { %294 = vst.msk [vmem:[#allocation2 + $0x90] sm:$0x3f] %vm284_vm4, %v267_v16 }
 0x120   :  { %344 = vst.msk [vmem:[#allocation2 + $0x80] sm:$0x3f] %vm335_vm5, %v316_v17  ;;  %v320_v18 = vpop.permute.xlu2 %319 }
 0x121   :  { %395 = vst.msk [vmem:[#allocation2 + $0x80] sm:$0x3f] %vm386_vm6, %v367_v61  ;;  %v3505_v61 = vrot.slane %v3502_v57, 2 }
 0x126   :  { %v418_v19 = vpop.permute.xlu1 %417  ;;  %v318_v20 = vpop.permute.xlu0 %317 }
 0x127   :  { %446 = vst.msk [vmem:[#allocation2 + $0x80] sm:$0x3f] %vm437_vm7, %v418_v19  ;;  %v789_v12 = vpop.f32.mrf.mxu0  ;;  %v833_v14 = vpop.f32.mrf.mxu1 }
 0x128   :  { %345 = vst.msk [vmem:[#allocation2 + $0x90] sm:$0x3f] %vm335_vm5, %v318_v20  ;;  %v108_v23 = vpop.permute.xlu2 %107 }
 0x129   :  { %396 = vst.msk [vmem:[#allocation2 + $0x90] sm:$0x3f] %vm386_vm6, %v369_v5 }
 0x12a   :  { %133 = vst.msk [vmem:[#allocation2 + $0xb0] sm:$0x3f] %vm121_vm1, %v108_v23 }
 0x12e   :  { %v492_v24 = vld [vmem:[#allocation2 + $0x80] sm:$0x3f]  ;;  %v420_v25 = vpop.permute.xlu1 %419  ;;  %v106_v26 = vpop.permute.xlu0 %105 }
 0x12f   :  { %v600_v27 = vsel %vm557_vm8, %v492_v24, %v553_v22  ;;  %v601_v28 = vsel %vm559_vm9, %v492_v24, %v553_v22  ;;  %v603_v29 = vsel %vm562_vm10, %v492_v24, %v553_v22  ;;  %447 = vst.msk [vmem:[#allocation2 + $0x90] sm:$0x3f] %vm437_vm7, %v420_v25 }
 0x130   :  { %v602_v31 = vrot.slane %v601_v28, 2  ;;  %v604_v32 = vrot.slane %v603_v29, 4  ;;  %665 = vst [vmem:[#allocation1] ss:$4 sm:$0xff] %v600_v27  ;;  %v271_v47 = vpop.permute.xlu2 %270 }
 0x131   :  { %132 = vst.msk [vmem:[#allocation2 + $0xa0] sm:$0x3f] %vm121_vm1, %v106_v26 }
 0x132   :  { %666 = vst [vmem:[#allocation1 + $0x1] ss:$4 sm:$0xff] %v602_v31 }
 0x133   :  { %667 = vst [vmem:[#allocation1 + $0x2] ss:$4 sm:$0xff] %v604_v32 }
 0x134   :  { %193 = vst.msk [vmem:[#allocation2 + $0xa0] sm:$0x3f] %vm182_vm2, %v167_v13 }
 0x136   :  { %v494_v34 = vld [vmem:[#allocation2 + $0x90] sm:$0x3f]  ;;  %v218_v35 = vpop.permute.xlu0 %217  ;;  %v269_v36 = vpop.permute.xlu1 %268 }
 0x137   :  { %v605_v37 = vsel %vm557_vm8, %v494_v34, %v554_v33  ;;  %v606_v38 = vsel %vm559_vm9, %v494_v34, %v554_v33  ;;  %v608_v39 = vsel %vm562_vm10, %v494_v34, %v554_v33  ;;  %244 = vst.msk [vmem:[#allocation2 + $0xa0] sm:$0x3f] %vm233_vm3, %v218_v35 }
 0x138   :  { %v607_v40 = vrot.slane %v606_v38, 2  ;;  %v609_v41 = vrot.slane %v608_v39, 4  ;;  %668 = vst [vmem:[#allocation1 + $0x3] ss:$4 sm:$0xff] %v605_v37  ;;  %v424_v58 = vpop.permute.xlu2 %423 }
 0x139   :  { %295 = vst.msk [vmem:[#allocation2 + $0xa0] sm:$0x3f] %vm284_vm4, %v269_v36 }
 0x13a   :  { %669 = vst [vmem:[#allocation1 + $0x20] ss:$4 sm:$0xff] %v607_v40  ;;  %v792_v16 = vpop.f32.mrf.mxu0  ;;  %v836_v19 = vpop.f32.mrf.mxu1 }
 0x13b   :  { %670 = vst [vmem:[#allocation1 + $0x21] ss:$4 sm:$0xff] %v609_v41 }
 0x13c   :  { %346 = vst.msk [vmem:[#allocation2 + $0xa0] sm:$0x3f] %vm335_vm5, %v320_v18 }
 0x13e   :  { %v371_v42 = vpop.permute.xlu0 %370  ;;  %v422_v43 = vpop.permute.xlu1 %421 }
 0x13f   :  { %v673_v44 = vld.sshfl [vmem:[#allocation1] sm:$0xff pattern:$0x73625140]  ;;  %v674_v45 = vld.sshfl [vmem:[#allocation1 + $0x8] sm:$0xff pattern:$0x73625140] }
 0x140   :  { %397 = vst.msk [vmem:[#allocation2 + $0xa0] sm:$0x3f] %vm386_vm6, %v371_v42  ;;  %806 = vmatmul.f32.gmra.mxu0 %v673_v44  ;;  %2969 = vmatmul.msk.f32.gmra.mxu1 %vm753_vm11, %v674_v45 }
 0x141   :  { %448 = vst.msk [vmem:[#allocation2 + $0xa0] sm:$0x3f] %vm437_vm7, %v422_v43 }
 0x147   :  { %v169_v49 = vpop.permute.xlu0 %168  ;;  %v220_v50 = vpop.permute.xlu1 %219 }
 0x148   :  { %v496_v51 = vld [vmem:[#allocation2 + $0xa0] sm:$0x3f]  ;;  %194 = vst.msk [vmem:[#allocation2 + $0xb0] sm:$0x3f] %vm182_vm2, %v169_v49 }
 0x149   :  { %v610_v52 = vsel %vm557_vm8, %v496_v51, %v555_v48  ;;  %v611_v53 = vsel %vm559_vm9, %v496_v51, %v555_v48  ;;  %v613_v54 = vsel %vm562_vm10, %v496_v51, %v555_v48  ;;  %245 = vst.msk [vmem:[#allocation2 + $0xb0] sm:$0x3f] %vm233_vm3, %v220_v50 }
 0x14a   :  { %v612_v55 = vrot.slane %v611_v53, 2  ;;  %v614_v56 = vrot.slane %v613_v54, 4  ;;  %671 = vst [vmem:[#allocation1 + $0x22] ss:$4 sm:$0xff] %v610_v52 }
 0x14b   :  { %296 = vst.msk [vmem:[#allocation2 + $0xb0] sm:$0x3f] %vm284_vm4, %v271_v47  ;;  %vm1853_vm4 = vcmask 588800  }
 0x14c   :  { %672 = vst [vmem:[#allocation1 + $0x23] ss:$4 sm:$0xff] %v612_v55 }
 0x14d   :  { %677 = vst [vmem:[#allocation1] ss:$4 sm:$0xff] %v614_v56 }
 0x14f   :  { %v322_v59 = vpop.permute.xlu0 %321  ;;  %v373_v60 = vpop.permute.xlu1 %372 }
 0x150   :  { %347 = vst.msk [vmem:[#allocation2 + $0xb0] sm:$0x3f] %vm335_vm5, %v322_v59  ;;  %vm2073_vm5 = vcmask 128064  }
 0x151   :  { %398 = vst.msk [vmem:[#allocation2 + $0xb0] sm:$0x3f] %vm386_vm6, %v373_v60  ;;  %v795_v21 = vpop.f32.mrf.mxu0  ;;  %v839_v28 = vpop.f32.mrf.mxu1  ;;  %vm2175_vm6 = vcmask 193664  }
 0x152   :  { %449 = vst.msk [vmem:[#allocation2 + $0xb0] sm:$0x3f] %vm437_vm7, %v424_v58  ;;  %vm2278_vm7 = vcmask 259264  }
 0x153   :  { %v675_v0 = vld.sshfl [vmem:[#allocation1 + $0x20] sm:$0xff pattern:$0x73625140]  ;;  %v676_v1 = vld.sshfl [vmem:[#allocation1 + $0x28] sm:$0xff pattern:$0x73625140] }
 0x154   :  { %700 = vst [vmem:[#allocation1 + $0x20] ss:$4 sm:$0xff] %v3505_v61  ;;  %809 = vmatmul.f32.gmra.mxu0 %v675_v0  ;;  %2970 = vmatmul.msk.f32.gmra.mxu1 %vm753_vm11, %v676_v1 }
 0x155   :  { %702 = vst [vmem:[#allocation1 + $0x21] ss:$4 sm:$0xff] %v3509_v62 }
 0x156   :  { %704 = vst [vmem:[#allocation1 + $0x22] ss:$4 sm:$0xff] %v3502_v57 }
 0x157   :  { %706 = vst [vmem:[#allocation1 + $0x23] ss:$4 sm:$0xff] %v3505_v61 }
 0x159   :  { %v498_v3 = vld [vmem:[#allocation2 + $0xb0] sm:$0x3f] }
 0x15a   :  { %v615_v4 = vsel %vm557_vm8, %v498_v3, %v556_v2  ;;  %v616_v5 = vsel %vm559_vm9, %v498_v3, %v556_v2  ;;  %v618_v6 = vsel %vm562_vm10, %v498_v3, %v556_v2  ;;  %vm2380_vm8 = vcmask 324864  }
 0x15b   :  { %v617_v7 = vrot.slane %v616_v5, 2  ;;  %v619_v8 = vrot.slane %v618_v6, 4  ;;  %678 = vst [vmem:[#allocation1 + $0x1] ss:$4 sm:$0xff] %v615_v4  ;;  %vm2482_vm9 = vcmask 390464   ;;  %vm2584_vm10 = vcmask 456064  }
 0x15d   :  { %679 = vst [vmem:[#allocation1 + $0x2] ss:$4 sm:$0xff] %v617_v7 }
 0x15e   :  { %v708_v9 = vld.sshfl [vmem:[#allocation1 + $0x20] sm:$0xff pattern:$0x73625140]  ;;  %680 = vst [vmem:[#allocation1 + $0x3] ss:$4 sm:$0xff] %v619_v8 }
 0x15f   :  { %713 = vst [vmem:[#allocation1 + $0x20] ss:$4 sm:$0xff] %v3502_v57  ;;  %v793_v20 = vadd.f32 %v792_v16, %v708_v9 }
 0x160   :  { %714 = vst [vmem:[#allocation1 + $0x21] ss:$4 sm:$0xff] %v3505_v61 }
 0x161   :  { %715 = vst [vmem:[#allocation1 + $0x22] ss:$4 sm:$0xff] %v3509_v62  ;;  %v3544_v23 = vadd.f32 %v836_v19, %v793_v20 }
 0x162   :  { %716 = vst [vmem:[#allocation1 + $0x23] ss:$4 sm:$0xff] %v3502_v57 }
 0x163   :  { %v872_v27 = vrot.slane %v3544_v23, 2  ;;  %v873_v59 = vrot.slane %v3544_v23, 4  ;;  %v874_v60 = vrot.slane %v3544_v23, 6 }
 0x165   :  { %v681_v10 = vld.sshfl [vmem:[#allocation1] sm:$0xff pattern:$0x73625140]  ;;  %v682_v11 = vld.sshfl [vmem:[#allocation1 + $0x8] sm:$0xff pattern:$0x73625140] }
 0x166   :  { %692 = vst [vmem:[#allocation1] ss:$4 sm:$0xff] %v3502_v57  ;;  %812 = vmatmul.f32.gmra.mxu0 %v681_v10  ;;  %2971 = vmatmul.msk.f32.gmra.mxu1 %vm753_vm11, %v682_v11 }
 0x167   :  { %694 = vst [vmem:[#allocation1 + $0x1] ss:$4 sm:$0xff] %v3505_v61 }
 0x168   :  { %696 = vst [vmem:[#allocation1 + $0x2] ss:$4 sm:$0xff] %v3509_v62 }
 0x169   :  { %v718_v13 = vld.sshfl [vmem:[#allocation1 + $0x20] sm:$0xff pattern:$0x73625140]  ;;  %698 = vst [vmem:[#allocation1 + $0x3] ss:$4 sm:$0xff] %v3502_v57 }
 0x16a   :  { %723 = vst [vmem:[#allocation1 + $0x20] ss:$4 sm:$0xff] %v3509_v62 }
 0x16b   :  { %724 = vst [vmem:[#allocation1 + $0x21] ss:$4 sm:$0xff] %v3502_v57 }
 0x16c   :  { %725 = vst [vmem:[#allocation1 + $0x22] ss:$4 sm:$0xff] %v3505_v61 }
 0x16d   :  { %726 = vst [vmem:[#allocation1 + $0x23] ss:$4 sm:$0xff] %v3509_v62 }
 0x170   :  { %v707_v15 = vld.sshfl [vmem:[#allocation1] sm:$0xff pattern:$0x73625140] }
 0x171   :  { %709 = vst [vmem:[#allocation1] ss:$4 sm:$0xff] %v3509_v62  ;;  %v790_v18 = vadd.f32 %v789_v12, %v707_v15 }
 0x172   :  { %710 = vst [vmem:[#allocation1 + $0x1] ss:$4 sm:$0xff] %v3502_v57 }
 0x173   :  { %711 = vst [vmem:[#allocation1 + $0x2] ss:$4 sm:$0xff] %v3505_v61  ;;  %v3542_v22 = vadd.f32 %v833_v14, %v790_v18 }
 0x174   :  { %v728_v17 = vld.sshfl [vmem:[#allocation1 + $0x20] sm:$0xff pattern:$0x73625140]  ;;  %712 = vst [vmem:[#allocation1 + $0x3] ss:$4 sm:$0xff] %v3509_v62 }
 0x175   :  { %733 = vst [vmem:[#allocation1 + $0x20] ss:$4 sm:$0xff] %v3505_v61  ;;  %v871_v25 = vrot.slane %v3542_v22, 6  ;;  %v869_v52 = vrot.slane %v3542_v22, 2  ;;  %v870_v54 = vrot.slane %v3542_v22, 4 }
 0x176   :  { %734 = vst [vmem:[#allocation1 + $0x21] ss:$4 sm:$0xff] %v3509_v62  ;;  %v798_v30 = vpop.f32.mrf.mxu0  ;;  %v842_v34 = vpop.f32.mrf.mxu1 }
 0x177   :  { %735 = vst [vmem:[#allocation1 + $0x22] ss:$4 sm:$0xff] %v3502_v57  ;;  %v799_v39 = vadd.f32 %v798_v30, %v718_v13 }
 0x178   :  { %736 = vst [vmem:[#allocation1 + $0x23] ss:$4 sm:$0xff] %v3505_v61 }
 0x179   :  { %v3576_v41 = vadd.f32 %v842_v34, %v799_v39 }
 0x17b   :  { %v717_v24 = vld.sshfl [vmem:[#allocation1] sm:$0xff pattern:$0x73625140]  ;;  %v880_v45 = vrot.slane %v3576_v41, 6  ;;  %v879_v0 = vrot.slane %v3576_v41, 4 }
 0x17c   :  { %719 = vst [vmem:[#allocation1] ss:$4 sm:$0xff] %v3505_v61  ;;  %v796_v29 = vadd.f32 %v795_v21, %v717_v24 }
 0x17d   :  { %720 = vst [vmem:[#allocation1 + $0x1] ss:$4 sm:$0xff] %v3509_v62 }
 0x17e   :  { %721 = vst [vmem:[#allocation1 + $0x2] ss:$4 sm:$0xff] %v3502_v57  ;;  %v3559_v31 = vadd.f32 %v839_v28, %v796_v29 }
 0x17f   :  { %v3550_v26 = vld.sshfl [vmem:[#allocation1 + $0x20] sm:$0xff pattern:$0x73625140]  ;;  %722 = vst [vmem:[#allocation1 + $0x3] ss:$4 sm:$0xff] %v3505_v61 }
 0x180   :  { %932 = vst [vmem:[#allocation1 + $0x21] ss:$4 sm:$0xff] %v3544_v23  ;;  %v875_v33 = vrot.slane %v3559_v31, 2  ;;  %v876_v35 = vrot.slane %v3559_v31, 4  ;;  %v877_v36 = vrot.slane %v3559_v31, 6 }
 0x181   :  { %934 = vst [vmem:[#allocation1 + $0x22] ss:$4 sm:$0xff] %v872_v27 }
 0x182   :  { %930 = vst [vmem:[#allocation1 + $0x20] ss:$4 sm:$0xff] %v871_v25 }
 0x186   :  { %v727_v32 = vld.sshfl [vmem:[#allocation1] sm:$0xff pattern:$0x73625140] }
 0x187   :  { %729 = vst [vmem:[#allocation1] ss:$4 sm:$0xff] %v3502_v57 }
 0x188   :  { %730 = vst [vmem:[#allocation1 + $0x1] ss:$4 sm:$0xff] %v3505_v61 }
 0x189   :  { %731 = vst [vmem:[#allocation1 + $0x2] ss:$4 sm:$0xff] %v3509_v62  ;;  %v3567_v37 = vld.sshfl [vmem:[#allocation1 + $0x20] sm:$0xff pattern:$0x73625140]  ;;  %v801_v38 = vpop.f32.mrf.mxu0  ;;  %v845_v42 = vpop.f32.mrf.mxu1 }
 0x18a   :  { %732 = vst [vmem:[#allocation1 + $0x3] ss:$4 sm:$0xff] %v3502_v57  ;;  %v802_v40 = vadd.f32 %v801_v38, %v727_v32  ;;  %v990_v21 = vsel %vm988_vm12, %v3567_v37, 0.0 }
 0x18b   :  { %940 = vst [vmem:[#allocation1 + $0x20] ss:$4 sm:$0xff] %v875_v33 }
 0x18c   :  { %941 = vst [vmem:[#allocation1 + $0x21] ss:$4 sm:$0xff] %v876_v35  ;;  %v3578_v43 = vadd.f32 %v845_v42, %v802_v40 }
 0x18d   :  { %942 = vst [vmem:[#allocation1 + $0x22] ss:$4 sm:$0xff] %v877_v36 }
 0x18e   :  { %v881_v47 = vrot.slane %v3578_v43, 2  ;;  %v882_v1 = vrot.slane %v3578_v43, 4  ;;  %v883_v3 = vrot.slane %v3578_v43, 6 }
 0x191   :  { %v737_v44 = vld.sshfl [vmem:[#allocation1] sm:$0xff pattern:$0x73625140] }
 0x192   :  { %739 = vst [vmem:[#allocation1] ss:$4 sm:$0xff] %v3509_v62 }
 0x193   :  { %740 = vst [vmem:[#allocation1 + $0x1] ss:$4 sm:$0xff] %v3502_v57 }
 0x194   :  { %741 = vst [vmem:[#allocation1 + $0x2] ss:$4 sm:$0xff] %v3505_v61  ;;  %v3584_v46 = vld.sshfl [vmem:[#allocation1 + $0x20] sm:$0xff pattern:$0x73625140] }
 0x195   :  { %742 = vst [vmem:[#allocation1 + $0x3] ss:$4 sm:$0xff] %v3509_v62  ;;  %v878_v62 = vrot.slane %v3576_v41, 2  ;;  %v994_v30 = vsel %vm988_vm12, %v3584_v46, 0.0 }
 0x196   :  { %948 = vst [vmem:[#allocation1 + $0x20] ss:$4 sm:$0xff] %v880_v45 }
 0x197   :  { %949 = vst [vmem:[#allocation1 + $0x21] ss:$4 sm:$0xff] %v3578_v43 }
 0x198   :  { %950 = vst [vmem:[#allocation1 + $0x22] ss:$4 sm:$0xff] %v881_v47 }
 0x199   :  { %v804_v48 = vpop.f32.mrf.mxu0  ;;  %v848_v50 = vpop.f32.mrf.mxu1 }
 0x19a   :  { %v805_v49 = vadd.f32 %v804_v48, %v728_v17 }
 0x19c   :  { %v3593_v51 = vld.sshfl [vmem:[#allocation1] sm:$0xff pattern:$0x73625140]  ;;  %v3596_v53 = vadd.f32 %v848_v50, %v805_v49  ;;  %v3029_v50 = vmov 72.0  }
 0x19d   :  { %923 = vst [vmem:[#allocation1] ss:$4 sm:$0xff] %v3542_v22  ;;  %3016 = vrcp.f32 %v3029_v50 }
 0x19e   :  { %925 = vst [vmem:[#allocation1 + $0x1] ss:$4 sm:$0xff] %v869_v52  ;;  %v884_v55 = vrot.slane %v3596_v53, 2  ;;  %v885_v56 = vrot.slane %v3596_v53, 4  ;;  %v886_v57 = vrot.slane %v3596_v53, 6 }
 0x19f   :  { %927 = vst [vmem:[#allocation1 + $0x2] ss:$4 sm:$0xff] %v870_v54  ;;  %v951_v58 = vld.sshfl [vmem:[#allocation1 + $0x20] sm:$0xff pattern:$0x73625140] }
 0x1a0   :  { %956 = vst [vmem:[#allocation1 + $0x20] ss:$4 sm:$0xff] %v884_v55  ;;  %v998_v39 = vsel %vm988_vm12, %v951_v58, 0.0 }
 0x1a1   :  { %957 = vst [vmem:[#allocation1 + $0x21] ss:$4 sm:$0xff] %v885_v56 }
 0x1a2   :  { %958 = vst [vmem:[#allocation1 + $0x22] ss:$4 sm:$0xff] %v886_v57 }
 0x1a6   :  { %v928_v61 = vld.sshfl [vmem:[#allocation1] sm:$0xff pattern:$0x73625140] }
 0x1a7   :  { %936 = vst [vmem:[#allocation1] ss:$4 sm:$0xff] %v873_v59  ;;  %v989_v17 = vsel %vm988_vm12, %v928_v61, 0.0 }
 0x1a8   :  { %937 = vst [vmem:[#allocation1 + $0x1] ss:$4 sm:$0xff] %v874_v60  ;;  %v991_v28 = vadd.f32 %v990_v21, %v989_v17 }
 0x1a9   :  { %938 = vst [vmem:[#allocation1 + $0x2] ss:$4 sm:$0xff] %v3559_v31  ;;  %v959_v10 = vld.sshfl [vmem:[#allocation1 + $0x20] sm:$0xff pattern:$0x73625140] }
 0x1b0   :  { %v939_v63 = vld.sshfl [vmem:[#allocation1] sm:$0xff pattern:$0x73625140] }
 0x1b1   :  { %944 = vst [vmem:[#allocation1] ss:$4 sm:$0xff] %v3576_v41  ;;  %v992_v24 = vsel %vm988_vm12, %v939_v63, 0.0 }
 0x1b2   :  { %945 = vst [vmem:[#allocation1 + $0x1] ss:$4 sm:$0xff] %v878_v62  ;;  %v993_v29 = vadd.f32 %v992_v24, %v991_v28 }
 0x1b3   :  { %946 = vst [vmem:[#allocation1 + $0x2] ss:$4 sm:$0xff] %v879_v0 }
 0x1b4   :  { %v995_v34 = vadd.f32 %v994_v30, %v993_v29 }
 0x1ba   :  { %v947_v2 = vld.sshfl [vmem:[#allocation1] sm:$0xff pattern:$0x73625140] }
 0x1bb   :  { %952 = vst [vmem:[#allocation1] ss:$4 sm:$0xff] %v882_v1  ;;  %v996_v32 = vsel %vm988_vm12, %v947_v2, 0.0 }
 0x1bc   :  { %953 = vst [vmem:[#allocation1 + $0x1] ss:$4 sm:$0xff] %v883_v3  ;;  %v997_v37 = vadd.f32 %v996_v32, %v995_v34 }
 0x1bd   :  { %954 = vst [vmem:[#allocation1 + $0x2] ss:$4 sm:$0xff] %v3596_v53  ;;  %v807_v4 = vpop.f32.mrf.mxu0  ;;  %v851_v6 = vpop.f32.mrf.mxu1 }
 0x1be   :  { %v808_v5 = vadd.f32 %v807_v4, %v737_v44  ;;  %v999_v44 = vadd.f32 %v998_v39, %v997_v37  ;;  %v1002_v4 = vsel %vm988_vm12, %v959_v10, 0.0 }
 0x1c0   :  { %v3634_v7 = vadd.f32 %v851_v6, %v808_v5 }
 0x1c2   :  { %v887_v8 = vrot.slane %v3634_v7, 2  ;;  %v889_v9 = vrot.slane %v3634_v7, 6  ;;  %v888_v11 = vrot.slane %v3634_v7, 4 }
 0x1c4   :  { %v955_v12 = vld.sshfl [vmem:[#allocation1] sm:$0xff pattern:$0x73625140]  ;;  %964 = vst [vmem:[#allocation1 + $0x20] ss:$4 sm:$0xff] %v889_v9 }
 0x1c5   :  { %960 = vst [vmem:[#allocation1] ss:$4 sm:$0xff] %v3634_v7  ;;  %v1000_v40 = vsel %vm988_vm12, %v955_v12, 0.0  ;;  %v3017_v12 = vpop.eup %3016 }
 0x1c6   :  { %961 = vst [vmem:[#allocation1 + $0x1] ss:$4 sm:$0xff] %v887_v8  ;;  %v1001_v61 = vadd.f32 %v1000_v40, %v999_v44  ;;  %v1019_v17 = vmul.f32 72.0, %v3017_v12  ;;  %vm1023_vm13 = vweird.f32 %v3017_v12 }
 0x1c7   :  { %962 = vst [vmem:[#allocation1 + $0x2] ss:$4 sm:$0xff] %v888_v11 }
 0x1c8   :  { %v1003_v5 = vadd.f32 %v1002_v4, %v1001_v61 }
 0x1d1   :  { %v810_v13 = vpop.f32.mrf.mxu0  ;;  %v854_v15 = vpop.f32.mrf.mxu1 }
 0x1d2   :  { %v811_v14 = vadd.f32 %v810_v13, %v3550_v26  ;;  %v963_v26 = vld.sshfl [vmem:[#allocation1] sm:$0xff pattern:$0x73625140] }
 0x1d4   :  { %v3647_v16 = vadd.f32 %v854_v15, %v811_v14 }
 0x1d6   :  { %v890_v18 = vrot.slane %v3647_v16, 2  ;;  %v891_v19 = vrot.slane %v3647_v16, 4  ;;  %v892_v20 = vrot.slane %v3647_v16, 6  ;;  %965 = vst [vmem:[#allocation1 + $0x21] ss:$4 sm:$0xff] %v3647_v16 }
 0x1d8   :  { %966 = vst [vmem:[#allocation1 + $0x22] ss:$4 sm:$0xff] %v890_v18 }
 0x1d9   :  { %968 = vst [vmem:[#allocation1] ss:$4 sm:$0xff] %v891_v19 }
 0x1da   :  { %969 = vst [vmem:[#allocation1 + $0x1] ss:$4 sm:$0xff] %v892_v20 }
 0x1df   :  { %v967_v58 = vld.sshfl [vmem:[#allocation1 + $0x20] sm:$0xff pattern:$0x73625140] }
 0x1e0   :  { %v1006_v6 = vsel %vm988_vm12, %v967_v58, 0.0 }
 0x1e3   :  { %v813_v38 = vpop.f32.mrf.mxu0  ;;  %v857_v48 = vpop.f32.mrf.mxu1 }
 0x1e4   :  { %v814_v42 = vadd.f32 %v813_v38, %v3593_v51  ;;  %v1004_v51 = vsel %vm988_vm12, %v963_v26, 0.0  ;;  %v1020_v26 = vsub.f32 1.0, %v1019_v17 }
 0x1e5   :  { %v1005_v13 = vadd.f32 %v1004_v51, %v1003_v5 }
 0x1e6   :  { %v3669_v49 = vadd.f32 %v857_v48, %v814_v42  ;;  %v1021_v32 = vmul.f32 %v3017_v12, %v1020_v26 }
 0x1e7   :  { %v1007_v14 = vadd.f32 %v1006_v6, %v1005_v13 }
 0x1e8   :  { %v893_v46 = vrot.slane %v3669_v49, 2  ;;  %v894_v63 = vrot.slane %v3669_v49, 4  ;;  %v895_v2 = vrot.slane %v3669_v49, 6  ;;  %970 = vst [vmem:[#allocation1 + $0x2] ss:$4 sm:$0xff] %v3669_v49  ;;  %v1022_v38 = vadd.f32 %v3017_v12, %v1021_v32 }
 0x1ea   :  { %972 = vst [vmem:[#allocation1 + $0x20] ss:$4 sm:$0xff] %v893_v46  ;;  %v3686_v42 = vsel %vm1023_vm13, %v3017_v12, %v1022_v38  ;;  %vm2788_vm13 = vcmask 587264  }
 0x1eb   :  { %973 = vst [vmem:[#allocation1 + $0x21] ss:$4 sm:$0xff] %v894_v63 }
 0x1ec   :  { %974 = vst [vmem:[#allocation1 + $0x22] ss:$4 sm:$0xff] %v895_v2 }
 0x1ef   :  { %v971_v15 = vld.sshfl [vmem:[#allocation1] sm:$0xff pattern:$0x73625140] }
 0x1f0   :  { %v1008_v10 = vsel %vm988_vm12, %v971_v15, 0.0 }
 0x1f1   :  { %v1009_v21 = vadd.f32 %v1008_v10, %v1007_v14 }
 0x1f3   :  { %v975_v24 = vld.sshfl [vmem:[#allocation1 + $0x20] sm:$0xff pattern:$0x73625140] }
 0x1f4   :  { %v1010_v28 = vsel %vm988_vm12, %v975_v24, 0.0 }
 0x1f5   :  { %v1011_v29 = vadd.f32 %v1010_v28, %v1009_v21 }
 0x1f7   :  { %v1012_v30 = vrot.slane %v1011_v29, 4 }
 0x1f9   :  { %v1013_v34 = vadd.f32 %v1012_v30, %v1011_v29 }
 0x1fb   :  { %v1014_v37 = vrot.slane %v1013_v34, 2 }
 0x1fd   :  { %v1015_v39 = vadd.f32 %v1014_v37, %v1013_v34 }
 0x1ff   :  { %v1016_v40 = vrot.slane %v1015_v39, 1 }
 0x201   :  { %v1017_v44 = vadd.f32 %v1016_v40, %v1015_v39 }
 0x203   :  { %v3689_v48 = vmul.f32 %v3686_v42, %v1017_v44 }
 0x205   :  { %v3692_v50 = vrot.slane %v3689_v48, 2  ;;  %v3695_v61 = vrot.slane %v3689_v48, 4  ;;  %v3699_v58 = vsub.f32 %v3542_v22, %v3689_v48  ;;  %v3714_v5 = vsub.f32 %v871_v25, %v3689_v48 }
 0x206   :  { %v3740_v14 = vsub.f32 %v873_v59, %v3689_v48  ;;  %v3754_v10 = vsub.f32 %v875_v33, %v3689_v48  ;;  %v3795_v32 = vsub.f32 %v880_v45, %v3689_v48  ;;  %v3821_v44 = vsub.f32 %v882_v1, %v3689_v48 }
 0x207   :  { %v3704_v4 = vsub.f32 %v869_v52, %v3692_v50  ;;  %v3709_v51 = vsub.f32 %v870_v54, %v3695_v61  ;;  %v3718_v6 = vsub.f32 %v3544_v23, %v3692_v50  ;;  %v3723_v12 = vsub.f32 %v872_v27, %v3695_v61 }
 0x208   :  { %v1067_v52 = vmul.f32 %v3699_v58, %v3699_v58  ;;  %v1070_v25 = vmul.f32 %v3714_v5, %v3714_v5  ;;  %v3745_v15 = vsub.f32 %v874_v60, %v3692_v50  ;;  %v3749_v17 = vsub.f32 %v3559_v31, %v3695_v61 }
 0x209   :  { %v1068_v54 = vmul.f32 %v3704_v4, %v3704_v4  ;;  %v1069_v22 = vmul.f32 %v3709_v51, %v3709_v51  ;;  %v1071_v13 = vmul.f32 %v3718_v6, %v3718_v6  ;;  %v1072_v27 = vmul.f32 %v3723_v12, %v3723_v12 }
 0x20a   :  { %1139 = vst [vmem:[#allocation1] ss:$4 sm:$0xff] %v1067_v52  ;;  %v3759_v59 = vsub.f32 %v876_v35, %v3692_v50  ;;  %v1073_v23 = vmul.f32 %v3740_v14, %v3740_v14  ;;  %v3766_v60 = vsub.f32 %v877_v36, %v3695_v61  ;;  %v1074_v21 = vmul.f32 %v3745_v15, %v3745_v15 }
 0x20b   :  { %1141 = vst [vmem:[#allocation1 + $0x1] ss:$4 sm:$0xff] %v1068_v54  ;;  %v1075_v33 = vmul.f32 %v3749_v17, %v3749_v17  ;;  %v1076_v35 = vmul.f32 %v3754_v10, %v3754_v10  ;;  %v3780_v36 = vsub.f32 %v3576_v41, %v3689_v48  ;;  %v3785_v29 = vsub.f32 %v878_v62, %v3692_v50 }
 0x20c   :  { %1143 = vst [vmem:[#allocation1 + $0x2] ss:$4 sm:$0xff] %v1069_v22  ;;  %v1077_v26 = vmul.f32 %v3759_v59, %v3759_v59  ;;  %v1078_v31 = vmul.f32 %v3766_v60, %v3766_v60  ;;  %v3790_v30 = vsub.f32 %v879_v0, %v3695_v61  ;;  %v3799_v34 = vsub.f32 %v3578_v43, %v3692_v50 }
 0x20d   :  { %1146 = vst [vmem:[#allocation1 + $0x20] ss:$4 sm:$0xff] %v1070_v25  ;;  %v1079_v37 = vmul.f32 %v3780_v36, %v3780_v36  ;;  %v3806_v62 = vsub.f32 %v881_v47, %v3695_v61  ;;  %v1080_v0 = vmul.f32 %v3785_v29, %v3785_v29  ;;  %v1082_v45 = vmul.f32 %v3795_v32, %v3795_v32 }
 0x20e   :  { %1148 = vst [vmem:[#allocation1 + $0x21] ss:$4 sm:$0xff] %v1071_v13  ;;  %v1081_v41 = vmul.f32 %v3790_v30, %v3790_v30  ;;  %v1083_v39 = vmul.f32 %v3799_v34, %v3799_v34  ;;  %v3826_v52 = vsub.f32 %v883_v3, %v3692_v50  ;;  %v3830_v54 = vsub.f32 %v3596_v53, %v3695_v61 }
 0x20f   :  { %1150 = vst [vmem:[#allocation1 + $0x22] ss:$4 sm:$0xff] %v1072_v27  ;;  %v1084_v47 = vmul.f32 %v3806_v62, %v3806_v62  ;;  %v3835_v22 = vsub.f32 %v884_v55, %v3689_v48  ;;  %v3840_v1 = vsub.f32 %v885_v56, %v3692_v50  ;;  %v1085_v43 = vmul.f32 %v3821_v44, %v3821_v44 }
 0x210   :  { %v3847_v3 = vsub.f32 %v886_v57, %v3695_v61  ;;  %v1086_v25 = vmul.f32 %v3826_v52, %v3826_v52  ;;  %v1087_v55 = vmul.f32 %v3830_v54, %v3830_v54 }
 0x211   :  { %v1088_v56 = vmul.f32 %v3835_v22, %v3835_v22 }
 0x213   :  { %v1144_v24 = vld.sshfl [vmem:[#allocation1] sm:$0xff pattern:$0x73625140] }
 0x214   :  { %1152 = vst [vmem:[#allocation1] ss:$4 sm:$0xff] %v1073_v23  ;;  %v1204_v27 = vsel %vm988_vm12, %v1144_v24, 0.0  ;;  %v1089_v23 = vmul.f32 %v3840_v1, %v3840_v1  ;;  %v3869_v24 = vsub.f32 %v887_v8, %v3692_v50 }
 0x215   :  { %1153 = vst [vmem:[#allocation1 + $0x1] ss:$4 sm:$0xff] %v1074_v21  ;;  %v1090_v21 = vmul.f32 %v3847_v3, %v3847_v3 }
 0x216   :  { %v1151_v28 = vld.sshfl [vmem:[#allocation1 + $0x20] sm:$0xff pattern:$0x73625140]  ;;  %1154 = vst [vmem:[#allocation1 + $0x2] ss:$4 sm:$0xff] %v1075_v33  ;;  %v3863_v33 = vsub.f32 %v3634_v7, %v3689_v48 }
 0x217   :  { %1156 = vst [vmem:[#allocation1 + $0x20] ss:$4 sm:$0xff] %v1076_v35  ;;  %v1205_v57 = vsel %vm988_vm12, %v1151_v28, 0.0  ;;  %v3874_v28 = vsub.f32 %v888_v11, %v3695_v61  ;;  %v1092_v11 = vmul.f32 %v3869_v24, %v3869_v24 }
 0x218   :  { %1157 = vst [vmem:[#allocation1 + $0x21] ss:$4 sm:$0xff] %v1077_v26  ;;  %v1206_v26 = vadd.f32 %v1205_v57, %v1204_v27  ;;  %v1091_v8 = vmul.f32 %v3863_v33, %v3863_v33 }
 0x219   :  { %1158 = vst [vmem:[#allocation1 + $0x22] ss:$4 sm:$0xff] %v1078_v31  ;;  %v3879_v31 = vsub.f32 %v889_v9, %v3689_v48  ;;  %v1093_v7 = vmul.f32 %v3874_v28, %v3874_v28 }
 0x21d   :  { %v1155_v38 = vld.sshfl [vmem:[#allocation1] sm:$0xff pattern:$0x73625140] }
 0x21e   :  { %1160 = vst [vmem:[#allocation1] ss:$4 sm:$0xff] %v1079_v37  ;;  %v1207_v35 = vsel %vm988_vm12, %v1155_v38, 0.0  ;;  %v3890_v38 = vsub.f32 %v890_v18, %v3695_v61 }
 0x21f   :  { %1161 = vst [vmem:[#allocation1 + $0x1] ss:$4 sm:$0xff] %v1080_v0  ;;  %v1208_v37 = vadd.f32 %v1207_v35, %v1206_v26  ;;  %v3883_v0 = vsub.f32 %v3647_v16, %v3692_v50  ;;  %v3928_v16 = vsub.f32 %v894_v63, %v3692_v50 }
 0x220   :  { %v1159_v40 = vld.sshfl [vmem:[#allocation1 + $0x20] sm:$0xff pattern:$0x73625140]  ;;  %1162 = vst [vmem:[#allocation1 + $0x2] ss:$4 sm:$0xff] %v1081_v41 }
 0x221   :  { %1164 = vst [vmem:[#allocation1 + $0x20] ss:$4 sm:$0xff] %v1082_v45  ;;  %v1209_v9 = vsel %vm988_vm12, %v1159_v40, 0.0  ;;  %v1095_v18 = vmul.f32 %v3883_v0, %v3883_v0  ;;  %v3907_v40 = vsub.f32 %v891_v19, %v3689_v48  ;;  %v3923_v19 = vsub.f32 %v893_v46, %v3689_v48 }
 0x222   :  { %1165 = vst [vmem:[#allocation1 + $0x21] ss:$4 sm:$0xff] %v1083_v39  ;;  %v1094_v39 = vmul.f32 %v3879_v31, %v3879_v31 }
 0x223   :  { %1166 = vst [vmem:[#allocation1 + $0x22] ss:$4 sm:$0xff] %v1084_v47  ;;  %v1210_v47 = vadd.f32 %v1209_v9, %v1208_v37  ;;  %v1100_v63 = vmul.f32 %v3923_v19, %v3923_v19 }
 0x227   :  { %v1163_v13 = vld.sshfl [vmem:[#allocation1] sm:$0xff pattern:$0x73625140] }
 0x228   :  { %1168 = vst [vmem:[#allocation1] ss:$4 sm:$0xff] %v1085_v43  ;;  %v1211_v45 = vsel %vm988_vm12, %v1163_v13, 0.0  ;;  %v3912_v13 = vsub.f32 %v892_v20, %v3692_v50  ;;  %v1097_v20 = vmul.f32 %v3907_v40, %v3907_v40 }
 0x229   :  { %1169 = vst [vmem:[#allocation1 + $0x1] ss:$4 sm:$0xff] %v1086_v25  ;;  %v1096_v25 = vmul.f32 %v3890_v38, %v3890_v38 }
 0x22a   :  { %v1167_v53 = vld.sshfl [vmem:[#allocation1 + $0x20] sm:$0xff pattern:$0x73625140]  ;;  %1170 = vst [vmem:[#allocation1 + $0x2] ss:$4 sm:$0xff] %v1087_v55  ;;  %v1212_v55 = vadd.f32 %v1211_v45, %v1210_v47 }
 0x22b   :  { %1172 = vst [vmem:[#allocation1 + $0x20] ss:$4 sm:$0xff] %v1088_v56  ;;  %v3916_v56 = vsub.f32 %v3669_v49, %v3695_v61  ;;  %v1213_v27 = vsel %vm988_vm12, %v1167_v53, 0.0  ;;  %v3935_v53 = vsub.f32 %v895_v2, %v3695_v61  ;;  %v1101_v49 = vmul.f32 %v3928_v16, %v3928_v16 }
 0x22c   :  { %1173 = vst [vmem:[#allocation1 + $0x21] ss:$4 sm:$0xff] %v1089_v23  ;;  %v1214_v57 = vadd.f32 %v1213_v27, %v1212_v55 }
 0x22d   :  { %1174 = vst [vmem:[#allocation1 + $0x22] ss:$4 sm:$0xff] %v1090_v21  ;;  %v1098_v21 = vmul.f32 %v3912_v13, %v3912_v13  ;;  %v1099_v48 = vmul.f32 %v3916_v56, %v3916_v56  ;;  %v1102_v26 = vmul.f32 %v3935_v53, %v3935_v53 }
 0x231   :  { %v1171_v41 = vld.sshfl [vmem:[#allocation1] sm:$0xff pattern:$0x73625140] }
 0x232   :  { %1176 = vst [vmem:[#allocation1] ss:$4 sm:$0xff] %v1091_v8  ;;  %v1215_v23 = vsel %vm988_vm12, %v1171_v41, 0.0 }
 0x233   :  { %1177 = vst [vmem:[#allocation1 + $0x1] ss:$4 sm:$0xff] %v1092_v11  ;;  %v1216_v46 = vadd.f32 %v1215_v23, %v1214_v57 }
 0x234   :  { %v1175_v43 = vld.sshfl [vmem:[#allocation1 + $0x20] sm:$0xff pattern:$0x73625140]  ;;  %1178 = vst [vmem:[#allocation1 + $0x2] ss:$4 sm:$0xff] %v1093_v7 }
 0x235   :  { %1180 = vst [vmem:[#allocation1 + $0x20] ss:$4 sm:$0xff] %v1094_v39  ;;  %v1217_v50 = vsel %vm988_vm12, %v1175_v43, 0.0 }
 0x236   :  { %1181 = vst [vmem:[#allocation1 + $0x21] ss:$4 sm:$0xff] %v1095_v18  ;;  %v1218_v37 = vadd.f32 %v1217_v50, %v1216_v46 }
 0x237   :  { %1182 = vst [vmem:[#allocation1 + $0x22] ss:$4 sm:$0xff] %v1096_v25 }
 0x23b   :  { %v1179_v35 = vld.sshfl [vmem:[#allocation1] sm:$0xff pattern:$0x73625140] }
 0x23c   :  { %1184 = vst [vmem:[#allocation1] ss:$4 sm:$0xff] %v1097_v20  ;;  %v1219_v61 = vsel %vm988_vm12, %v1179_v35, 0.0 }
 0x23d   :  { %1185 = vst [vmem:[#allocation1 + $0x1] ss:$4 sm:$0xff] %v1098_v21  ;;  %v1220_v8 = vadd.f32 %v1219_v61, %v1218_v37  ;;  %v3958_v61 = vld [vmem:[%s5457_s3] ss:$0 sm:$0xff] }
 0x23e   :  { %v1183_v2 = vld.sshfl [vmem:[#allocation1 + $0x20] sm:$0xff pattern:$0x73625140]  ;;  %1186 = vst [vmem:[#allocation1 + $0x2] ss:$4 sm:$0xff] %v1099_v48 }
 0x23f   :  { %1188 = vst [vmem:[#allocation1 + $0x20] ss:$4 sm:$0xff] %v1100_v63  ;;  %v1221_v11 = vsel %vm988_vm12, %v1183_v2, 0.0 }
 0x240   :  { %1189 = vst [vmem:[#allocation1 + $0x21] ss:$4 sm:$0xff] %v1101_v49  ;;  %v1222_v7 = vadd.f32 %v1221_v11, %v1220_v8  ;;  %v3967_v8 = vrot.slane %v3958_v61, 2  ;;  %v3972_v11 = vld [vmem:[%s5458_s4] ss:$0 sm:$0xff] }
 0x241   :  { %1190 = vst [vmem:[#allocation1 + $0x22] ss:$4 sm:$0xff] %v1102_v26 }
 0x245   :  { %v1187_v41 = vld.sshfl [vmem:[#allocation1] sm:$0xff pattern:$0x73625140] }
 0x246   :  { %v1223_v9 = vsel %vm988_vm12, %v1187_v41, 0.0 }
 0x247   :  { %v1224_v45 = vadd.f32 %v1223_v9, %v1222_v7  ;;  %v3979_v9 = vrot.slane %v3958_v61, 4 }
 0x248   :  { %v1191_v39 = vld.sshfl [vmem:[#allocation1 + $0x20] sm:$0xff pattern:$0x73625140] }
 0x249   :  { %v1225_v47 = vsel %vm988_vm12, %v1191_v39, 0.0 }
 0x24a   :  { %v1226_v18 = vadd.f32 %v1225_v47, %v1224_v45 }
 0x24c   :  { %v1227_v43 = vrot.slane %v1226_v18, 4 }
 0x24e   :  { %v1228_v25 = vadd.f32 %v1227_v43, %v1226_v18 }
 0x250   :  { %v1229_v55 = vrot.slane %v1228_v25, 2 }
 0x252   :  { %v1230_v27 = vadd.f32 %v1229_v55, %v1228_v25  ;;  %v3995_v25 = vrot.slane %v3972_v11, 4 }
 0x254   :  { %v1231_v23 = vrot.slane %v1230_v27, 1 }
 0x256   :  { %v1232_v57 = vadd.f32 %v1231_v23, %v1230_v27 }
 0x258   :  { %v1233_v20 = vmul.f32 %v1232_v57, %v3686_v42 }
 0x25a   :  { %v1234_v21 = vadd.f32 1e-05, %v1233_v20 }
 0x25c   :  { %3018 = vrsqrt.f32 %v1234_v21  ;;  %vm1241_vm15 = vweird.f32 %v1234_v21 }
 0x262   :  { %v3019_v35 = vpop.eup %3018 }
 0x263   :  { %v1236_v46 = vmul.f32 %v3019_v35, %v1234_v21  ;;  %vm1242_vm14 = vweird.f32 %v3019_v35 }
 0x264   :  { %vm1243_vm0 = vmor %vm1241_vm15, %vm1242_vm14 }
 0x265   :  { %v1237_v48 = vmul.f32 %v3019_v35, %v1236_v46 }
 0x267   :  { %v1238_v63 = vmul.f32 0.5, %v1237_v48 }
 0x269   :  { %v1239_v50 = vsub.f32 1.5, %v1238_v63 }
 0x26b   :  { %v1240_v49 = vmul.f32 %v3019_v35, %v1239_v50 }
 0x26d   :  { %v3953_v2 = vsel %vm1243_vm0, %v3019_v35, %v1240_v49 }
 0x26e   :  { %v3961_v26 = vrot.slane %v3953_v2, 2  ;;  %v3964_v37 = vrot.slane %v3953_v2, 4  ;;  %v1250_v41 = vmul.f32 %v3953_v2, %v3699_v58  ;;  %v1253_v39 = vmul.f32 %v3953_v2, %v3714_v5 }
 0x26f   :  { %v3990_v58 = vrot.slane %v3972_v11, 2  ;;  %v1256_v20 = vmul.f32 %v3953_v2, %v3740_v14  ;;  %v1259_v14 = vmul.f32 %v3953_v2, %v3754_v10 }
 0x270   :  { %v1251_v7 = vmul.f32 %v3961_v26, %v3704_v4  ;;  %v1252_v45 = vmul.f32 %v3964_v37, %v3709_v51  ;;  %v1254_v47 = vmul.f32 %v3961_v26, %v3718_v6  ;;  %v1255_v18 = vmul.f32 %v3964_v37, %v3723_v12 }
 0x271   :  { %v1294_v4 = vmul.f32 %v3958_v61, %v1250_v41  ;;  %v1297_v5 = vmul.f32 %v3958_v61, %v1253_v39  ;;  %v1257_v35 = vmul.f32 %v3961_v26, %v3745_v15  ;;  %v1258_v48 = vmul.f32 %v3964_v37, %v3749_v17 }
 0x272   :  { %v1295_v43 = vmul.f32 %v3967_v8, %v1251_v7  ;;  %v1296_v51 = vmul.f32 %v3979_v9, %v1252_v45  ;;  %v1298_v55 = vmul.f32 %v3967_v8, %v1254_v47  ;;  %v1299_v6 = vmul.f32 %v3979_v9, %v1255_v18 }
 0x273   :  { %v4002_v12 = vadd.f32 %v3972_v11, %v1294_v4  ;;  %v4011_v57 = vadd.f32 %v3972_v11, %v1297_v5  ;;  %v1260_v63 = vmul.f32 %v3961_v26, %v3759_v59  ;;  %v1300_v15 = vmul.f32 %v3958_v61, %v1256_v20 }
 0x274   :  { %v4005_v27 = vadd.f32 %v3990_v58, %v1295_v43  ;;  %v4008_v23 = vadd.f32 %v3995_v25, %v1296_v51  ;;  %v4016_v21 = vadd.f32 %v3990_v58, %v1298_v55  ;;  %v4022_v46 = vadd.f32 %v3995_v25, %v1299_v6 }
 0x275   :  { %1410 = vst [vmem:[#allocation1] ss:$4 sm:$0xff] %v4002_v12  ;;  %v1261_v50 = vmul.f32 %v3964_v37, %v3766_v60  ;;  %v1301_v49 = vmul.f32 %v3967_v8, %v1257_v35  ;;  %v1302_v17 = vmul.f32 %v3979_v9, %v1258_v48  ;;  %v1303_v10 = vmul.f32 %v3958_v61, %v1259_v14 }
 0x276   :  { %1412 = vst [vmem:[#allocation1 + $0x1] ss:$4 sm:$0xff] %v4005_v27  ;;  %v1304_v41 = vmul.f32 %v3967_v8, %v1260_v63  ;;  %v4043_v7 = vadd.f32 %v3972_v11, %v1300_v15  ;;  %v1262_v60 = vmul.f32 %v3953_v2, %v3780_v36  ;;  %v1263_v18 = vmul.f32 %v3961_v26, %v3785_v29 }
 0x277   :  { %1414 = vst [vmem:[#allocation1 + $0x2] ss:$4 sm:$0xff] %v4008_v23  ;;  %v1305_v59 = vmul.f32 %v3979_v9, %v1261_v50  ;;  %v4047_v45 = vadd.f32 %v3990_v58, %v1301_v49  ;;  %v4052_v47 = vadd.f32 %v3995_v25, %v1302_v17  ;;  %v4058_v4 = vadd.f32 %v3972_v11, %v1303_v10 }
 0x278   :  { %1417 = vst [vmem:[#allocation1 + $0x20] ss:$4 sm:$0xff] %v4011_v57  ;;  %v1264_v43 = vmul.f32 %v3964_v37, %v3790_v30  ;;  %v4064_v51 = vadd.f32 %v3990_v58, %v1304_v41  ;;  %v1265_v5 = vmul.f32 %v3953_v2, %v3795_v32  ;;  %v1266_v29 = vmul.f32 %v3961_v26, %v3799_v34 }
 0x279   :  { %1419 = vst [vmem:[#allocation1 + $0x21] ss:$4 sm:$0xff] %v4016_v21  ;;  %v4070_v55 = vadd.f32 %v3995_v25, %v1305_v59  ;;  %v1306_v6 = vmul.f32 %v3958_v61, %v1262_v60  ;;  %v1267_v30 = vmul.f32 %v3964_v37, %v3806_v62  ;;  %v1307_v20 = vmul.f32 %v3967_v8, %v1263_v18 }
 0x27a   :  { %1421 = vst [vmem:[#allocation1 + $0x22] ss:$4 sm:$0xff] %v4022_v46  ;;  %v1308_v32 = vmul.f32 %v3979_v9, %v1264_v43  ;;  %v1309_v35 = vmul.f32 %v3958_v61, %v1265_v5  ;;  %v1310_v48 = vmul.f32 %v3967_v8, %v1266_v29  ;;  %v1268_v62 = vmul.f32 %v3953_v2, %v3821_v44 }
 0x27b   :  { %v4085_v14 = vadd.f32 %v3972_v11, %v1306_v6  ;;  %v1311_v34 = vmul.f32 %v3979_v9, %v1267_v30  ;;  %v4089_v63 = vadd.f32 %v3990_v58, %v1307_v20  ;;  %v1269_v49 = vmul.f32 %v3961_v26, %v3826_v52 }
 0x27c   :  { %v4094_v50 = vadd.f32 %v3995_v25, %v1308_v32  ;;  %v4100_v17 = vadd.f32 %v3972_v11, %v1309_v35  ;;  %v1270_v10 = vmul.f32 %v3964_v37, %v3830_v54  ;;  %v4106_v41 = vadd.f32 %v3990_v58, %v1310_v48 }
 0x27d   :  { %v1271_v59 = vmul.f32 %v3953_v2, %v3835_v22  ;;  %v4112_v60 = vadd.f32 %v3995_v25, %v1311_v34  ;;  %v1272_v52 = vmul.f32 %v3961_v26, %v3840_v1  ;;  %v1312_v18 = vmul.f32 %v3958_v61, %v1268_v62 }
 0x27e   :  { %v1415_v39 = vld.sshfl [vmem:[#allocation1] sm:$0xff pattern:$0x73625140]  ;;  %v1273_v54 = vmul.f32 %v3964_v37, %v3847_v3  ;;  %v1313_v43 = vmul.f32 %v3967_v8, %v1269_v49  ;;  %v1314_v22 = vmul.f32 %v3979_v9, %v1270_v10  ;;  %v1274_v3 = vmul.f32 %v3953_v2, %v3863_v33 }
 0x27f   :  { %1423 = vst [vmem:[#allocation1] ss:$4 sm:$0xff] %v4043_v7  ;;  %v1315_v5 = vmul.f32 %v3958_v61, %v1271_v59  ;;  %v1316_v29 = vmul.f32 %v3967_v8, %v1272_v52  ;;  %v4127_v6 = vadd.f32 %v3972_v11, %v1312_v18  ;;  %v1275_v35 = vmul.f32 %v3961_v26, %v3869_v24 }
 0x280   :  { %1424 = vst [vmem:[#allocation1 + $0x1] ss:$4 sm:$0xff] %v4047_v45  ;;  %v1317_v1 = vmul.f32 %v3979_v9, %v1273_v54  ;;  %v4131_v30 = vadd.f32 %v3990_v58, %v1313_v43  ;;  %v4136_v32 = vadd.f32 %v3995_v25, %v1314_v22  ;;  %v1475_v34 = vsel %vm988_vm12, %v1415_v39, 0.0 }
 0x281   :  { %v1422_v36 = vld.sshfl [vmem:[#allocation1 + $0x20] sm:$0xff pattern:$0x73625140]  ;;  %1425 = vst [vmem:[#allocation1 + $0x2] ss:$4 sm:$0xff] %v4052_v47  ;;  %v4142_v48 = vadd.f32 %v3972_v11, %v1315_v5  ;;  %v1276_v62 = vmul.f32 %v3964_v37, %v3874_v28  ;;  %v4149_v33 = vadd.f32 %v3990_v58, %v1316_v29  ;;  %v1277_v24 = vmul.f32 %v3953_v2, %v3879_v31 }
 0x282   :  { %1427 = vst [vmem:[#allocation1 + $0x20] ss:$4 sm:$0xff] %v4058_v4  ;;  %v1476_v10 = vsel %vm988_vm12, %v1422_v36, 0.0  ;;  %v4156_v59 = vadd.f32 %v3995_v25, %v1317_v1  ;;  %v1278_v39 = vmul.f32 %v3961_v26, %v3883_v0  ;;  %v1318_v28 = vmul.f32 %v3958_v61, %v1274_v3 }
 0x283   :  { %1428 = vst [vmem:[#allocation1 + $0x21] ss:$4 sm:$0xff] %v4064_v51  ;;  %v1279_v36 = vmul.f32 %v3964_v37, %v3890_v38  ;;  %v1319_v18 = vmul.f32 %v3967_v8, %v1275_v35  ;;  %v1477_v31 = vadd.f32 %v1476_v10, %v1475_v34  ;;  %v1320_v54 = vmul.f32 %v3979_v9, %v1276_v62 }
 0x284   :  { %1429 = vst [vmem:[#allocation1 + $0x22] ss:$4 sm:$0xff] %v4070_v55  ;;  %v1321_v43 = vmul.f32 %v3958_v61, %v1277_v24  ;;  %v1322_v0 = vmul.f32 %v3967_v8, %v1278_v39  ;;  %v4172_v5 = vadd.f32 %v3972_v11, %v1318_v28  ;;  %v1280_v1 = vmul.f32 %v3953_v2, %v3907_v40 }
 0x285   :  { %v4176_v29 = vadd.f32 %v3990_v58, %v1319_v18  ;;  %v4181_v3 = vadd.f32 %v3995_v25, %v1320_v54  ;;  %v1281_v62 = vmul.f32 %v3961_v26, %v3912_v13  ;;  %v1282_v40 = vmul.f32 %v3964_v37, %v3916_v56 }
 0x286   :  { %v4189_v10 = vadd.f32 %v3972_v11, %v1321_v43  ;;  %v4195_v39 = vadd.f32 %v3990_v58, %v1322_v0  ;;  %v1324_v56 = vmul.f32 %v3958_v61, %v1280_v1 }
 0x287   :  { %v1325_v18 = vmul.f32 %v3967_v8, %v1281_v62 }
 0x288   :  { %v1426_v15 = vld.sshfl [vmem:[#allocation1] sm:$0xff pattern:$0x73625140]  ;;  %v4218_v43 = vadd.f32 %v3972_v11, %v1324_v56 }
 0x289   :  { %1431 = vst [vmem:[#allocation1] ss:$4 sm:$0xff] %v4085_v14  ;;  %v1478_v52 = vsel %vm988_vm12, %v1426_v15, 0.0  ;;  %v1323_v15 = vmul.f32 %v3979_v9, %v1279_v36  ;;  %v1285_v36 = vmul.f32 %v3964_v37, %v3935_v53  ;;  %v4222_v37 = vadd.f32 %v3990_v58, %v1325_v18 }
 0x28a   :  { %1432 = vst [vmem:[#allocation1 + $0x1] ss:$4 sm:$0xff] %v4089_v63  ;;  %v1479_v22 = vadd.f32 %v1478_v52, %v1477_v31  ;;  %v1284_v52 = vmul.f32 %v3961_v26, %v3928_v16 }
 0x28b   :  { %v1430_v44 = vld.sshfl [vmem:[#allocation1 + $0x20] sm:$0xff pattern:$0x73625140]  ;;  %1433 = vst [vmem:[#allocation1 + $0x2] ss:$4 sm:$0xff] %v4094_v50  ;;  %v4201_v13 = vadd.f32 %v3995_v25, %v1323_v15  ;;  %v1329_v53 = vmul.f32 %v3979_v9, %v1285_v36 }
 0x28c   :  { %1435 = vst [vmem:[#allocation1 + $0x20] ss:$4 sm:$0xff] %v4100_v17  ;;  %v1480_v35 = vsel %vm988_vm12, %v1430_v44, 0.0  ;;  %v1283_v44 = vmul.f32 %v3953_v2, %v3923_v19  ;;  %v1326_v19 = vmul.f32 %v3979_v9, %v1282_v40  ;;  %v1328_v26 = vmul.f32 %v3967_v8, %v1284_v52 }
 0x28d   :  { %1436 = vst [vmem:[#allocation1 + $0x21] ss:$4 sm:$0xff] %v4106_v41  ;;  %v1481_v24 = vadd.f32 %v1480_v35, %v1479_v22  ;;  %v4239_v1 = vadd.f32 %v3995_v25, %v1329_v53 }
 0x28e   :  { %1437 = vst [vmem:[#allocation1 + $0x22] ss:$4 sm:$0xff] %v4112_v60  ;;  %v1327_v54 = vmul.f32 %v3958_v61, %v1283_v44  ;;  %v4225_v15 = vadd.f32 %v3995_v25, %v1326_v19 }
 0x290   :  { %v4229_v61 = vadd.f32 %v3972_v11, %v1327_v54 }
 0x292   :  { %v1434_v20 = vld.sshfl [vmem:[#allocation1] sm:$0xff pattern:$0x73625140] }
 0x293   :  { %1439 = vst [vmem:[#allocation1] ss:$4 sm:$0xff] %v4127_v6  ;;  %v1482_v34 = vsel %vm988_vm12, %v1434_v20, 0.0 }
 0x294   :  { %1440 = vst [vmem:[#allocation1 + $0x1] ss:$4 sm:$0xff] %v4131_v30  ;;  %v1483_v20 = vadd.f32 %v1482_v34, %v1481_v24 }
 0x295   :  { %v1438_v49 = vld.sshfl [vmem:[#allocation1 + $0x20] sm:$0xff pattern:$0x73625140]  ;;  %1441 = vst [vmem:[#allocation1 + $0x2] ss:$4 sm:$0xff] %v4136_v32 }
 0x296   :  { %1443 = vst [vmem:[#allocation1 + $0x20] ss:$4 sm:$0xff] %v4142_v48  ;;  %v1484_v2 = vsel %vm988_vm12, %v1438_v49, 0.0  ;;  %v4234_v49 = vadd.f32 %v3990_v58, %v1328_v26 }
 0x297   :  { %1444 = vst [vmem:[#allocation1 + $0x21] ss:$4 sm:$0xff] %v4149_v33  ;;  %v1485_v16 = vadd.f32 %v1484_v2, %v1483_v20 }
 0x298   :  { %1445 = vst [vmem:[#allocation1 + $0x22] ss:$4 sm:$0xff] %v4156_v59 }
 0x29c   :  { %v1442_v38 = vld.sshfl [vmem:[#allocation1] sm:$0xff pattern:$0x73625140] }
 0x29d   :  { %1447 = vst [vmem:[#allocation1] ss:$4 sm:$0xff] %v4172_v5  ;;  %v1486_v31 = vsel %vm988_vm12, %v1442_v38, 0.0 }
 0x29e   :  { %1448 = vst [vmem:[#allocation1 + $0x1] ss:$4 sm:$0xff] %v4176_v29  ;;  %v1487_v0 = vadd.f32 %v1486_v31, %v1485_v16 }
 0x29f   :  { %v1446_v28 = vld.sshfl [vmem:[#allocation1 + $0x20] sm:$0xff pattern:$0x73625140]  ;;  %1449 = vst [vmem:[#allocation1 + $0x2] ss:$4 sm:$0xff] %v4181_v3 }
 0x2a0   :  { %1451 = vst [vmem:[#allocation1 + $0x20] ss:$4 sm:$0xff] %v4189_v10  ;;  %v1488_v8 = vsel %vm988_vm12, %v1446_v28, 0.0 }
 0x2a1   :  { %1452 = vst [vmem:[#allocation1 + $0x21] ss:$4 sm:$0xff] %v4195_v39  ;;  %v1489_v35 = vadd.f32 %v1488_v8, %v1487_v0 }
 0x2a2   :  { %1453 = vst [vmem:[#allocation1 + $0x22] ss:$4 sm:$0xff] %v4201_v13 }
 0x2a6   :  { %v1450_v22 = vld.sshfl [vmem:[#allocation1] sm:$0xff pattern:$0x73625140] }
 0x2a7   :  { %1455 = vst [vmem:[#allocation1] ss:$4 sm:$0xff] %v4218_v43  ;;  %v1490_v38 = vsel %vm988_vm12, %v1450_v22, 0.0 }
 0x2a8   :  { %1456 = vst [vmem:[#allocation1 + $0x1] ss:$4 sm:$0xff] %v4222_v37  ;;  %v1491_v11 = vadd.f32 %v1490_v38, %v1489_v35 }
 0x2a9   :  { %v1454_v9 = vld.sshfl [vmem:[#allocation1 + $0x20] sm:$0xff pattern:$0x73625140]  ;;  %1457 = vst [vmem:[#allocation1 + $0x2] ss:$4 sm:$0xff] %v4225_v15 }
 0x2aa   :  { %1459 = vst [vmem:[#allocation1 + $0x20] ss:$4 sm:$0xff] %v4229_v61  ;;  %v1492_v34 = vsel %vm988_vm12, %v1454_v9, 0.0 }
 0x2ab   :  { %1460 = vst [vmem:[#allocation1 + $0x21] ss:$4 sm:$0xff] %v4234_v49  ;;  %v1493_v62 = vadd.f32 %v1492_v34, %v1491_v11 }
 0x2ac   :  { %1461 = vst [vmem:[#allocation1 + $0x22] ss:$4 sm:$0xff] %v4239_v1 }
 0x2b0   :  { %v1458_v58 = vld.sshfl [vmem:[#allocation1] sm:$0xff pattern:$0x73625140] }
 0x2b1   :  { %v1494_v24 = vsel %vm988_vm12, %v1458_v58, 0.0 }
 0x2b2   :  { %v1495_v40 = vadd.f32 %v1494_v24, %v1493_v62 }
 0x2b3   :  { %v1462_v28 = vld.sshfl [vmem:[#allocation1 + $0x20] sm:$0xff pattern:$0x73625140] }
 0x2b4   :  { %v1496_v44 = vsel %vm988_vm12, %v1462_v28, 0.0 }
 0x2b5   :  { %v1497_v25 = vadd.f32 %v1496_v44, %v1495_v40 }
 0x2b7   :  { %v1498_v20 = vrot.slane %v1497_v25, 4 }
 0x2b9   :  { %v1499_v52 = vadd.f32 %v1498_v20, %v1497_v25 }
 0x2bb   :  { %v1500_v56 = vrot.slane %v1499_v52, 2 }
 0x2bd   :  { %v1501_v36 = vadd.f32 %v1500_v56, %v1499_v52 }
 0x2bf   :  { %v1502_v18 = vrot.slane %v1501_v36, 1 }
 0x2c1   :  { %v1503_v19 = vadd.f32 %v1502_v18, %v1501_v36 }
 0x2c3   :  { %v4248_v2 = vmul.f32 %v1503_v19, %v3686_v42 }
 0x2c5   :  { %v4251_v31 = vrot.slane %v4248_v2, 2  ;;  %v4254_v54 = vrot.slane %v4248_v2, 4  ;;  %v4258_v16 = vsub.f32 %v4002_v12, %v4248_v2  ;;  %v4270_v22 = vsub.f32 %v4011_v57, %v4248_v2 }
 0x2c6   :  { %v4294_v9 = vsub.f32 %v4043_v7, %v4248_v2  ;;  %v4306_v11 = vsub.f32 %v4058_v4, %v4248_v2  ;;  %v4330_v40 = vsub.f32 %v4085_v14, %v4248_v2  ;;  %v4342_v25 = vsub.f32 %v4100_v17, %v4248_v2 }
 0x2c7   :  { %v4262_v26 = vsub.f32 %v4005_v27, %v4251_v31  ;;  %v4266_v53 = vsub.f32 %v4008_v23, %v4254_v54  ;;  %v4274_v0 = vsub.f32 %v4016_v21, %v4251_v31  ;;  %v4278_v12 = vsub.f32 %v4022_v46, %v4254_v54 }
 0x2c8   :  { %v1546_v27 = vmul.f32 %v4258_v16, %v4258_v16  ;;  %v1549_v57 = vmul.f32 %v4270_v22, %v4270_v22  ;;  %v4298_v38 = vsub.f32 %v4047_v45, %v4251_v31  ;;  %v4302_v35 = vsub.f32 %v4052_v47, %v4254_v54 }
 0x2c9   :  { %v1547_v8 = vmul.f32 %v4262_v26, %v4262_v26  ;;  %v1548_v23 = vmul.f32 %v4266_v53, %v4266_v53  ;;  %v1550_v21 = vmul.f32 %v4274_v0, %v4274_v0  ;;  %v1551_v46 = vmul.f32 %v4278_v12, %v4278_v12 }
 0x2ca   :  { %1618 = vst [vmem:[#allocation1] ss:$4 sm:$0xff] %v1546_v27  ;;  %v4310_v34 = vsub.f32 %v4064_v51, %v4251_v31  ;;  %v1552_v7 = vmul.f32 %v4294_v9, %v4294_v9  ;;  %v4316_v45 = vsub.f32 %v4070_v55, %v4254_v54  ;;  %v1553_v58 = vmul.f32 %v4298_v38, %v4298_v38 }
 0x2cb   :  { %1620 = vst [vmem:[#allocation1 + $0x1] ss:$4 sm:$0xff] %v1547_v8  ;;  %v1554_v62 = vmul.f32 %v4302_v35, %v4302_v35  ;;  %v1555_v4 = vmul.f32 %v4306_v11, %v4306_v11  ;;  %v4334_v28 = vsub.f32 %v4089_v63, %v4251_v31  ;;  %v4338_v44 = vsub.f32 %v4094_v50, %v4254_v54 }
 0x2cc   :  { %1622 = vst [vmem:[#allocation1 + $0x2] ss:$4 sm:$0xff] %v1548_v23  ;;  %v1556_v51 = vmul.f32 %v4310_v34, %v4310_v34  ;;  %v1557_v55 = vmul.f32 %v4316_v45, %v4316_v45  ;;  %v4346_v20 = vsub.f32 %v4106_v41, %v4251_v31  ;;  %v1558_v14 = vmul.f32 %v4330_v40, %v4330_v40 }
 0x2cd   :  { %1625 = vst [vmem:[#allocation1 + $0x20] ss:$4 sm:$0xff] %v1549_v57  ;;  %v4352_v63 = vsub.f32 %v4112_v60, %v4254_v54  ;;  %v1559_v52 = vmul.f32 %v4334_v28, %v4334_v28  ;;  %v1560_v56 = vmul.f32 %v4338_v44, %v4338_v44  ;;  %v1561_v17 = vmul.f32 %v4342_v25, %v4342_v25 }
 0x2ce   :  { %1627 = vst [vmem:[#allocation1 + $0x21] ss:$4 sm:$0xff] %v1550_v21  ;;  %v1562_v41 = vmul.f32 %v4346_v20, %v4346_v20  ;;  %v4366_v18 = vsub.f32 %v4127_v6, %v4248_v2  ;;  %v4370_v19 = vsub.f32 %v4131_v30, %v4251_v31  ;;  %v4374_v27 = vsub.f32 %v4136_v32, %v4254_v54 }
 0x2cf   :  { %1629 = vst [vmem:[#allocation1 + $0x22] ss:$4 sm:$0xff] %v1551_v46  ;;  %v1563_v60 = vmul.f32 %v4352_v63, %v4352_v63  ;;  %v4378_v8 = vsub.f32 %v4142_v48, %v4248_v2  ;;  %v4382_v23 = vsub.f32 %v4149_v33, %v4251_v31  ;;  %v4388_v30 = vsub.f32 %v4156_v59, %v4254_v54 }
 0x2d0   :  { %v1564_v6 = vmul.f32 %v4366_v18, %v4366_v18  ;;  %v1565_v57 = vmul.f32 %v4370_v19, %v4370_v19  ;;  %v1566_v21 = vmul.f32 %v4374_v27, %v4374_v27 }
 0x2d1   :  { %v1567_v48 = vmul.f32 %v4378_v8, %v4378_v8  ;;  %v1568_v46 = vmul.f32 %v4382_v23, %v4382_v23 }
 0x2d3   :  { %v1623_v47 = vld.sshfl [vmem:[#allocation1] sm:$0xff pattern:$0x73625140] }
 0x2d4   :  { %1631 = vst [vmem:[#allocation1] ss:$4 sm:$0xff] %v1552_v7  ;;  %v1683_v33 = vsel %vm988_vm12, %v1623_v47, 0.0  ;;  %v4409_v47 = vsub.f32 %v4176_v29, %v4251_v31  ;;  %v4427_v29 = vsub.f32 %v4201_v13, %v4254_v54 }
 0x2d5   :  { %1632 = vst [vmem:[#allocation1 + $0x1] ss:$4 sm:$0xff] %v1553_v58  ;;  %v1569_v58 = vmul.f32 %v4388_v30, %v4388_v30 }
 0x2d6   :  { %v1630_v24 = vld.sshfl [vmem:[#allocation1 + $0x20] sm:$0xff pattern:$0x73625140]  ;;  %1633 = vst [vmem:[#allocation1 + $0x2] ss:$4 sm:$0xff] %v1554_v62  ;;  %v4404_v62 = vsub.f32 %v4172_v5, %v4248_v2  ;;  %v4421_v5 = vsub.f32 %v4195_v39, %v4251_v31 }
 0x2d7   :  { %1635 = vst [vmem:[#allocation1 + $0x20] ss:$4 sm:$0xff] %v1555_v4  ;;  %v1684_v59 = vsel %vm988_vm12, %v1630_v24, 0.0  ;;  %v4413_v24 = vsub.f32 %v4181_v3, %v4254_v54  ;;  %v1571_v3 = vmul.f32 %v4409_v47, %v4409_v47 }
 0x2d8   :  { %1636 = vst [vmem:[#allocation1 + $0x21] ss:$4 sm:$0xff] %v1556_v51  ;;  %v1685_v51 = vadd.f32 %v1684_v59, %v1683_v33  ;;  %v1574_v13 = vmul.f32 %v4421_v5, %v4421_v5  ;;  %v4461_v59 = vsub.f32 %v4234_v49, %v4251_v31 }
 0x2d9   :  { %1637 = vst [vmem:[#allocation1 + $0x22] ss:$4 sm:$0xff] %v1557_v55  ;;  %v4417_v55 = vsub.f32 %v4189_v10, %v4248_v2  ;;  %v1572_v10 = vmul.f32 %v4413_v24, %v4413_v24 }
 0x2dd   :  { %v1634_v50 = vld.sshfl [vmem:[#allocation1] sm:$0xff pattern:$0x73625140] }
 0x2de   :  { %1639 = vst [vmem:[#allocation1] ss:$4 sm:$0xff] %v1558_v14  ;;  %v1686_v4 = vsel %vm988_vm12, %v1634_v50, 0.0 }
 0x2df   :  { %1640 = vst [vmem:[#allocation1 + $0x1] ss:$4 sm:$0xff] %v1559_v52  ;;  %v1687_v14 = vadd.f32 %v1686_v4, %v1685_v51  ;;  %v1570_v52 = vmul.f32 %v4404_v62, %v4404_v62 }
 0x2e0   :  { %v1638_v36 = vld.sshfl [vmem:[#allocation1 + $0x20] sm:$0xff pattern:$0x73625140]  ;;  %1641 = vst [vmem:[#allocation1 + $0x2] ss:$4 sm:$0xff] %v1560_v56 }
 0x2e1   :  { %1643 = vst [vmem:[#allocation1 + $0x20] ss:$4 sm:$0xff] %v1561_v17  ;;  %v1688_v56 = vsel %vm988_vm12, %v1638_v36, 0.0  ;;  %v1573_v17 = vmul.f32 %v4417_v55, %v4417_v55  ;;  %v4443_v36 = vsub.f32 %v4218_v43, %v4248_v2 }
 0x2e2   :  { %1644 = vst [vmem:[#allocation1 + $0x21] ss:$4 sm:$0xff] %v1562_v41  ;;  %v1689_v41 = vadd.f32 %v1688_v56, %v1687_v14 }
 0x2e3   :  { %1645 = vst [vmem:[#allocation1 + $0x22] ss:$4 sm:$0xff] %v1563_v60 }
 0x2e7   :  { %v1642_v32 = vld.sshfl [vmem:[#allocation1] sm:$0xff pattern:$0x73625140] }
 0x2e8   :  { %1647 = vst [vmem:[#allocation1] ss:$4 sm:$0xff] %v1564_v6  ;;  %v1690_v39 = vsel %vm988_vm12, %v1642_v32, 0.0  ;;  %v1575_v6 = vmul.f32 %v4427_v29, %v4427_v29  ;;  %v4447_v32 = vsub.f32 %v4222_v37, %v4251_v31  ;;  %v1576_v37 = vmul.f32 %v4443_v36, %v4443_v36 }
 0x2e9   :  { %1648 = vst [vmem:[#allocation1 + $0x1] ss:$4 sm:$0xff] %v1565_v57  ;;  %v1691_v57 = vadd.f32 %v1690_v39, %v1689_v41  ;;  %v1580_v31 = vmul.f32 %v4461_v59, %v4461_v59 }
 0x2ea   :  { %v1646_v7 = vld.sshfl [vmem:[#allocation1 + $0x20] sm:$0xff pattern:$0x73625140]  ;;  %1649 = vst [vmem:[#allocation1 + $0x2] ss:$4 sm:$0xff] %v1566_v21  ;;  %v4451_v21 = vsub.f32 %v4225_v15, %v4254_v54  ;;  %v4467_v15 = vsub.f32 %v4239_v1, %v4254_v54 }
 0x2eb   :  { %1651 = vst [vmem:[#allocation1 + $0x20] ss:$4 sm:$0xff] %v1567_v48  ;;  %v1692_v48 = vsel %vm988_vm12, %v1646_v7, 0.0  ;;  %v1577_v7 = vmul.f32 %v4447_v32, %v4447_v32 }
 0x2ec   :  { %1652 = vst [vmem:[#allocation1 + $0x21] ss:$4 sm:$0xff] %v1568_v46  ;;  %v4457_v46 = vsub.f32 %v4229_v61, %v4248_v2  ;;  %v1693_v43 = vadd.f32 %v1692_v48, %v1691_v57  ;;  %v1578_v61 = vmul.f32 %v4451_v21, %v4451_v21  ;;  %v1581_v51 = vmul.f32 %v4467_v15, %v4467_v15 }
 0x2ed   :  { %1653 = vst [vmem:[#allocation1 + $0x22] ss:$4 sm:$0xff] %v1569_v58 }
 0x2ee   :  { %v1579_v49 = vmul.f32 %v4457_v46, %v4457_v46 }
 0x2f1   :  { %v1650_v50 = vld.sshfl [vmem:[#allocation1] sm:$0xff pattern:$0x73625140] }
 0x2f2   :  { %1655 = vst [vmem:[#allocation1] ss:$4 sm:$0xff] %v1570_v52  ;;  %v1694_v33 = vsel %vm988_vm12, %v1650_v50, 0.0 }
 0x2f3   :  { %1656 = vst [vmem:[#allocation1 + $0x1] ss:$4 sm:$0xff] %v1571_v3  ;;  %v1695_v4 = vadd.f32 %v1694_v33, %v1693_v43 }
 0x2f4   :  { %v1654_v60 = vld.sshfl [vmem:[#allocation1 + $0x20] sm:$0xff pattern:$0x73625140]  ;;  %1657 = vst [vmem:[#allocation1 + $0x2] ss:$4 sm:$0xff] %v1572_v10 }
 0x2f5   :  { %1659 = vst [vmem:[#allocation1 + $0x20] ss:$4 sm:$0xff] %v1573_v17  ;;  %v1696_v2 = vsel %vm988_vm12, %v1654_v60, 0.0 }
 0x2f6   :  { %1660 = vst [vmem:[#allocation1 + $0x21] ss:$4 sm:$0xff] %v1574_v13  ;;  %v1697_v14 = vadd.f32 %v1696_v2, %v1695_v4 }
 0x2f7   :  { %1661 = vst [vmem:[#allocation1 + $0x22] ss:$4 sm:$0xff] %v1575_v6 }
 0x2fb   :  { %v1658_v58 = vld.sshfl [vmem:[#allocation1] sm:$0xff pattern:$0x73625140] }
 0x2fc   :  { %1663 = vst [vmem:[#allocation1] ss:$4 sm:$0xff] %v1576_v37  ;;  %v1698_v54 = vsel %vm988_vm12, %v1658_v58, 0.0 }
 0x2fd   :  { %1664 = vst [vmem:[#allocation1 + $0x1] ss:$4 sm:$0xff] %v1577_v7  ;;  %v1699_v52 = vadd.f32 %v1698_v54, %v1697_v14  ;;  %v4490_v54 = vld [vmem:[%s5459_s5] ss:$0 sm:$0xff]  ;;  %s3031_s5 = smov 8  }
 0x2fe   :  { %v1662_v1 = vld.sshfl [vmem:[#allocation1 + $0x20] sm:$0xff pattern:$0x73625140]  ;;  %1665 = vst [vmem:[#allocation1 + $0x2] ss:$4 sm:$0xff] %v1578_v61  ;;  %v4499_v14 = vrot.slane %v4490_v54, 2 }
 0x2ff   :  { %1667 = vst [vmem:[#allocation1 + $0x20] ss:$4 sm:$0xff] %v1579_v49  ;;  %v1700_v3 = vsel %vm988_vm12, %v1662_v1, 0.0 }
 0x300   :  { %1668 = vst [vmem:[#allocation1 + $0x21] ss:$4 sm:$0xff] %v1580_v31  ;;  %v1701_v10 = vadd.f32 %v1700_v3, %v1699_v52  ;;  %v4504_v52 = vld [vmem:[%s5460_s6] ss:$0 sm:$0xff]  ;;  %s3032_s6 = smov 24  }
 0x301   :  { %1669 = vst [vmem:[#allocation1 + $0x22] ss:$4 sm:$0xff] %v1581_v51 }
 0x305   :  { %v1666_v50 = vld.sshfl [vmem:[#allocation1] sm:$0xff pattern:$0x73625140] }
 0x306   :  { %v1702_v56 = vsel %vm988_vm12, %v1666_v50, 0.0 }
 0x307   :  { %v1703_v39 = vadd.f32 %v1702_v56, %v1701_v10  ;;  %v4511_v10 = vrot.slane %v4490_v54, 4 }
 0x308   :  { %v1670_v17 = vld.sshfl [vmem:[#allocation1 + $0x20] sm:$0xff pattern:$0x73625140] }
 0x309   :  { %v1704_v41 = vsel %vm988_vm12, %v1670_v17, 0.0 }
 0x30a   :  { %v1705_v13 = vadd.f32 %v1704_v41, %v1703_v39 }
 0x30c   :  { %v1706_v60 = vrot.slane %v1705_v13, 4 }
 0x30e   :  { %v1707_v6 = vadd.f32 %v1706_v60, %v1705_v13  ;;  %v4527_v60 = vrot.slane %v4504_v52, 4 }
 0x310   :  { %v1708_v57 = vrot.slane %v1707_v6, 2 }
 0x312   :  { %v1709_v48 = vadd.f32 %v1708_v57, %v1707_v6 }
 0x314   :  { %v1710_v33 = vrot.slane %v1709_v48, 1 }
 0x316   :  { %v1711_v43 = vadd.f32 %v1710_v33, %v1709_v48 }
 0x318   :  { %v1712_v37 = vmul.f32 %v1711_v43, %v3686_v42 }
 0x31a   :  { %v1713_v7 = vadd.f32 1e-05, %v1712_v37 }
 0x31c   :  { %3020 = vrsqrt.f32 %v1713_v7  ;;  %vm1720_vm2 = vweird.f32 %v1713_v7 }
 0x322   :  { %v3021_v58 = vpop.eup %3020 }
 0x323   :  { %v1715_v4 = vmul.f32 %v3021_v58, %v1713_v7  ;;  %vm1721_vm1 = vweird.f32 %v3021_v58 }
 0x324   :  { %vm1722_vm3 = vmor %vm1720_vm2, %vm1721_vm1 }
 0x325   :  { %v1716_v61 = vmul.f32 %v3021_v58, %v1715_v4 }
 0x327   :  { %v1717_v49 = vmul.f32 0.5, %v1716_v61 }
 0x329   :  { %v1718_v2 = vsub.f32 1.5, %v1717_v49 }
 0x32b   :  { %v1719_v31 = vmul.f32 %v3021_v58, %v1718_v2 }
 0x32d   :  { %v4485_v1 = vsel %vm1722_vm3, %v3021_v58, %v1719_v31 }
 0x32e   :  { %v4493_v42 = vrot.slane %v4485_v1, 2  ;;  %v4496_v51 = vrot.slane %v4485_v1, 4  ;;  %v1729_v3 = vmul.f32 %v4485_v1, %v4258_v16  ;;  %v1732_v39 = vmul.f32 %v4485_v1, %v4270_v22 }
 0x32f   :  { %v4522_v16 = vrot.slane %v4504_v52, 2  ;;  %v1735_v43 = vmul.f32 %v4485_v1, %v4294_v9  ;;  %v1738_v9 = vmul.f32 %v4485_v1, %v4306_v11 }
 0x330   :  { %v1730_v50 = vmul.f32 %v4493_v42, %v4262_v26  ;;  %v1731_v56 = vmul.f32 %v4496_v51, %v4266_v53  ;;  %v1733_v17 = vmul.f32 %v4493_v42, %v4274_v0  ;;  %v1734_v41 = vmul.f32 %v4496_v51, %v4278_v12 }
 0x331   :  { %v1773_v26 = vmul.f32 %v4490_v54, %v1729_v3  ;;  %v1776_v22 = vmul.f32 %v4490_v54, %v1732_v39  ;;  %v1736_v7 = vmul.f32 %v4493_v42, %v4298_v38  ;;  %v1737_v4 = vmul.f32 %v4496_v51, %v4302_v35 }
 0x332   :  { %v1774_v13 = vmul.f32 %v4499_v14, %v1730_v50  ;;  %v1775_v53 = vmul.f32 %v4511_v10, %v1731_v56  ;;  %v1777_v6 = vmul.f32 %v4499_v14, %v1733_v17  ;;  %v1778_v0 = vmul.f32 %v4511_v10, %v1734_v41 }
 0x333   :  { %v4534_v12 = vadd.f32 %v4504_v52, %v1773_v26  ;;  %v4543_v33 = vadd.f32 %v4504_v52, %v1776_v22  ;;  %v1739_v61 = vmul.f32 %v4493_v42, %v4310_v34  ;;  %v1779_v38 = vmul.f32 %v4490_v54, %v1735_v43 }
 0x334   :  { %v4537_v57 = vadd.f32 %v4522_v16, %v1774_v13  ;;  %v4540_v48 = vadd.f32 %v4527_v60, %v1775_v53  ;;  %v4548_v37 = vadd.f32 %v4522_v16, %v1777_v6  ;;  %v4554_v58 = vadd.f32 %v4527_v60, %v1778_v0 }
 0x335   :  { %1906 = vst [vmem:[#allocation1] ss:$4 sm:$0xff] %v4534_v12  ;;  %v1740_v49 = vmul.f32 %v4496_v51, %v4316_v45  ;;  %v1780_v2 = vmul.f32 %v4499_v14, %v1736_v7  ;;  %v1781_v35 = vmul.f32 %v4511_v10, %v1737_v4  ;;  %v1782_v11 = vmul.f32 %v4490_v54, %v1738_v9 }
 0x336   :  { %1908 = vst [vmem:[#allocation1 + $0x1] ss:$4 sm:$0xff] %v4537_v57  ;;  %v1783_v31 = vmul.f32 %v4499_v14, %v1739_v61  ;;  %v4575_v3 = vadd.f32 %v4504_v52, %v1779_v38  ;;  %v1741_v45 = vmul.f32 %v4485_v1, %v4330_v40  ;;  %v1742_v17 = vmul.f32 %v4493_v42, %v4334_v28 }
 0x337   :  { %1910 = vst [vmem:[#allocation1 + $0x2] ss:$4 sm:$0xff] %v4540_v48  ;;  %v1784_v34 = vmul.f32 %v4511_v10, %v1740_v49  ;;  %v4579_v50 = vadd.f32 %v4522_v16, %v1780_v2  ;;  %v4586_v39 = vadd.f32 %v4527_v60, %v1781_v35  ;;  %v4592_v41 = vadd.f32 %v4504_v52, %v1782_v11 }
 0x338   :  { %1913 = vst [vmem:[#allocation1 + $0x20] ss:$4 sm:$0xff] %v4543_v33  ;;  %v1743_v26 = vmul.f32 %v4496_v51, %v4338_v44  ;;  %v4598_v13 = vadd.f32 %v4522_v16, %v1783_v31  ;;  %v1744_v53 = vmul.f32 %v4485_v1, %v4342_v25  ;;  %v1745_v22 = vmul.f32 %v4493_v42, %v4346_v20 }
 0x339   :  { %1915 = vst [vmem:[#allocation1 + $0x21] ss:$4 sm:$0xff] %v4548_v37  ;;  %v4606_v28 = vadd.f32 %v4527_v60, %v1784_v34  ;;  %v1785_v44 = vmul.f32 %v4490_v54, %v1741_v45  ;;  %v1746_v6 = vmul.f32 %v4496_v51, %v4352_v63  ;;  %v1786_v0 = vmul.f32 %v4499_v14, %v1742_v17 }
 0x33a   :  { %1917 = vst [vmem:[#allocation1 + $0x22] ss:$4 sm:$0xff] %v4554_v58  ;;  %v1787_v25 = vmul.f32 %v4511_v10, %v1743_v26  ;;  %v1788_v43 = vmul.f32 %v4490_v54, %v1744_v53  ;;  %v1789_v7 = vmul.f32 %v4499_v14, %v1745_v22  ;;  %v1747_v63 = vmul.f32 %v4485_v1, %v4366_v18 }
 0x33b   :  { %v4621_v4 = vadd.f32 %v4504_v52, %v1785_v44  ;;  %v1790_v20 = vmul.f32 %v4511_v10, %v1746_v6  ;;  %v4625_v9 = vadd.f32 %v4522_v16, %v1786_v0  ;;  %v1748_v49 = vmul.f32 %v4493_v42, %v4370_v19 }
 0x33c   :  { %v4630_v38 = vadd.f32 %v4527_v60, %v1787_v25  ;;  %v4636_v2 = vadd.f32 %v4504_v52, %v1788_v43  ;;  %v1749_v35 = vmul.f32 %v4496_v51, %v4374_v27  ;;  %v4642_v11 = vadd.f32 %v4522_v16, %v1789_v7 }
 0x33d   :  { %v1750_v31 = vmul.f32 %v4485_v1, %v4378_v8  ;;  %v4650_v19 = vadd.f32 %v4527_v60, %v1790_v20  ;;  %v1751_v34 = vmul.f32 %v4493_v42, %v4382_v23  ;;  %v1791_v27 = vmul.f32 %v4490_v54, %v1747_v63 }
 0x33e   :  { %v4581_v56 = vld.sshfl [vmem:[#allocation1] sm:$0xff pattern:$0x73625140]  ;;  %v1752_v45 = vmul.f32 %v4496_v51, %v4388_v30  ;;  %v1792_v17 = vmul.f32 %v4499_v14, %v1748_v49  ;;  %v1793_v8 = vmul.f32 %v4511_v10, %v1749_v35  ;;  %v3030_v22 = vmov 0.0  }
 0x33f   :  { %1919 = vst [vmem:[#allocation1] ss:$4 sm:$0xff] %v4575_v3  ;;  %v1794_v26 = vmul.f32 %v4490_v54, %v1750_v31  ;;  %v1795_v53 = vmul.f32 %v4499_v14, %v1751_v34  ;;  %v4665_v23 = vadd.f32 %v4504_v52, %v1791_v27  ;;  %v1753_v0 = vmul.f32 %v4485_v1, %v4404_v62 }
 0x340   :  { %1920 = vst [vmem:[#allocation1 + $0x1] ss:$4 sm:$0xff] %v4579_v50  ;;  %v1796_v30 = vmul.f32 %v4511_v10, %v1752_v45  ;;  %v4671_v44 = vadd.f32 %v4522_v16, %v1792_v17  ;;  %v4679_v25 = vadd.f32 %v4527_v60, %v1793_v8  ;;  %v1754_v43 = vmul.f32 %v4493_v42, %v4409_v47 }
 0x341   :  { %v4600_v40 = vld.sshfl [vmem:[#allocation1 + $0x20] sm:$0xff pattern:$0x73625140]  ;;  %1921 = vst [vmem:[#allocation1 + $0x2] ss:$4 sm:$0xff] %v4586_v39  ;;  %v4685_v7 = vadd.f32 %v4504_v52, %v1794_v26  ;;  %v1755_v20 = vmul.f32 %v4496_v51, %v4413_v24  ;;  %v1756_v63 = vmul.f32 %v4485_v1, %v4417_v55  ;;  %v1757_v49 = vmul.f32 %v4493_v42, %v4421_v5 }
 0x342   :  { %1923 = vst [vmem:[#allocation1 + $0x20] ss:$4 sm:$0xff] %v4592_v41  ;;  %v4699_v47 = vadd.f32 %v4527_v60, %v1796_v30  ;;  %v1797_v24 = vmul.f32 %v4490_v54, %v1753_v0  ;;  %v1758_v35 = vmul.f32 %v4496_v51, %v4427_v29  ;;  %v1798_v31 = vmul.f32 %v4499_v14, %v1754_v43 }
 0x343   :  { %1924 = vst [vmem:[#allocation1 + $0x21] ss:$4 sm:$0xff] %v4598_v13  ;;  %v1799_v55 = vmul.f32 %v4511_v10, %v1755_v20  ;;  %v1800_v34 = vmul.f32 %v4490_v54, %v1756_v63  ;;  %v1801_v5 = vmul.f32 %v4499_v14, %v1757_v49  ;;  %v1759_v8 = vmul.f32 %v4485_v1, %v4443_v36 }
 0x344   :  { %1925 = vst [vmem:[#allocation1 + $0x22] ss:$4 sm:$0xff] %v4606_v28  ;;  %v4718_v27 = vadd.f32 %v4504_v52, %v1797_v24  ;;  %v1802_v29 = vmul.f32 %v4511_v10, %v1758_v35  ;;  %v4724_v45 = vadd.f32 %v4522_v16, %v1798_v31  ;;  %v1761_v0 = vmul.f32 %v4496_v51, %v4451_v21 }
 0x345   :  { %1858 = vst.msk [vmem:[#allocation3 + $0x20] sm:$0xff] %vm1853_vm4, %v3030_v22  ;;  %v4733_v26 = vadd.f32 %v4527_v60, %v1799_v55  ;;  %v4739_v30 = vadd.f32 %v4504_v52, %v1800_v34  ;;  %v4745_v43 = vadd.f32 %v4522_v16, %v1801_v5  ;;  %v1762_v20 = vmul.f32 %v4485_v1, %v4457_v46 }
 0x346   :  { %1854 = vst.msk [vmem:[#allocation3] sm:$0xff] %vm1853_vm4, %v3030_v22  ;;  %v1763_v63 = vmul.f32 %v4493_v42, %v4461_v59  ;;  %v1803_v21 = vmul.f32 %v4490_v54, %v1759_v8  ;;  %v1764_v49 = vmul.f32 %v4496_v51, %v4467_v15  ;;  %v1805_v46 = vmul.f32 %v4511_v10, %v1761_v0 }
 0x347   :  { %1855 = vst.msk [vmem:[#allocation3 + $0x8] sm:$0xff] %vm1853_vm4, %v3030_v22  ;;  %v1806_v1 = vmul.f32 %v4490_v54, %v1762_v20 }
 0x348   :  { %v1922_v61 = vld.sshfl [vmem:[#allocation1] sm:$0xff pattern:$0x73625140]  ;;  %1856 = vst.msk [vmem:[#allocation3 + $0x10] sm:$0xff] %vm1853_vm4, %v3030_v22  ;;  %v1807_v59 = vmul.f32 %v4499_v14, %v1763_v63  ;;  %v1808_v15 = vmul.f32 %v4511_v10, %v1764_v49  ;;  %v4783_v54 = vadd.f32 %v4527_v60, %v1805_v46 }
 0x349   :  { %1927 = vst [vmem:[#allocation1] ss:$4 sm:$0xff] %v4621_v4 }
 0x34a   :  { %1928 = vst [vmem:[#allocation1 + $0x1] ss:$4 sm:$0xff] %v4625_v9  ;;  %v4791_v31 = vadd.f32 %v4522_v16, %v1807_v59  ;;  %v4795_v55 = vadd.f32 %v4527_v60, %v1808_v15 }
 0x34b   :  { %v4644_v18 = vld.sshfl [vmem:[#allocation1 + $0x20] sm:$0xff pattern:$0x73625140]  ;;  %1929 = vst [vmem:[#allocation1 + $0x2] ss:$4 sm:$0xff] %v4630_v38 }
 0x34c   :  { %1931 = vst [vmem:[#allocation1 + $0x20] ss:$4 sm:$0xff] %v4636_v2 }
 0x34d   :  { %1932 = vst [vmem:[#allocation1 + $0x21] ss:$4 sm:$0xff] %v4642_v11 }
 0x34e   :  { %1933 = vst [vmem:[#allocation1 + $0x22] ss:$4 sm:$0xff] %v4650_v19 }
 0x34f   :  { %1974 = vst.msk [vmem:[#allocation3 + $0x22] sm:$0x3f] %vm988_vm12, %v1922_v61  ;;  %v4691_v61 = vadd.f32 %v4522_v16, %v1795_v53  ;;  %v1760_v53 = vmul.f32 %v4493_v42, %v4447_v32  ;;  %v4753_v32 = vadd.f32 %v4527_v60, %v1802_v29  ;;  %v4772_v42 = vadd.f32 %v4504_v52, %v1803_v21 }
 0x350   :  { %1857 = vst.msk [vmem:[#allocation3 + $0x18] sm:$0xff] %vm1853_vm4, %v3030_v22 }
 0x351   :  { %v1804_v24 = vmul.f32 %v4499_v14, %v1760_v53  ;;  %1859 = vst.msk [vmem:[#allocation3 + $0x28] sm:$0xff] %vm1853_vm4, %v3030_v22  ;;  %v4787_v14 = vadd.f32 %v4504_v52, %v1806_v1 }
 0x352   :  { %v4673_v6 = vld.sshfl [vmem:[#allocation1] sm:$0xff pattern:$0x73625140]  ;;  %1860 = vst.msk [vmem:[#allocation3 + $0x30] sm:$0xff] %vm1853_vm4, %v3030_v22 }
 0x353   :  { %1935 = vst [vmem:[#allocation1] ss:$4 sm:$0xff] %v4665_v23  ;;  %v4778_v51 = vadd.f32 %v4522_v16, %v1804_v24 }
 0x354   :  { %1936 = vst [vmem:[#allocation1 + $0x1] ss:$4 sm:$0xff] %v4671_v44 }
 0x355   :  { %v4693_v62 = vld.sshfl [vmem:[#allocation1 + $0x20] sm:$0xff pattern:$0x73625140]  ;;  %1937 = vst [vmem:[#allocation1 + $0x2] ss:$4 sm:$0xff] %v4679_v25 }
 0x356   :  { %1939 = vst [vmem:[#allocation1 + $0x20] ss:$4 sm:$0xff] %v4685_v7 }
 0x357   :  { %1940 = vst [vmem:[#allocation1 + $0x21] ss:$4 sm:$0xff] %v4691_v61 }
 0x358   :  { %1941 = vst [vmem:[#allocation1 + $0x22] ss:$4 sm:$0xff] %v4699_v47 }
 0x359   :  { %1861 = vst.msk [vmem:[#allocation3 + $0x38] sm:$0xff] %vm1853_vm4, %v3030_v22 }
 0x35a   :  { %1862 = vst.msk [vmem:[#allocation3 + $0x40] sm:$0xff] %vm1853_vm4, %v3030_v22 }
 0x35b   :  { %1863 = vst.msk [vmem:[#allocation3 + $0x48] sm:$0xff] %vm1853_vm4, %v3030_v22 }
 0x35c   :  { %v4726_v17 = vld.sshfl [vmem:[#allocation1] sm:$0xff pattern:$0x73625140]  ;;  %1864 = vst.msk [vmem:[#allocation3 + $0x50] sm:$0xff] %vm1853_vm4, %v3030_v22 }
 0x35d   :  { %1943 = vst [vmem:[#allocation1] ss:$4 sm:$0xff] %v4718_v27 }
 0x35e   :  { %1944 = vst [vmem:[#allocation1 + $0x1] ss:$4 sm:$0xff] %v4724_v45 }
 0x35f   :  { %v4747_v36 = vld.sshfl [vmem:[#allocation1 + $0x20] sm:$0xff pattern:$0x73625140]  ;;  %1945 = vst [vmem:[#allocation1 + $0x2] ss:$4 sm:$0xff] %v4733_v26 }
 0x360   :  { %1947 = vst [vmem:[#allocation1 + $0x20] ss:$4 sm:$0xff] %v4739_v30 }
 0x361   :  { %1948 = vst [vmem:[#allocation1 + $0x21] ss:$4 sm:$0xff] %v4745_v43 }
 0x362   :  { %1949 = vst [vmem:[#allocation1 + $0x22] ss:$4 sm:$0xff] %v4753_v32 }
 0x363   :  { %1865 = vst.msk [vmem:[#allocation3 + $0x58] sm:$0xff] %vm1853_vm4, %v3030_v22 }
 0x364   :  { %1866 = vst.msk [vmem:[#allocation3 + $0x60] sm:$0xff] %vm1853_vm4, %v3030_v22 }
 0x365   :  { %1867 = vst.msk [vmem:[#allocation3 + $0x68] sm:$0xff] %vm1853_vm4, %v3030_v22 }
 0x366   :  { %v1946_v35 = vld.sshfl [vmem:[#allocation1] sm:$0xff pattern:$0x73625140]  ;;  %1868 = vst.msk [vmem:[#allocation3 + $0x70] sm:$0xff] %vm1853_vm4, %v3030_v22 }
 0x367   :  { %1951 = vst [vmem:[#allocation1] ss:$4 sm:$0xff] %v4772_v42 }
 0x368   :  { %1952 = vst [vmem:[#allocation1 + $0x1] ss:$4 sm:$0xff] %v4778_v51 }
 0x369   :  { %v1950_v10 = vld.sshfl [vmem:[#allocation1 + $0x20] sm:$0xff pattern:$0x73625140]  ;;  %1953 = vst [vmem:[#allocation1 + $0x2] ss:$4 sm:$0xff] %v4783_v54 }
 0x36a   :  { %1955 = vst [vmem:[#allocation1 + $0x20] ss:$4 sm:$0xff] %v4787_v14 }
 0x36b   :  { %1956 = vst [vmem:[#allocation1 + $0x21] ss:$4 sm:$0xff] %v4791_v31 }
 0x36c   :  { %1957 = vst [vmem:[#allocation1 + $0x22] ss:$4 sm:$0xff] %v4795_v55 }
 0x36d   :  { %1869 = vst.msk [vmem:[#allocation3 + $0x78] sm:$0xff] %vm1853_vm4, %v3030_v22 }
 0x36e   :  { %1972 = vst.msk [vmem:[#allocation3 + $0x12] sm:$0x3f] %vm988_vm12, %v4581_v56 }
 0x36f   :  { %1973 = vst.msk [vmem:[#allocation3 + $0x1a] sm:$0x3f] %vm988_vm12, %v4600_v40 }
 0x370   :  { %v1954_v52 = vld.sshfl [vmem:[#allocation1] sm:$0xff pattern:$0x73625140]  ;;  %1975 = vst.msk [vmem:[#allocation3 + $0x2a] sm:$0x3f] %vm988_vm12, %v4644_v18 }
 0x371   :  { %1984 = vst [vmem:[#allocation1] ss:$4 sm:$0xff] %v4534_v12 }
 0x372   :  { %1986 = vst [vmem:[#allocation1 + $0x1] ss:$4 sm:$0xff] %v4537_v57 }
 0x373   :  { %v1958_v16 = vld.sshfl [vmem:[#allocation1 + $0x20] sm:$0xff pattern:$0x73625140]  ;;  %1988 = vst [vmem:[#allocation1 + $0x2] ss:$4 sm:$0xff] %v4540_v48 }
 0x374   :  { %1991 = vst [vmem:[#allocation1 + $0x20] ss:$4 sm:$0xff] %v4543_v33 }
 0x375   :  { %1993 = vst [vmem:[#allocation1 + $0x21] ss:$4 sm:$0xff] %v4548_v37 }
 0x376   :  { %1995 = vst [vmem:[#allocation1 + $0x22] ss:$4 sm:$0xff] %v4554_v58 }
 0x377   :  { %1976 = vst.msk [vmem:[#allocation3 + $0x32] sm:$0x3f] %vm988_vm12, %v4673_v6 }
 0x378   :  { %1977 = vst.msk [vmem:[#allocation3 + $0x3a] sm:$0x3f] %vm988_vm12, %v4693_v62 }
 0x379   :  { %1978 = vst.msk [vmem:[#allocation3 + $0x52] sm:$0x3f] %vm988_vm12, %v4726_v17 }
 0x37a   :  { %v1989_v60 = vld.sshfl [vmem:[#allocation1] sm:$0xff pattern:$0x73625140]  ;;  %1979 = vst.msk [vmem:[#allocation3 + $0x5a] sm:$0x3f] %vm988_vm12, %v4747_v36 }
 0x37b   :  { %1997 = vst [vmem:[#allocation1] ss:$4 sm:$0xff] %v4575_v3  ;;  %2037 = vrot.lane.b32.xlu0 %v1989_v60, %s3031_s5 }
 0x37c   :  { %1998 = vst [vmem:[#allocation1 + $0x1] ss:$4 sm:$0xff] %v4579_v50 }
 0x37d   :  { %v1996_v34 = vld.sshfl [vmem:[#allocation1 + $0x20] sm:$0xff pattern:$0x73625140]  ;;  %1999 = vst [vmem:[#allocation1 + $0x2] ss:$4 sm:$0xff] %v4586_v39 }
 0x37e   :  { %2001 = vst [vmem:[#allocation1 + $0x20] ss:$4 sm:$0xff] %v4592_v41  ;;  %2039 = vrot.lane.b32.xlu1 %v1996_v34, %s3031_s5 }
 0x37f   :  { %2002 = vst [vmem:[#allocation1 + $0x21] ss:$4 sm:$0xff] %v4598_v13 }
 0x380   :  { %2003 = vst [vmem:[#allocation1 + $0x22] ss:$4 sm:$0xff] %v4606_v28 }
 0x381   :  { %1980 = vst.msk [vmem:[#allocation3 + $0x62] sm:$0x3f] %vm988_vm12, %v1946_v35 }
 0x382   :  { %1981 = vst.msk [vmem:[#allocation3 + $0x6a] sm:$0x3f] %vm988_vm12, %v1950_v10 }
 0x383   :  { %1982 = vst.msk [vmem:[#allocation3 + $0x72] sm:$0x3f] %vm988_vm12, %v1954_v52 }
 0x384   :  { %v2000_v56 = vld.sshfl [vmem:[#allocation1] sm:$0xff pattern:$0x73625140]  ;;  %1983 = vst.msk [vmem:[#allocation3 + $0x7a] sm:$0x3f] %vm988_vm12, %v1958_v16  ;;  %vm2686_vm12 = vcmask 521664  }
 0x385   :  { %2005 = vst [vmem:[#allocation1] ss:$4 sm:$0xff] %v4621_v4  ;;  %2041 = vrot.lane.b32.xlu2 %v2000_v56, %s3031_s5 }
 0x386   :  { %2006 = vst [vmem:[#allocation1 + $0x1] ss:$4 sm:$0xff] %v4625_v9 }
 0x387   :  { %v2004_v22 = vld.sshfl [vmem:[#allocation1 + $0x20] sm:$0xff pattern:$0x73625140]  ;;  %2007 = vst [vmem:[#allocation1 + $0x2] ss:$4 sm:$0xff] %v4630_v38 }
 0x388   :  { %2009 = vst [vmem:[#allocation1 + $0x20] ss:$4 sm:$0xff] %v4636_v2  ;;  %2043 = vrot.lane.b32.xlu0 %v2004_v22, %s3031_s5 }
 0x389   :  { %2010 = vst [vmem:[#allocation1 + $0x21] ss:$4 sm:$0xff] %v4642_v11 }
 0x38a   :  { %2011 = vst [vmem:[#allocation1 + $0x22] ss:$4 sm:$0xff] %v4650_v19 }
 0x38e   :  { %v2008_v40 = vld.sshfl [vmem:[#allocation1] sm:$0xff pattern:$0x73625140] }
 0x38f   :  { %2013 = vst [vmem:[#allocation1] ss:$4 sm:$0xff] %v4665_v23  ;;  %2045 = vrot.lane.b32.xlu1 %v2008_v40, %s3031_s5 }
 0x390   :  { %2014 = vst [vmem:[#allocation1 + $0x1] ss:$4 sm:$0xff] %v4671_v44 }
 0x391   :  { %v2012_v18 = vld.sshfl [vmem:[#allocation1 + $0x20] sm:$0xff pattern:$0x73625140]  ;;  %2015 = vst [vmem:[#allocation1 + $0x2] ss:$4 sm:$0xff] %v4679_v25 }
 0x392   :  { %2017 = vst [vmem:[#allocation1 + $0x20] ss:$4 sm:$0xff] %v4685_v7  ;;  %2047 = vrot.lane.b32.xlu2 %v2012_v18, %s3031_s5 }
 0x393   :  { %2018 = vst [vmem:[#allocation1 + $0x21] ss:$4 sm:$0xff] %v4691_v61 }
 0x394   :  { %2019 = vst [vmem:[#allocation1 + $0x22] ss:$4 sm:$0xff] %v4699_v47 }
 0x398   :  { %v2016_v6 = vld.sshfl [vmem:[#allocation1] sm:$0xff pattern:$0x73625140] }
 0x399   :  { %2021 = vst [vmem:[#allocation1] ss:$4 sm:$0xff] %v4718_v27  ;;  %2049 = vrot.lane.b32.xlu0 %v2016_v6, %s3031_s5 }
 0x39a   :  { %2022 = vst [vmem:[#allocation1 + $0x1] ss:$4 sm:$0xff] %v4724_v45 }
 0x39b   :  { %v2020_v62 = vld.sshfl [vmem:[#allocation1 + $0x20] sm:$0xff pattern:$0x73625140]  ;;  %2023 = vst [vmem:[#allocation1 + $0x2] ss:$4 sm:$0xff] %v4733_v26 }
 0x39c   :  { %2025 = vst [vmem:[#allocation1 + $0x20] ss:$4 sm:$0xff] %v4739_v30  ;;  %2051 = vrot.lane.b32.xlu1 %v2020_v62, %s3031_s5 }
 0x39d   :  { %2026 = vst [vmem:[#allocation1 + $0x21] ss:$4 sm:$0xff] %v4745_v43 }
 0x39e   :  { %2027 = vst [vmem:[#allocation1 + $0x22] ss:$4 sm:$0xff] %v4753_v32 }
 0x3a2   :  { %v2024_v5 = vld.sshfl [vmem:[#allocation1] sm:$0xff pattern:$0x73625140] }
 0x3a3   :  { %2029 = vst [vmem:[#allocation1] ss:$4 sm:$0xff] %v4772_v42  ;;  %2053 = vrot.lane.b32.xlu2 %v2024_v5, %s3031_s5 }
 0x3a4   :  { %2030 = vst [vmem:[#allocation1 + $0x1] ss:$4 sm:$0xff] %v4778_v51 }
 0x3a5   :  { %v2028_v29 = vld.sshfl [vmem:[#allocation1 + $0x20] sm:$0xff pattern:$0x73625140]  ;;  %2031 = vst [vmem:[#allocation1 + $0x2] ss:$4 sm:$0xff] %v4783_v54 }
 0x3a6   :  { %2033 = vst [vmem:[#allocation1 + $0x20] ss:$4 sm:$0xff] %v4787_v14  ;;  %2055 = vrot.lane.b32.xlu0 %v2028_v29, %s3031_s5 }
 0x3a7   :  { %2034 = vst [vmem:[#allocation1 + $0x21] ss:$4 sm:$0xff] %v4791_v31 }
 0x3a8   :  { %2035 = vst [vmem:[#allocation1 + $0x22] ss:$4 sm:$0xff] %v4795_v55 }
 0x3ac   :  { %v2032_v17 = vld.sshfl [vmem:[#allocation1] sm:$0xff pattern:$0x73625140] }
 0x3ad   :  { %2086 = vst [vmem:[#allocation1] ss:$4 sm:$0xff] %v4534_v12  ;;  %2057 = vrot.lane.b32.xlu1 %v2032_v17, %s3031_s5 }
 0x3ae   :  { %2088 = vst [vmem:[#allocation1 + $0x1] ss:$4 sm:$0xff] %v4537_v57 }
 0x3af   :  { %v2036_v8 = vld.sshfl [vmem:[#allocation1 + $0x20] sm:$0xff pattern:$0x73625140]  ;;  %2090 = vst [vmem:[#allocation1 + $0x2] ss:$4 sm:$0xff] %v4540_v48 }
 0x3b0   :  { %2093 = vst [vmem:[#allocation1 + $0x20] ss:$4 sm:$0xff] %v4543_v33  ;;  %2059 = vrot.lane.b32.xlu2 %v2036_v8, %s3031_s5 }
 0x3b1   :  { %2095 = vst [vmem:[#allocation1 + $0x21] ss:$4 sm:$0xff] %v4548_v37 }
 0x3b2   :  { %2097 = vst [vmem:[#allocation1 + $0x22] ss:$4 sm:$0xff] %v4554_v58 }
 0x3b6   :  { %v2091_v53 = vld.sshfl [vmem:[#allocation1] sm:$0xff pattern:$0x73625140] }
 0x3b7   :  { %2099 = vst [vmem:[#allocation1] ss:$4 sm:$0xff] %v4575_v3  ;;  %2139 = vrot.lane.b32.xlu0 %v2091_v53, %s3022_s15 }
 0x3b8   :  { %2100 = vst [vmem:[#allocation1 + $0x1] ss:$4 sm:$0xff] %v4579_v50 }
 0x3b9   :  { %v2098_v0 = vld.sshfl [vmem:[#allocation1 + $0x20] sm:$0xff pattern:$0x73625140]  ;;  %2101 = vst [vmem:[#allocation1 + $0x2] ss:$4 sm:$0xff] %v4586_v39 }
 0x3ba   :  { %2103 = vst [vmem:[#allocation1 + $0x20] ss:$4 sm:$0xff] %v4592_v41  ;;  %2141 = vrot.lane.b32.xlu1 %v2098_v0, %s3022_s15 }
 0x3bb   :  { %2104 = vst [vmem:[#allocation1 + $0x21] ss:$4 sm:$0xff] %v4598_v13 }
 0x3bc   :  { %2105 = vst [vmem:[#allocation1 + $0x22] ss:$4 sm:$0xff] %v4606_v28 }
 0x3c0   :  { %v2102_v36 = vld.sshfl [vmem:[#allocation1] sm:$0xff pattern:$0x73625140] }
 0x3c1   :  { %2107 = vst [vmem:[#allocation1] ss:$4 sm:$0xff] %v4621_v4  ;;  %2143 = vrot.lane.b32.xlu0 %v2102_v36, %s3022_s15 }
 0x3c2   :  { %2108 = vst [vmem:[#allocation1 + $0x1] ss:$4 sm:$0xff] %v4625_v9 }
 0x3c3   :  { %v2106_v20 = vld.sshfl [vmem:[#allocation1 + $0x20] sm:$0xff pattern:$0x73625140]  ;;  %2109 = vst [vmem:[#allocation1 + $0x2] ss:$4 sm:$0xff] %v4630_v38 }
 0x3c4   :  { %2111 = vst [vmem:[#allocation1 + $0x20] ss:$4 sm:$0xff] %v4636_v2  ;;  %2145 = vrot.lane.b32.xlu2 %v2106_v20, %s3022_s15 }
 0x3c5   :  { %2112 = vst [vmem:[#allocation1 + $0x21] ss:$4 sm:$0xff] %v4642_v11 }
 0x3c6   :  { %2113 = vst [vmem:[#allocation1 + $0x22] ss:$4 sm:$0xff] %v4650_v19 }
 0x3ca   :  { %v2110_v63 = vld.sshfl [vmem:[#allocation1] sm:$0xff pattern:$0x73625140] }
 0x3cb   :  { %2115 = vst [vmem:[#allocation1] ss:$4 sm:$0xff] %v4665_v23  ;;  %2147 = vrot.lane.b32.xlu1 %v2110_v63, %s3022_s15 }
 0x3cc   :  { %2116 = vst [vmem:[#allocation1 + $0x1] ss:$4 sm:$0xff] %v4671_v44 }
 0x3cd   :  { %v4905_v21 = vld.sshfl [vmem:[#allocation1 + $0x20] sm:$0xff pattern:$0x73625140]  ;;  %2117 = vst [vmem:[#allocation1 + $0x2] ss:$4 sm:$0xff] %v4679_v25 }
 0x3ce   :  { %2119 = vst [vmem:[#allocation1 + $0x20] ss:$4 sm:$0xff] %v4685_v7 }
 0x3cf   :  { %2120 = vst [vmem:[#allocation1 + $0x21] ss:$4 sm:$0xff] %v4691_v61 }
 0x3d0   :  { %2121 = vst [vmem:[#allocation1 + $0x22] ss:$4 sm:$0xff] %v4699_v47 }
 0x3d4   :  { %v2118_v49 = vld.sshfl [vmem:[#allocation1] sm:$0xff pattern:$0x73625140] }
 0x3d5   :  { %2123 = vst [vmem:[#allocation1] ss:$4 sm:$0xff] %v4718_v27  ;;  %2151 = vrot.lane.b32.xlu2 %v2118_v49, %s3022_s15 }
 0x3d6   :  { %2124 = vst [vmem:[#allocation1 + $0x1] ss:$4 sm:$0xff] %v4724_v45 }
 0x3d7   :  { %v2122_v24 = vld.sshfl [vmem:[#allocation1 + $0x20] sm:$0xff pattern:$0x73625140]  ;;  %2125 = vst [vmem:[#allocation1 + $0x2] ss:$4 sm:$0xff] %v4733_v26 }
 0x3d8   :  { %2127 = vst [vmem:[#allocation1 + $0x20] ss:$4 sm:$0xff] %v4739_v30  ;;  %2153 = vrot.lane.b32.xlu1 %v2122_v24, %s3022_s15 }
 0x3d9   :  { %2128 = vst [vmem:[#allocation1 + $0x21] ss:$4 sm:$0xff] %v4745_v43 }
 0x3da   :  { %2129 = vst [vmem:[#allocation1 + $0x22] ss:$4 sm:$0xff] %v4753_v32 }
 0x3de   :  { %v2126_v46 = vld.sshfl [vmem:[#allocation1] sm:$0xff pattern:$0x73625140] }
 0x3df   :  { %2131 = vst [vmem:[#allocation1] ss:$4 sm:$0xff] %v4772_v42  ;;  %2155 = vrot.lane.b32.xlu0 %v2126_v46, %s3022_s15  ;;  %v2042_v59 = vpop.permute.xlu2 %2041 }
 0x3e0   :  { %2132 = vst [vmem:[#allocation1 + $0x1] ss:$4 sm:$0xff] %v4778_v51 }
 0x3e1   :  { %v2130_v1 = vld.sshfl [vmem:[#allocation1 + $0x20] sm:$0xff pattern:$0x73625140]  ;;  %2133 = vst [vmem:[#allocation1 + $0x2] ss:$4 sm:$0xff] %v4783_v54 }
 0x3e2   :  { %2135 = vst [vmem:[#allocation1 + $0x20] ss:$4 sm:$0xff] %v4787_v14  ;;  %2157 = vrot.lane.b32.xlu1 %v2130_v1, %s3022_s15 }
 0x3e3   :  { %2136 = vst [vmem:[#allocation1 + $0x21] ss:$4 sm:$0xff] %v4791_v31 }
 0x3e4   :  { %2137 = vst [vmem:[#allocation1 + $0x22] ss:$4 sm:$0xff] %v4795_v55 }
 0x3e5   :  { %2076 = vst.msk [vmem:[#allocation3 + $0x21] sm:$0x3f] %vm2073_vm5, %v2042_v59 }
 0x3e8   :  { %v4928_v15 = vld.sshfl [vmem:[#allocation1] sm:$0xff pattern:$0x73625140] }
 0x3e9   :  { %2188 = vst [vmem:[#allocation1] ss:$4 sm:$0xff] %v4534_v12 }
 0x3ea   :  { %2190 = vst [vmem:[#allocation1 + $0x1] ss:$4 sm:$0xff] %v4537_v57 }
 0x3eb   :  { %v4932_v35 = vld.sshfl [vmem:[#allocation1 + $0x20] sm:$0xff pattern:$0x73625140]  ;;  %2192 = vst [vmem:[#allocation1 + $0x2] ss:$4 sm:$0xff] %v4540_v48 }
 0x3ec   :  { %2195 = vst [vmem:[#allocation1 + $0x20] ss:$4 sm:$0xff] %v4543_v33  ;;  %v2048_v16 = vpop.permute.xlu2 %2047 }
 0x3ed   :  { %2197 = vst [vmem:[#allocation1 + $0x21] ss:$4 sm:$0xff] %v4548_v37  ;;  %v2038_v22 = vpop.permute.xlu0 %2037 }
 0x3ee   :  { %2199 = vst [vmem:[#allocation1 + $0x22] ss:$4 sm:$0xff] %v4554_v58 }
 0x3ef   :  { %2079 = vst.msk [vmem:[#allocation3 + $0x39] sm:$0x3f] %vm2073_vm5, %v2048_v16 }
 0x3f0   :  { %v2040_v56 = vpop.permute.xlu1 %2039  ;;  %2074 = vst.msk [vmem:[#allocation3 + $0x11] sm:$0x3f] %vm2073_vm5, %v2038_v22 }
 0x3f1   :  { %2075 = vst.msk [vmem:[#allocation3 + $0x19] sm:$0x3f] %vm2073_vm5, %v2040_v56 }
 0x3f2   :  { %v2193_v10 = vld.sshfl [vmem:[#allocation1] sm:$0xff pattern:$0x73625140] }
 0x3f3   :  { %2201 = vst [vmem:[#allocation1] ss:$4 sm:$0xff] %v4575_v3  ;;  %2241 = vrot.lane.b32.xlu2 %v2193_v10, %s3032_s6 }
 0x3f4   :  { %2202 = vst [vmem:[#allocation1 + $0x1] ss:$4 sm:$0xff] %v4579_v50 }
 0x3f5   :  { %v2200_v52 = vld.sshfl [vmem:[#allocation1 + $0x20] sm:$0xff pattern:$0x73625140]  ;;  %2203 = vst [vmem:[#allocation1 + $0x2] ss:$4 sm:$0xff] %v4586_v39 }
 0x3f6   :  { %2205 = vst [vmem:[#allocation1 + $0x20] ss:$4 sm:$0xff] %v4592_v41 }
 0x3f7   :  { %2206 = vst [vmem:[#allocation1 + $0x21] ss:$4 sm:$0xff] %v4598_v13 }
 0x3f8   :  { %2207 = vst [vmem:[#allocation1 + $0x22] ss:$4 sm:$0xff] %v4606_v28 }
 0x3fa   :  { %v2044_v62 = vpop.permute.xlu0 %2043 }
 0x3fb   :  { %2243 = vrot.lane.b32.xlu2 %v2200_v52, %s3032_s6  ;;  %2077 = vst.msk [vmem:[#allocation3 + $0x29] sm:$0x3f] %vm2073_vm5, %v2044_v62 }
 0x3fc   :  { %v2204_v60 = vld.sshfl [vmem:[#allocation1] sm:$0xff pattern:$0x73625140] }
 0x3fd   :  { %2209 = vst [vmem:[#allocation1] ss:$4 sm:$0xff] %v4621_v4  ;;  %2245 = vrot.lane.b32.xlu0 %v2204_v60, %s3032_s6  ;;  %v2054_v6 = vpop.permute.xlu2 %2053 }
 0x3fe   :  { %2210 = vst [vmem:[#allocation1 + $0x1] ss:$4 sm:$0xff] %v4625_v9 }
 0x3ff   :  { %v2208_v34 = vld.sshfl [vmem:[#allocation1 + $0x20] sm:$0xff pattern:$0x73625140]  ;;  %2211 = vst [vmem:[#allocation1 + $0x2] ss:$4 sm:$0xff] %v4630_v38 }
 0x400   :  { %2213 = vst [vmem:[#allocation1 + $0x20] ss:$4 sm:$0xff] %v4636_v2 }
 0x401   :  { %2214 = vst [vmem:[#allocation1 + $0x21] ss:$4 sm:$0xff] %v4642_v11  ;;  %v2046_v5 = vpop.permute.xlu1 %2045 }
 0x402   :  { %2215 = vst [vmem:[#allocation1 + $0x22] ss:$4 sm:$0xff] %v4650_v19 }
 0x403   :  { %2247 = vrot.lane.b32.xlu2 %v2208_v34, %s3032_s6  ;;  %2082 = vst.msk [vmem:[#allocation3 + $0x61] sm:$0x3f] %vm2073_vm5, %v2054_v6 }
 0x404   :  { %2078 = vst.msk [vmem:[#allocation3 + $0x31] sm:$0x3f] %vm2073_vm5, %v2046_v5 }
 0x406   :  { %v2212_v40 = vld.sshfl [vmem:[#allocation1] sm:$0xff pattern:$0x73625140] }
 0x407   :  { %2217 = vst [vmem:[#allocation1] ss:$4 sm:$0xff] %v4665_v23  ;;  %2249 = vrot.lane.b32.xlu1 %v2212_v40, %s3032_s6 }
 0x408   :  { %2218 = vst [vmem:[#allocation1 + $0x1] ss:$4 sm:$0xff] %v4671_v44 }
 0x409   :  { %v2216_v18 = vld.sshfl [vmem:[#allocation1 + $0x20] sm:$0xff pattern:$0x73625140]  ;;  %2219 = vst [vmem:[#allocation1 + $0x2] ss:$4 sm:$0xff] %v4679_v25 }
 0x40a   :  { %2221 = vst [vmem:[#allocation1 + $0x20] ss:$4 sm:$0xff] %v4685_v7  ;;  %2251 = vrot.lane.b32.xlu0 %v2216_v18, %s3032_s6  ;;  %v2060_v8 = vpop.permute.xlu2 %2059 }
 0x40b   :  { %2222 = vst [vmem:[#allocation1 + $0x21] ss:$4 sm:$0xff] %v4691_v61  ;;  %v2050_v53 = vpop.permute.xlu0 %2049 }
 0x40c   :  { %2223 = vst [vmem:[#allocation1 + $0x22] ss:$4 sm:$0xff] %v4699_v47 }
 0x40d   :  { %2085 = vst.msk [vmem:[#allocation3 + $0x79] sm:$0x3f] %vm2073_vm5, %v2060_v8 }
 0x40e   :  { %v2052_v0 = vpop.permute.xlu1 %2051  ;;  %2080 = vst.msk [vmem:[#allocation3 + $0x51] sm:$0x3f] %vm2073_vm5, %v2050_v53 }
 0x40f   :  { %2081 = vst.msk [vmem:[#allocation3 + $0x59] sm:$0x3f] %vm2073_vm5, %v2052_v0 }
 0x410   :  { %v2220_v29 = vld.sshfl [vmem:[#allocation1] sm:$0xff pattern:$0x73625140] }
 0x411   :  { %2225 = vst [vmem:[#allocation1] ss:$4 sm:$0xff] %v4718_v27 }
 0x412   :  { %2226 = vst [vmem:[#allocation1 + $0x1] ss:$4 sm:$0xff] %v4724_v45  ;;  %2253 = vrot.lane.b32.xlu0 %v2220_v29, %s3032_s6 }
 0x413   :  { %v2224_v17 = vld.sshfl [vmem:[#allocation1 + $0x20] sm:$0xff pattern:$0x73625140]  ;;  %2227 = vst [vmem:[#allocation1 + $0x2] ss:$4 sm:$0xff] %v4733_v26 }
 0x414   :  { %2229 = vst [vmem:[#allocation1 + $0x20] ss:$4 sm:$0xff] %v4739_v30  ;;  %2255 = vrot.lane.b32.xlu1 %v2224_v17, %s3032_s6 }
 0x415   :  { %2230 = vst [vmem:[#allocation1 + $0x21] ss:$4 sm:$0xff] %v4745_v43 }
 0x416   :  { %2231 = vst [vmem:[#allocation1 + $0x22] ss:$4 sm:$0xff] %v4753_v32 }
 0x418   :  { %v2056_v63 = vpop.permute.xlu0 %2055 }
 0x419   :  { %2083 = vst.msk [vmem:[#allocation3 + $0x69] sm:$0x3f] %vm2073_vm5, %v2056_v63 }
 0x41a   :  { %v2228_v36 = vld.sshfl [vmem:[#allocation1] sm:$0xff pattern:$0x73625140] }
 0x41b   :  { %2235 = vst [vmem:[#allocation1 + $0x2] ss:$4 sm:$0xff] %v4783_v54  ;;  %2257 = vrot.lane.b32.xlu0 %v2228_v36, %s3032_s6 }
 0x41c   :  { %2233 = vst [vmem:[#allocation1] ss:$4 sm:$0xff] %v4772_v42 }
 0x41d   :  { %v2232_v20 = vld.sshfl [vmem:[#allocation1 + $0x20] sm:$0xff pattern:$0x73625140]  ;;  %2234 = vst [vmem:[#allocation1 + $0x1] ss:$4 sm:$0xff] %v4778_v51 }
 0x41e   :  { %2237 = vst [vmem:[#allocation1 + $0x20] ss:$4 sm:$0xff] %v4787_v14  ;;  %2259 = vrot.lane.b32.xlu2 %v2232_v20, %s3032_s6  ;;  %v2146_v49 = vpop.permute.xlu2 %2145 }
 0x41f   :  { %2238 = vst [vmem:[#allocation1 + $0x21] ss:$4 sm:$0xff] %v4791_v31  ;;  %v2058_v24 = vpop.permute.xlu1 %2057 }
 0x420   :  { %2239 = vst [vmem:[#allocation1 + $0x22] ss:$4 sm:$0xff] %v4795_v55 }
 0x421   :  { %2179 = vst.msk [vmem:[#allocation3 + $0x28] sm:$0x3f] %vm2175_vm6, %v2146_v49 }
 0x422   :  { %2084 = vst.msk [vmem:[#allocation3 + $0x71] sm:$0x3f] %vm2073_vm5, %v2058_v24 }
 0x424   :  { %v2236_v46 = vld.sshfl [vmem:[#allocation1] sm:$0xff pattern:$0x73625140] }
 0x425   :  { %2291 = vst [vmem:[#allocation1] ss:$4 sm:$0xff] %v4534_v12 }
 0x426   :  { %2261 = vrot.lane.b32.xlu2 %v2236_v46, %s3032_s6  ;;  %2293 = vst [vmem:[#allocation1 + $0x1] ss:$4 sm:$0xff] %v4537_v57 }
 0x427   :  { %v4993_v1 = vld.sshfl [vmem:[#allocation1 + $0x20] sm:$0xff pattern:$0x73625140]  ;;  %2295 = vst [vmem:[#allocation1 + $0x2] ss:$4 sm:$0xff] %v4540_v48 }
 0x428   :  { %2298 = vst [vmem:[#allocation1 + $0x20] ss:$4 sm:$0xff] %v4543_v33 }
 0x429   :  { %2300 = vst [vmem:[#allocation1 + $0x21] ss:$4 sm:$0xff] %v4548_v37  ;;  %v2140_v59 = vpop.permute.xlu0 %2139 }
 0x42a   :  { %2302 = vst [vmem:[#allocation1 + $0x22] ss:$4 sm:$0xff] %v4554_v58 }
 0x42b   :  { %2176 = vst.msk [vmem:[#allocation3 + $0x10] sm:$0x3f] %vm2175_vm6, %v2140_v59 }
 0x42c   :  { %v2142_v10 = vpop.permute.xlu1 %2141 }
 0x42d   :  { %2177 = vst.msk [vmem:[#allocation3 + $0x18] sm:$0x3f] %vm2175_vm6, %v2142_v10 }
 0x42e   :  { %v2296_v52 = vld.sshfl [vmem:[#allocation1] sm:$0xff pattern:$0x73625140] }
 0x42f   :  { %2344 = vrot.lane.b32.xlu0 %v2296_v52, %s3023_s16  ;;  %2304 = vst [vmem:[#allocation1] ss:$4 sm:$0xff] %v4575_v3  ;;  %v2152_v60 = vpop.permute.xlu2 %2151 }
 0x430   :  { %2305 = vst [vmem:[#allocation1 + $0x1] ss:$4 sm:$0xff] %v4579_v50 }
 0x431   :  { %v2303_v16 = vld.sshfl [vmem:[#allocation1 + $0x20] sm:$0xff pattern:$0x73625140]  ;;  %2306 = vst [vmem:[#allocation1 + $0x2] ss:$4 sm:$0xff] %v4586_v39 }
 0x432   :  { %2346 = vrot.lane.b32.xlu1 %v2303_v16, %s3023_s16  ;;  %2308 = vst [vmem:[#allocation1 + $0x20] ss:$4 sm:$0xff] %v4592_v41 }
 0x433   :  { %2309 = vst [vmem:[#allocation1 + $0x21] ss:$4 sm:$0xff] %v4598_v13  ;;  %v2144_v34 = vpop.permute.xlu0 %2143 }
 0x434   :  { %2310 = vst [vmem:[#allocation1 + $0x22] ss:$4 sm:$0xff] %v4606_v28 }
 0x435   :  { %2182 = vst.msk [vmem:[#allocation3 + $0x50] sm:$0x3f] %vm2175_vm6, %v2152_v60 }
 0x436   :  { %2178 = vst.msk [vmem:[#allocation3 + $0x20] sm:$0x3f] %vm2175_vm6, %v2144_v34 }
 0x438   :  { %v2307_v56 = vld.sshfl [vmem:[#allocation1] sm:$0xff pattern:$0x73625140] }
 0x439   :  { %2348 = vrot.lane.b32.xlu2 %v2307_v56, %s3023_s16  ;;  %2312 = vst [vmem:[#allocation1] ss:$4 sm:$0xff] %v4621_v4 }
 0x43a   :  { %2313 = vst [vmem:[#allocation1 + $0x1] ss:$4 sm:$0xff] %v4625_v9 }
 0x43b   :  { %v2311_v22 = vld.sshfl [vmem:[#allocation1 + $0x20] sm:$0xff pattern:$0x73625140]  ;;  %2314 = vst [vmem:[#allocation1 + $0x2] ss:$4 sm:$0xff] %v4630_v38 }
 0x43c   :  { %2350 = vrot.lane.b32.xlu1 %v2311_v22, %s3023_s16  ;;  %2316 = vst [vmem:[#allocation1 + $0x20] ss:$4 sm:$0xff] %v4636_v2 }
 0x43d   :  { %2317 = vst [vmem:[#allocation1 + $0x21] ss:$4 sm:$0xff] %v4642_v11  ;;  %v2148_v40 = vpop.permute.xlu1 %2147 }
 0x43e   :  { %2318 = vst [vmem:[#allocation1 + $0x22] ss:$4 sm:$0xff] %v4650_v19 }
 0x43f   :  { %2180 = vst.msk [vmem:[#allocation3 + $0x30] sm:$0x3f] %vm2175_vm6, %v2148_v40 }
 0x442   :  { %v2315_v18 = vld.sshfl [vmem:[#allocation1] sm:$0xff pattern:$0x73625140] }
 0x443   :  { %2352 = vrot.lane.b32.xlu0 %v2315_v18, %s3023_s16  ;;  %2320 = vst [vmem:[#allocation1] ss:$4 sm:$0xff] %v4665_v23 }
 0x444   :  { %2321 = vst [vmem:[#allocation1 + $0x1] ss:$4 sm:$0xff] %v4671_v44 }
 0x445   :  { %2322 = vst [vmem:[#allocation1 + $0x2] ss:$4 sm:$0xff] %v4679_v25  ;;  %v5024_v6 = vld.sshfl [vmem:[#allocation1 + $0x20] sm:$0xff pattern:$0x73625140] }
 0x446   :  { %2324 = vst [vmem:[#allocation1 + $0x20] ss:$4 sm:$0xff] %v4685_v7 }
 0x447   :  { %2325 = vst [vmem:[#allocation1 + $0x21] ss:$4 sm:$0xff] %v4691_v61 }
 0x448   :  { %2326 = vst [vmem:[#allocation1 + $0x22] ss:$4 sm:$0xff] %v4699_v47 }
 0x44a   :  { %v2154_v62 = vpop.permute.xlu1 %2153 }
 0x44b   :  { %2183 = vst.msk [vmem:[#allocation3 + $0x58] sm:$0x3f] %vm2175_vm6, %v2154_v62 }
 0x44c   :  { %v2323_v5 = vld.sshfl [vmem:[#allocation1] sm:$0xff pattern:$0x73625140] }
 0x44d   :  { %2356 = vrot.lane.b32.xlu2 %v2323_v5, %s3023_s16  ;;  %2328 = vst [vmem:[#allocation1] ss:$4 sm:$0xff] %v4718_v27  ;;  %v2242_v29 = vpop.permute.xlu2 %2241 }
 0x44e   :  { %2329 = vst [vmem:[#allocation1 + $0x1] ss:$4 sm:$0xff] %v4724_v45 }
 0x44f   :  { %v2327_v17 = vld.sshfl [vmem:[#allocation1 + $0x20] sm:$0xff pattern:$0x73625140]  ;;  %2330 = vst [vmem:[#allocation1 + $0x2] ss:$4 sm:$0xff] %v4733_v26 }
 0x450   :  { %2358 = vrot.lane.b32.xlu0 %v2327_v17, %s3023_s16  ;;  %2332 = vst [vmem:[#allocation1 + $0x20] ss:$4 sm:$0xff] %v4739_v30 }
 0x451   :  { %2333 = vst [vmem:[#allocation1 + $0x21] ss:$4 sm:$0xff] %v4745_v43  ;;  %v2156_v8 = vpop.permute.xlu0 %2155 }
 0x452   :  { %2334 = vst [vmem:[#allocation1 + $0x22] ss:$4 sm:$0xff] %v4753_v32 }
 0x453   :  { %2279 = vst.msk [vmem:[#allocation3 + $0xa] sm:$0x3f] %vm2278_vm7, %v2242_v29 }
 0x454   :  { %v2158_v53 = vpop.permute.xlu1 %2157  ;;  %2184 = vst.msk [vmem:[#allocation3 + $0x60] sm:$0x3f] %vm2175_vm6, %v2156_v8 }
 0x455   :  { %2185 = vst.msk [vmem:[#allocation3 + $0x68] sm:$0x3f] %vm2175_vm6, %v2158_v53  ;;  %v2244_v0 = vpop.permute.xlu2 %2243 }
 0x456   :  { %v2331_v36 = vld.sshfl [vmem:[#allocation1] sm:$0xff pattern:$0x73625140]  ;;  %2280 = vst.msk [vmem:[#allocation3 + $0x12] sm:$0x3f] %vm2278_vm7, %v2244_v0 }
 0x457   :  { %2360 = vrot.lane.b32.xlu2 %v2331_v36, %s3023_s16  ;;  %2336 = vst [vmem:[#allocation1] ss:$4 sm:$0xff] %v4772_v42 }
 0x458   :  { %2337 = vst [vmem:[#allocation1 + $0x1] ss:$4 sm:$0xff] %v4778_v51 }
 0x459   :  { %v2335_v20 = vld.sshfl [vmem:[#allocation1 + $0x20] sm:$0xff pattern:$0x73625140]  ;;  %2338 = vst [vmem:[#allocation1 + $0x2] ss:$4 sm:$0xff] %v4783_v54 }
 0x45a   :  { %2362 = vrot.lane.b32.xlu1 %v2335_v20, %s3023_s16  ;;  %2340 = vst [vmem:[#allocation1 + $0x20] ss:$4 sm:$0xff] %v4787_v14 }
 0x45b   :  { %2341 = vst [vmem:[#allocation1 + $0x21] ss:$4 sm:$0xff] %v4791_v31 }
 0x45c   :  { %2342 = vst [vmem:[#allocation1 + $0x22] ss:$4 sm:$0xff] %v4795_v55 }
 0x45d   :  { %v2248_v63 = vpop.permute.xlu2 %2247 }
 0x45e   :  { %2282 = vst.msk [vmem:[#allocation3 + $0x22] sm:$0x3f] %vm2278_vm7, %v2248_v63 }
 0x460   :  { %v2339_v49 = vld.sshfl [vmem:[#allocation1] sm:$0xff pattern:$0x73625140] }
 0x461   :  { %2364 = vrot.lane.b32.xlu0 %v2339_v49, %s3023_s16  ;;  %2393 = vst [vmem:[#allocation1] ss:$4 sm:$0xff] %v4534_v12 }
 0x462   :  { %2395 = vst [vmem:[#allocation1 + $0x1] ss:$4 sm:$0xff] %v4537_v57 }
 0x463   :  { %2397 = vst [vmem:[#allocation1 + $0x2] ss:$4 sm:$0xff] %v4540_v48  ;;  %v5055_v24 = vld.sshfl [vmem:[#allocation1 + $0x20] sm:$0xff pattern:$0x73625140] }
 0x464   :  { %2400 = vst [vmem:[#allocation1 + $0x20] ss:$4 sm:$0xff] %v4543_v33 }
 0x465   :  { %2402 = vst [vmem:[#allocation1 + $0x21] ss:$4 sm:$0xff] %v4548_v37 }
 0x466   :  { %2404 = vst [vmem:[#allocation1 + $0x22] ss:$4 sm:$0xff] %v4554_v58 }
 0x46a   :  { %v2398_v46 = vld.sshfl [vmem:[#allocation1] sm:$0xff pattern:$0x73625140] }
 0x46b   :  { %2446 = vrot.lane.b32.xlu1 %v2398_v46, %s3033_s30  ;;  %2406 = vst [vmem:[#allocation1] ss:$4 sm:$0xff] %v4575_v3 }
 0x46c   :  { %2407 = vst [vmem:[#allocation1 + $0x1] ss:$4 sm:$0xff] %v4579_v50 }
 0x46d   :  { %v2405_v59 = vld.sshfl [vmem:[#allocation1 + $0x20] sm:$0xff pattern:$0x73625140]  ;;  %2408 = vst [vmem:[#allocation1 + $0x2] ss:$4 sm:$0xff] %v4586_v39 }
 0x46e   :  { %2448 = vrot.lane.b32.xlu0 %v2405_v59, %s3033_s30  ;;  %2410 = vst [vmem:[#allocation1 + $0x20] ss:$4 sm:$0xff] %v4592_v41 }
 0x46f   :  { %2411 = vst [vmem:[#allocation1 + $0x21] ss:$4 sm:$0xff] %v4598_v13  ;;  %v2246_v10 = vpop.permute.xlu0 %2245 }
 0x470   :  { %2412 = vst [vmem:[#allocation1 + $0x22] ss:$4 sm:$0xff] %v4606_v28 }
 0x471   :  { %2281 = vst.msk [vmem:[#allocation3 + $0x1a] sm:$0x3f] %vm2278_vm7, %v2246_v10 }
 0x474   :  { %v2409_v52 = vld.sshfl [vmem:[#allocation1] sm:$0xff pattern:$0x73625140] }
 0x475   :  { %2450 = vrot.lane.b32.xlu1 %v2409_v52, %s3033_s30  ;;  %2414 = vst [vmem:[#allocation1] ss:$4 sm:$0xff] %v4621_v4 }
 0x476   :  { %2415 = vst [vmem:[#allocation1 + $0x1] ss:$4 sm:$0xff] %v4625_v9 }
 0x477   :  { %v2413_v16 = vld.sshfl [vmem:[#allocation1 + $0x20] sm:$0xff pattern:$0x73625140]  ;;  %2416 = vst [vmem:[#allocation1 + $0x2] ss:$4 sm:$0xff] %v4630_v38 }
 0x478   :  { %2452 = vrot.lane.b32.xlu0 %v2413_v16, %s3033_s30  ;;  %2418 = vst [vmem:[#allocation1 + $0x20] ss:$4 sm:$0xff] %v4636_v2  ;;  %v2260_v60 = vpop.permute.xlu2 %2259 }
 0x479   :  { %2419 = vst [vmem:[#allocation1 + $0x21] ss:$4 sm:$0xff] %v4642_v11  ;;  %v2250_v34 = vpop.permute.xlu1 %2249 }
 0x47a   :  { %2420 = vst [vmem:[#allocation1 + $0x22] ss:$4 sm:$0xff] %v4650_v19 }
 0x47b   :  { %2288 = vst.msk [vmem:[#allocation3 + $0x62] sm:$0x3f] %vm2278_vm7, %v2260_v60 }
 0x47c   :  { %v2252_v56 = vpop.permute.xlu0 %2251  ;;  %2283 = vst.msk [vmem:[#allocation3 + $0x2a] sm:$0x3f] %vm2278_vm7, %v2250_v34 }
 0x47d   :  { %2284 = vst.msk [vmem:[#allocation3 + $0x32] sm:$0x3f] %vm2278_vm7, %v2252_v56 }
 0x47e   :  { %v2417_v22 = vld.sshfl [vmem:[#allocation1] sm:$0xff pattern:$0x73625140] }
 0x47f   :  { %2454 = vrot.lane.b32.xlu2 %v2417_v22, %s3033_s30  ;;  %2422 = vst [vmem:[#allocation1] ss:$4 sm:$0xff] %v4665_v23 }
 0x480   :  { %2423 = vst [vmem:[#allocation1 + $0x1] ss:$4 sm:$0xff] %v4671_v44  ;;  %v2262_v18 = vpop.permute.xlu2 %2261 }
 0x481   :  { %2424 = vst [vmem:[#allocation1 + $0x2] ss:$4 sm:$0xff] %v4679_v25  ;;  %v5084_v40 = vld.sshfl [vmem:[#allocation1 + $0x20] sm:$0xff pattern:$0x73625140] }
 0x482   :  { %2426 = vst [vmem:[#allocation1 + $0x20] ss:$4 sm:$0xff] %v4685_v7 }
 0x483   :  { %2427 = vst [vmem:[#allocation1 + $0x21] ss:$4 sm:$0xff] %v4691_v61 }
 0x484   :  { %2428 = vst [vmem:[#allocation1 + $0x22] ss:$4 sm:$0xff] %v4699_v47  ;;  %v2254_v62 = vpop.permute.xlu0 %2253 }
 0x485   :  { %2289 = vst.msk [vmem:[#allocation3 + $0x6a] sm:$0x3f] %vm2278_vm7, %v2262_v18 }
 0x486   :  { %v2256_v5 = vpop.permute.xlu1 %2255  ;;  %2285 = vst.msk [vmem:[#allocation3 + $0x4a] sm:$0x3f] %vm2278_vm7, %v2254_v62 }
 0x487   :  { %2286 = vst.msk [vmem:[#allocation3 + $0x52] sm:$0x3f] %vm2278_vm7, %v2256_v5 }
 0x488   :  { %v2425_v29 = vld.sshfl [vmem:[#allocation1] sm:$0xff pattern:$0x73625140] }
 0x489   :  { %2458 = vrot.lane.b32.xlu1 %v2425_v29, %s3033_s30  ;;  %2430 = vst [vmem:[#allocation1] ss:$4 sm:$0xff] %v4718_v27 }
 0x48a   :  { %2431 = vst [vmem:[#allocation1 + $0x1] ss:$4 sm:$0xff] %v4724_v45 }
 0x48b   :  { %v2429_v17 = vld.sshfl [vmem:[#allocation1 + $0x20] sm:$0xff pattern:$0x73625140]  ;;  %2432 = vst [vmem:[#allocation1 + $0x2] ss:$4 sm:$0xff] %v4733_v26 }
 0x48c   :  { %2460 = vrot.lane.b32.xlu2 %v2429_v17, %s3033_s30  ;;  %2434 = vst [vmem:[#allocation1 + $0x20] ss:$4 sm:$0xff] %v4739_v30 }
 0x48d   :  { %2435 = vst [vmem:[#allocation1 + $0x21] ss:$4 sm:$0xff] %v4745_v43  ;;  %v2258_v8 = vpop.permute.xlu0 %2257 }
 0x48e   :  { %2436 = vst [vmem:[#allocation1 + $0x22] ss:$4 sm:$0xff] %v4753_v32 }
 0x48f   :  { %2287 = vst.msk [vmem:[#allocation3 + $0x5a] sm:$0x3f] %vm2278_vm7, %v2258_v8 }
 0x492   :  { %v2433_v53 = vld.sshfl [vmem:[#allocation1] sm:$0xff pattern:$0x73625140] }
 0x493   :  { %2462 = vrot.lane.b32.xlu1 %v2433_v53, %s3033_s30  ;;  %2438 = vst [vmem:[#allocation1] ss:$4 sm:$0xff] %v4772_v42  ;;  %v2349_v36 = vpop.permute.xlu2 %2348 }
 0x494   :  { %2439 = vst [vmem:[#allocation1 + $0x1] ss:$4 sm:$0xff] %v4778_v51 }
 0x495   :  { %v2437_v0 = vld.sshfl [vmem:[#allocation1 + $0x20] sm:$0xff pattern:$0x73625140]  ;;  %2440 = vst [vmem:[#allocation1 + $0x2] ss:$4 sm:$0xff] %v4783_v54 }
 0x496   :  { %2464 = vrot.lane.b32.xlu0 %v2437_v0, %s3033_s30  ;;  %2442 = vst [vmem:[#allocation1 + $0x20] ss:$4 sm:$0xff] %v4787_v14 }
 0x497   :  { %2443 = vst [vmem:[#allocation1 + $0x21] ss:$4 sm:$0xff] %v4791_v31 }
 0x498   :  { %2444 = vst [vmem:[#allocation1 + $0x22] ss:$4 sm:$0xff] %v4795_v55 }
 0x499   :  { %2383 = vst.msk [vmem:[#allocation3 + $0x19] sm:$0x3f] %vm2380_vm8, %v2349_v36 }
 0x49c   :  { %v2441_v20 = vld.sshfl [vmem:[#allocation1] sm:$0xff pattern:$0x73625140] }
 0x49d   :  { %2466 = vrot.lane.b32.xlu2 %v2441_v20, %s3033_s30  ;;  %2495 = vst [vmem:[#allocation1] ss:$4 sm:$0xff] %v4534_v12 }
 0x49e   :  { %2497 = vst [vmem:[#allocation1 + $0x1] ss:$4 sm:$0xff] %v4537_v57 }
 0x49f   :  { %2499 = vst [vmem:[#allocation1 + $0x2] ss:$4 sm:$0xff] %v4540_v48  ;;  %v5114_v63 = vld.sshfl [vmem:[#allocation1 + $0x20] sm:$0xff pattern:$0x73625140] }
 0x4a0   :  { %2502 = vst [vmem:[#allocation1 + $0x20] ss:$4 sm:$0xff] %v4543_v33 }
 0x4a1   :  { %2504 = vst [vmem:[#allocation1 + $0x21] ss:$4 sm:$0xff] %v4548_v37  ;;  %v2345_v49 = vpop.permute.xlu0 %2344 }
 0x4a2   :  { %2506 = vst [vmem:[#allocation1 + $0x22] ss:$4 sm:$0xff] %v4554_v58 }
 0x4a3   :  { %2381 = vst.msk [vmem:[#allocation3 + $0x9] sm:$0x3f] %vm2380_vm8, %v2345_v49 }
 0x4a4   :  { %v2347_v46 = vpop.permute.xlu1 %2346 }
 0x4a5   :  { %2382 = vst.msk [vmem:[#allocation3 + $0x11] sm:$0x3f] %vm2380_vm8, %v2347_v46 }
 0x4a6   :  { %v2500_v59 = vld.sshfl [vmem:[#allocation1] sm:$0xff pattern:$0x73625140] }
 0x4a7   :  { %2548 = vrot.lane.b32.xlu2 %v2500_v59, %s3024_s19  ;;  %2508 = vst [vmem:[#allocation1] ss:$4 sm:$0xff] %v4575_v3  ;;  %v2357_v52 = vpop.permute.xlu2 %2356 }
 0x4a8   :  { %2509 = vst [vmem:[#allocation1 + $0x1] ss:$4 sm:$0xff] %v4579_v50 }
 0x4a9   :  { %2510 = vst [vmem:[#allocation1 + $0x2] ss:$4 sm:$0xff] %v4586_v39  ;;  %v2507_v10 = vld.sshfl [vmem:[#allocation1 + $0x20] sm:$0xff pattern:$0x73625140] }
 0x4aa   :  { %2512 = vst [vmem:[#allocation1 + $0x20] ss:$4 sm:$0xff] %v4592_v41 }
 0x4ab   :  { %2513 = vst [vmem:[#allocation1 + $0x21] ss:$4 sm:$0xff] %v4598_v13 }
 0x4ac   :  { %2514 = vst [vmem:[#allocation1 + $0x22] ss:$4 sm:$0xff] %v4606_v28 }
 0x4ad   :  { %2387 = vst.msk [vmem:[#allocation3 + $0x49] sm:$0x3f] %vm2380_vm8, %v2357_v52 }
 0x4ae   :  { %v2351_v16 = vpop.permute.xlu1 %2350 }
 0x4af   :  { %2550 = vrot.lane.b32.xlu2 %v2507_v10, %s3024_s19  ;;  %2384 = vst.msk [vmem:[#allocation3 + $0x21] sm:$0x3f] %vm2380_vm8, %v2351_v16 }
 0x4b0   :  { %v2511_v60 = vld.sshfl [vmem:[#allocation1] sm:$0xff pattern:$0x73625140] }
 0x4b1   :  { %2516 = vst [vmem:[#allocation1] ss:$4 sm:$0xff] %v4621_v4  ;;  %v2361_v56 = vpop.permute.xlu2 %2360 }
 0x4b2   :  { %2517 = vst [vmem:[#allocation1 + $0x1] ss:$4 sm:$0xff] %v4625_v9 }
 0x4b3   :  { %v2515_v34 = vld.sshfl [vmem:[#allocation1 + $0x20] sm:$0xff pattern:$0x73625140]  ;;  %2518 = vst [vmem:[#allocation1 + $0x2] ss:$4 sm:$0xff] %v4630_v38 }
 0x4b4   :  { %2554 = vrot.lane.b32.xlu0 %v2515_v34, %s3024_s19  ;;  %2520 = vst [vmem:[#allocation1 + $0x20] ss:$4 sm:$0xff] %v4636_v2 }
 0x4b5   :  { %2521 = vst [vmem:[#allocation1 + $0x21] ss:$4 sm:$0xff] %v4642_v11  ;;  %v2353_v22 = vpop.permute.xlu0 %2352 }
 0x4b6   :  { %2522 = vst [vmem:[#allocation1 + $0x22] ss:$4 sm:$0xff] %v4650_v19 }
 0x4b7   :  { %2552 = vrot.lane.b32.xlu2 %v2511_v60, %s3024_s19  ;;  %2389 = vst.msk [vmem:[#allocation3 + $0x59] sm:$0x3f] %vm2380_vm8, %v2361_v56 }
 0x4b8   :  { %2385 = vst.msk [vmem:[#allocation3 + $0x29] sm:$0x3f] %vm2380_vm8, %v2353_v22 }
 0x4ba   :  { %v2519_v18 = vld.sshfl [vmem:[#allocation1] sm:$0xff pattern:$0x73625140] }
 0x4bb   :  { %2524 = vst [vmem:[#allocation1] ss:$4 sm:$0xff] %v4665_v23 }
 0x4bc   :  { %2525 = vst [vmem:[#allocation1 + $0x1] ss:$4 sm:$0xff] %v4671_v44 }
 0x4bd   :  { %v2523_v62 = vld.sshfl [vmem:[#allocation1 + $0x20] sm:$0xff pattern:$0x73625140]  ;;  %2526 = vst [vmem:[#allocation1 + $0x2] ss:$4 sm:$0xff] %v4679_v25 }
 0x4be   :  { %2558 = vrot.lane.b32.xlu1 %v2523_v62, %s3024_s19  ;;  %2528 = vst [vmem:[#allocation1 + $0x20] ss:$4 sm:$0xff] %v4685_v7 }
 0x4bf   :  { %2529 = vst [vmem:[#allocation1 + $0x21] ss:$4 sm:$0xff] %v4691_v61  ;;  %2556 = vrot.lane.b32.xlu2 %v2519_v18, %s3024_s19 }
 0x4c0   :  { %2530 = vst [vmem:[#allocation1 + $0x22] ss:$4 sm:$0xff] %v4699_v47 }
 0x4c2   :  { %v2359_v5 = vpop.permute.xlu0 %2358 }
 0x4c3   :  { %2388 = vst.msk [vmem:[#allocation3 + $0x51] sm:$0x3f] %vm2380_vm8, %v2359_v5 }
 0x4c4   :  { %v5150_v29 = vld.sshfl [vmem:[#allocation1] sm:$0xff pattern:$0x73625140] }
 0x4c5   :  { %2532 = vst [vmem:[#allocation1] ss:$4 sm:$0xff] %v4718_v27 }
 0x4c6   :  { %2533 = vst [vmem:[#allocation1 + $0x1] ss:$4 sm:$0xff] %v4724_v45 }
 0x4c7   :  { %v2531_v17 = vld.sshfl [vmem:[#allocation1 + $0x20] sm:$0xff pattern:$0x73625140]  ;;  %2534 = vst [vmem:[#allocation1 + $0x2] ss:$4 sm:$0xff] %v4733_v26 }
 0x4c8   :  { %2562 = vrot.lane.b32.xlu0 %v2531_v17, %s3024_s19  ;;  %2536 = vst [vmem:[#allocation1 + $0x20] ss:$4 sm:$0xff] %v4739_v30 }
 0x4c9   :  { %2537 = vst [vmem:[#allocation1 + $0x21] ss:$4 sm:$0xff] %v4745_v43 }
 0x4ca   :  { %2538 = vst [vmem:[#allocation1 + $0x22] ss:$4 sm:$0xff] %v4753_v32 }
 0x4cc   :  { %v2363_v8 = vpop.permute.xlu1 %2362 }
 0x4cd   :  { %2390 = vst.msk [vmem:[#allocation3 + $0x61] sm:$0x3f] %vm2380_vm8, %v2363_v8 }
 0x4ce   :  { %v2535_v53 = vld.sshfl [vmem:[#allocation1] sm:$0xff pattern:$0x73625140] }
 0x4cf   :  { %2564 = vrot.lane.b32.xlu1 %v2535_v53, %s3024_s19  ;;  %2540 = vst [vmem:[#allocation1] ss:$4 sm:$0xff] %v4772_v42 }
 0x4d0   :  { %2541 = vst [vmem:[#allocation1 + $0x1] ss:$4 sm:$0xff] %v4778_v51 }
 0x4d1   :  { %v2539_v0 = vld.sshfl [vmem:[#allocation1 + $0x20] sm:$0xff pattern:$0x73625140]  ;;  %2542 = vst [vmem:[#allocation1 + $0x2] ss:$4 sm:$0xff] %v4783_v54 }
 0x4d2   :  { %2566 = vrot.lane.b32.xlu0 %v2539_v0, %s3024_s19  ;;  %2544 = vst [vmem:[#allocation1 + $0x20] ss:$4 sm:$0xff] %v4787_v14 }
 0x4d3   :  { %2545 = vst [vmem:[#allocation1 + $0x21] ss:$4 sm:$0xff] %v4791_v31  ;;  %v2365_v36 = vpop.permute.xlu0 %2364 }
 0x4d4   :  { %2546 = vst [vmem:[#allocation1 + $0x22] ss:$4 sm:$0xff] %v4795_v55 }
 0x4d5   :  { %2391 = vst.msk [vmem:[#allocation3 + $0x69] sm:$0x3f] %vm2380_vm8, %v2365_v36 }
 0x4d8   :  { %v2543_v20 = vld.sshfl [vmem:[#allocation1] sm:$0xff pattern:$0x73625140] }
 0x4d9   :  { %2568 = vrot.lane.b32.xlu2 %v2543_v20, %s3024_s19  ;;  %2597 = vst [vmem:[#allocation1] ss:$4 sm:$0xff] %v4534_v12  ;;  %v2455_v46 = vpop.permute.xlu2 %2454 }
 0x4da   :  { %2599 = vst [vmem:[#allocation1 + $0x1] ss:$4 sm:$0xff] %v4537_v57 }
 0x4db   :  { %2601 = vst [vmem:[#allocation1 + $0x2] ss:$4 sm:$0xff] %v4540_v48  ;;  %v5173_v49 = vld.sshfl [vmem:[#allocation1 + $0x20] sm:$0xff pattern:$0x73625140] }
 0x4dc   :  { %2604 = vst [vmem:[#allocation1 + $0x20] ss:$4 sm:$0xff] %v4543_v33 }
 0x4dd   :  { %2606 = vst [vmem:[#allocation1 + $0x21] ss:$4 sm:$0xff] %v4548_v37  ;;  %v2447_v59 = vpop.permute.xlu1 %2446 }
 0x4de   :  { %2608 = vst [vmem:[#allocation1 + $0x22] ss:$4 sm:$0xff] %v4554_v58 }
 0x4df   :  { %2487 = vst.msk [vmem:[#allocation3 + $0x28] sm:$0x3f] %vm2482_vm9, %v2455_v46 }
 0x4e0   :  { %v2449_v10 = vpop.permute.xlu0 %2448  ;;  %2483 = vst.msk [vmem:[#allocation3 + $0x8] sm:$0x3f] %vm2482_vm9, %v2447_v59 }
 0x4e1   :  { %2484 = vst.msk [vmem:[#allocation3 + $0x10] sm:$0x3f] %vm2482_vm9, %v2449_v10 }
 0x4e2   :  { %v2602_v52 = vld.sshfl [vmem:[#allocation1] sm:$0xff pattern:$0x73625140] }
 0x4e3   :  { %2650 = vrot.lane.b32.xlu0 %v2602_v52, %s3034_s10  ;;  %2610 = vst [vmem:[#allocation1] ss:$4 sm:$0xff] %v4575_v3 }
 0x4e4   :  { %2611 = vst [vmem:[#allocation1 + $0x1] ss:$4 sm:$0xff] %v4579_v50 }
 0x4e5   :  { %2612 = vst [vmem:[#allocation1 + $0x2] ss:$4 sm:$0xff] %v4586_v39  ;;  %v2609_v16 = vld.sshfl [vmem:[#allocation1 + $0x20] sm:$0xff pattern:$0x73625140] }
 0x4e6   :  { %2614 = vst [vmem:[#allocation1 + $0x20] ss:$4 sm:$0xff] %v4592_v41  ;;  %v2461_v60 = vpop.permute.xlu2 %2460 }
 0x4e7   :  { %2615 = vst [vmem:[#allocation1 + $0x21] ss:$4 sm:$0xff] %v4598_v13  ;;  %v2451_v34 = vpop.permute.xlu1 %2450 }
 0x4e8   :  { %2616 = vst [vmem:[#allocation1 + $0x22] ss:$4 sm:$0xff] %v4606_v28 }
 0x4e9   :  { %2490 = vst.msk [vmem:[#allocation3 + $0x50] sm:$0x3f] %vm2482_vm9, %v2461_v60 }
 0x4ea   :  { %v2453_v56 = vpop.permute.xlu0 %2452  ;;  %2485 = vst.msk [vmem:[#allocation3 + $0x18] sm:$0x3f] %vm2482_vm9, %v2451_v34 }
 0x4eb   :  { %2652 = vrot.lane.b32.xlu0 %v2609_v16, %s3034_s10  ;;  %2486 = vst.msk [vmem:[#allocation3 + $0x20] sm:$0x3f] %vm2482_vm9, %v2453_v56 }
 0x4ec   :  { %v2613_v22 = vld.sshfl [vmem:[#allocation1] sm:$0xff pattern:$0x73625140] }
 0x4ed   :  { %2654 = vrot.lane.b32.xlu1 %v2613_v22, %s3034_s10  ;;  %2618 = vst [vmem:[#allocation1] ss:$4 sm:$0xff] %v4621_v4 }
 0x4ee   :  { %2619 = vst [vmem:[#allocation1 + $0x1] ss:$4 sm:$0xff] %v4625_v9 }
 0x4ef   :  { %v2617_v18 = vld.sshfl [vmem:[#allocation1 + $0x20] sm:$0xff pattern:$0x73625140]  ;;  %2620 = vst [vmem:[#allocation1 + $0x2] ss:$4 sm:$0xff] %v4630_v38 }
 0x4f0   :  { %2656 = vrot.lane.b32.xlu2 %v2617_v18, %s3034_s10  ;;  %2622 = vst [vmem:[#allocation1 + $0x20] ss:$4 sm:$0xff] %v4636_v2 }
 0x4f1   :  { %2623 = vst [vmem:[#allocation1 + $0x21] ss:$4 sm:$0xff] %v4642_v11 }
 0x4f2   :  { %2624 = vst [vmem:[#allocation1 + $0x22] ss:$4 sm:$0xff] %v4650_v19 }
 0x4f6   :  { %v2621_v62 = vld.sshfl [vmem:[#allocation1] sm:$0xff pattern:$0x73625140] }
 0x4f7   :  { %2658 = vrot.lane.b32.xlu1 %v2621_v62, %s3034_s10  ;;  %2626 = vst [vmem:[#allocation1] ss:$4 sm:$0xff] %v4665_v23  ;;  %v2467_v5 = vpop.permute.xlu2 %2466 }
 0x4f8   :  { %2627 = vst [vmem:[#allocation1 + $0x1] ss:$4 sm:$0xff] %v4671_v44 }
 0x4f9   :  { %v2625_v17 = vld.sshfl [vmem:[#allocation1 + $0x20] sm:$0xff pattern:$0x73625140]  ;;  %2628 = vst [vmem:[#allocation1 + $0x2] ss:$4 sm:$0xff] %v4679_v25 }
 0x4fa   :  { %2660 = vrot.lane.b32.xlu0 %v2625_v17, %s3034_s10  ;;  %2630 = vst [vmem:[#allocation1 + $0x20] ss:$4 sm:$0xff] %v4685_v7 }
 0x4fb   :  { %2631 = vst [vmem:[#allocation1 + $0x21] ss:$4 sm:$0xff] %v4691_v61  ;;  %v2459_v8 = vpop.permute.xlu1 %2458 }
 0x4fc   :  { %2632 = vst [vmem:[#allocation1 + $0x22] ss:$4 sm:$0xff] %v4699_v47 }
 0x4fd   :  { %2493 = vst.msk [vmem:[#allocation3 + $0x68] sm:$0x3f] %vm2482_vm9, %v2467_v5 }
 0x4fe   :  { %2489 = vst.msk [vmem:[#allocation3 + $0x48] sm:$0x3f] %vm2482_vm9, %v2459_v8 }
 0x500   :  { %v5210_v53 = vld.sshfl [vmem:[#allocation1] sm:$0xff pattern:$0x73625140] }
 0x501   :  { %2634 = vst [vmem:[#allocation1] ss:$4 sm:$0xff] %v4718_v27  ;;  %v2549_v0 = vpop.permute.xlu2 %2548 }
 0x502   :  { %2635 = vst [vmem:[#allocation1 + $0x1] ss:$4 sm:$0xff] %v4724_v45 }
 0x503   :  { %v2633_v36 = vld.sshfl [vmem:[#allocation1 + $0x20] sm:$0xff pattern:$0x73625140]  ;;  %2636 = vst [vmem:[#allocation1 + $0x2] ss:$4 sm:$0xff] %v4733_v26 }
 0x504   :  { %2664 = vrot.lane.b32.xlu2 %v2633_v36, %s3034_s10  ;;  %2638 = vst [vmem:[#allocation1 + $0x20] ss:$4 sm:$0xff] %v4739_v30 }
 0x505   :  { %2639 = vst [vmem:[#allocation1 + $0x21] ss:$4 sm:$0xff] %v4745_v43  ;;  %v2463_v20 = vpop.permute.xlu1 %2462 }
 0x506   :  { %2640 = vst [vmem:[#allocation1 + $0x22] ss:$4 sm:$0xff] %v4753_v32 }
 0x507   :  { %2585 = vst.msk [vmem:[#allocation3 + $0x2] sm:$0x3f] %vm2584_vm10, %v2549_v0 }
 0x508   :  { %v2465_v46 = vpop.permute.xlu0 %2464  ;;  %2491 = vst.msk [vmem:[#allocation3 + $0x58] sm:$0x3f] %vm2482_vm9, %v2463_v20 }
 0x509   :  { %2492 = vst.msk [vmem:[#allocation3 + $0x60] sm:$0x3f] %vm2482_vm9, %v2465_v46  ;;  %v2551_v59 = vpop.permute.xlu2 %2550 }
 0x50a   :  { %v2637_v10 = vld.sshfl [vmem:[#allocation1] sm:$0xff pattern:$0x73625140]  ;;  %2586 = vst.msk [vmem:[#allocation3 + $0xa] sm:$0x3f] %vm2584_vm10, %v2551_v59 }
 0x50b   :  { %2666 = vrot.lane.b32.xlu0 %v2637_v10, %s3034_s10  ;;  %2642 = vst [vmem:[#allocation1] ss:$4 sm:$0xff] %v4772_v42 }
 0x50c   :  { %2643 = vst [vmem:[#allocation1 + $0x1] ss:$4 sm:$0xff] %v4778_v51 }
 0x50d   :  { %v2641_v52 = vld.sshfl [vmem:[#allocation1 + $0x20] sm:$0xff pattern:$0x73625140]  ;;  %2644 = vst [vmem:[#allocation1 + $0x2] ss:$4 sm:$0xff] %v4783_v54 }
 0x50e   :  { %2646 = vst [vmem:[#allocation1 + $0x20] ss:$4 sm:$0xff] %v4787_v14  ;;  %2668 = vrot.lane.b32.xlu2 %v2641_v52, %s3034_s10 }
 0x50f   :  { %2647 = vst [vmem:[#allocation1 + $0x21] ss:$4 sm:$0xff] %v4791_v31 }
 0x510   :  { %2648 = vst [vmem:[#allocation1 + $0x22] ss:$4 sm:$0xff] %v4795_v55 }
 0x511   :  { %v2553_v16 = vpop.permute.xlu2 %2552 }
 0x512   :  { %2587 = vst.msk [vmem:[#allocation3 + $0x12] sm:$0x3f] %vm2584_vm10, %v2553_v16 }
 0x514   :  { %v2645_v60 = vld.sshfl [vmem:[#allocation1] sm:$0xff pattern:$0x73625140] }
 0x515   :  { %2670 = vrot.lane.b32.xlu1 %v2645_v60, %s3034_s10  ;;  %2699 = vst [vmem:[#allocation1] ss:$4 sm:$0xff] %v4534_v12 }
 0x516   :  { %2701 = vst [vmem:[#allocation1 + $0x1] ss:$4 sm:$0xff] %v4537_v57 }
 0x517   :  { %2703 = vst [vmem:[#allocation1 + $0x2] ss:$4 sm:$0xff] %v4540_v48  ;;  %v2649_v34 = vld.sshfl [vmem:[#allocation1 + $0x20] sm:$0xff pattern:$0x73625140] }
 0x518   :  { %2706 = vst [vmem:[#allocation1 + $0x20] ss:$4 sm:$0xff] %v4543_v33 }
 0x519   :  { %2708 = vst [vmem:[#allocation1 + $0x21] ss:$4 sm:$0xff] %v4548_v37  ;;  %v2557_v56 = vpop.permute.xlu2 %2556 }
 0x51a   :  { %2710 = vst [vmem:[#allocation1 + $0x22] ss:$4 sm:$0xff] %v4554_v58 }
 0x51b   :  { %2589 = vst.msk [vmem:[#allocation3 + $0x22] sm:$0x3f] %vm2584_vm10, %v2557_v56 }
 0x51e   :  { %v2704_v22 = vld.sshfl [vmem:[#allocation1] sm:$0xff pattern:$0x73625140] }
 0x51f   :  { %2752 = vrot.lane.b32.xlu1 %v2704_v22, %s3025_s22  ;;  %2712 = vst [vmem:[#allocation1] ss:$4 sm:$0xff] %v4575_v3 }
 0x520   :  { %2713 = vst [vmem:[#allocation1 + $0x1] ss:$4 sm:$0xff] %v4579_v50 }
 0x521   :  { %2714 = vst [vmem:[#allocation1 + $0x2] ss:$4 sm:$0xff] %v4586_v39  ;;  %v2711_v12 = vld.sshfl [vmem:[#allocation1 + $0x20] sm:$0xff pattern:$0x73625140] }
 0x522   :  { %2716 = vst [vmem:[#allocation1 + $0x20] ss:$4 sm:$0xff] %v4592_v41 }
 0x523   :  { %2717 = vst [vmem:[#allocation1 + $0x21] ss:$4 sm:$0xff] %v4598_v13 }
 0x524   :  { %2718 = vst [vmem:[#allocation1 + $0x22] ss:$4 sm:$0xff] %v4606_v28 }
 0x526   :  { %v2555_v57 = vpop.permute.xlu0 %2554 }
 0x527   :  { %2754 = vrot.lane.b32.xlu1 %v2711_v12, %s3025_s22  ;;  %2588 = vst.msk [vmem:[#allocation3 + $0x1a] sm:$0x3f] %vm2584_vm10, %v2555_v57 }
 0x528   :  { %v2715_v48 = vld.sshfl [vmem:[#allocation1] sm:$0xff pattern:$0x73625140] }
 0x529   :  { %2756 = vrot.lane.b32.xlu0 %v2715_v48, %s3025_s22  ;;  %2720 = vst [vmem:[#allocation1] ss:$4 sm:$0xff] %v4621_v4 }
 0x52a   :  { %2721 = vst [vmem:[#allocation1 + $0x1] ss:$4 sm:$0xff] %v4625_v9 }
 0x52b   :  { %v2719_v33 = vld.sshfl [vmem:[#allocation1 + $0x20] sm:$0xff pattern:$0x73625140]  ;;  %2722 = vst [vmem:[#allocation1 + $0x2] ss:$4 sm:$0xff] %v4630_v38 }
 0x52c   :  { %2724 = vst [vmem:[#allocation1 + $0x20] ss:$4 sm:$0xff] %v4636_v2 }
 0x52d   :  { %2725 = vst [vmem:[#allocation1 + $0x21] ss:$4 sm:$0xff] %v4642_v11 }
 0x52e   :  { %2726 = vst [vmem:[#allocation1 + $0x22] ss:$4 sm:$0xff] %v4650_v19 }
 0x52f   :  { %2758 = vrot.lane.b32.xlu1 %v2719_v33, %s3025_s22 }
 0x530   :  { %v2559_v37 = vpop.permute.xlu1 %2558 }
 0x531   :  { %2590 = vst.msk [vmem:[#allocation3 + $0x2a] sm:$0x3f] %vm2584_vm10, %v2559_v37 }
 0x532   :  { %v2723_v58 = vld.sshfl [vmem:[#allocation1] sm:$0xff pattern:$0x73625140] }
 0x533   :  { %2760 = vrot.lane.b32.xlu0 %v2723_v58, %s3025_s22  ;;  %2728 = vst [vmem:[#allocation1] ss:$4 sm:$0xff] %v4665_v23  ;;  %v2569_v50 = vpop.permute.xlu2 %2568 }
 0x534   :  { %2729 = vst [vmem:[#allocation1 + $0x1] ss:$4 sm:$0xff] %v4671_v44 }
 0x535   :  { %v2727_v3 = vld.sshfl [vmem:[#allocation1 + $0x20] sm:$0xff pattern:$0x73625140]  ;;  %2730 = vst [vmem:[#allocation1 + $0x2] ss:$4 sm:$0xff] %v4679_v25 }
 0x536   :  { %2762 = vrot.lane.b32.xlu2 %v2727_v3, %s3025_s22  ;;  %2732 = vst [vmem:[#allocation1 + $0x20] ss:$4 sm:$0xff] %v4685_v7  ;;  %v2825_v7 = vld [vmem:[%s5462_s7 + $0x40] sm:$0xff] }
 0x537   :  { %2733 = vst [vmem:[#allocation1 + $0x21] ss:$4 sm:$0xff] %v4691_v61  ;;  %2885 = vmatpush.msra.mxu2 %v2825_v7  ;;  %2988 = vmatpush.msra.mxu3 %v2825_v7 }
 0x538   :  { %2734 = vst [vmem:[#allocation1 + $0x22] ss:$4 sm:$0xff] %v4699_v47 }
 0x539   :  { %2595 = vst.msk [vmem:[#allocation3 + $0x62] sm:$0x3f] %vm2584_vm10, %v2569_v50 }
 0x53a   :  { %v2563_v39 = vpop.permute.xlu0 %2562 }
 0x53b   :  { %2672 = vrot.lane.b32.xlu0 %v2649_v34, %s3034_s10  ;;  %2592 = vst.msk [vmem:[#allocation3 + $0x4a] sm:$0x3f] %vm2584_vm10, %v2563_v39 }
 0x53c   :  { %v2731_v41 = vld.sshfl [vmem:[#allocation1] sm:$0xff pattern:$0x73625140] }
 0x53d   :  { %2736 = vst [vmem:[#allocation1] ss:$4 sm:$0xff] %v4718_v27 }
 0x53e   :  { %2737 = vst [vmem:[#allocation1 + $0x1] ss:$4 sm:$0xff] %v4724_v45 }
 0x53f   :  { %2738 = vst [vmem:[#allocation1 + $0x2] ss:$4 sm:$0xff] %v4733_v26  ;;  %v2735_v13 = vld.sshfl [vmem:[#allocation1 + $0x20] sm:$0xff pattern:$0x73625140]  ;;  %v2824_v26 = vld [vmem:[%s5462_s7 + $0x38] sm:$0xff] }
 0x540   :  { %2766 = vrot.lane.b32.xlu1 %v2735_v13, %s3025_s22  ;;  %2740 = vst [vmem:[#allocation1 + $0x20] ss:$4 sm:$0xff] %v4739_v30  ;;  %v2823_v30 = vld [vmem:[%s5462_s7 + $0x30] sm:$0xff]  ;;  %2886 = vmatpush.msra.mxu2 %v2824_v26 }
 0x541   :  { %2741 = vst [vmem:[#allocation1 + $0x21] ss:$4 sm:$0xff] %v4745_v43  ;;  %v2565_v28 = vpop.permute.xlu1 %2564  ;;  %2989 = vmatpush.msra.mxu3 %v2824_v26  ;;  %v2822_v43 = vld [vmem:[%s5462_s7 + $0x28] sm:$0xff] }
 0x542   :  { %2742 = vst [vmem:[#allocation1 + $0x22] ss:$4 sm:$0xff] %v4753_v32  ;;  %2887 = vmatpush.msra.mxu2 %v2823_v30  ;;  %v2821_v32 = vld [vmem:[%s5462_s7 + $0x20] sm:$0xff] }
 0x543   :  { %2593 = vst.msk [vmem:[#allocation3 + $0x52] sm:$0x3f] %vm2584_vm10, %v2565_v28  ;;  %2990 = vmatpush.msra.mxu3 %v2823_v30 }
 0x544   :  { %v2567_v4 = vpop.permute.xlu0 %2566  ;;  %2888 = vmatpush.msra.mxu2 %v2822_v43 }
 0x545   :  { %2594 = vst.msk [vmem:[#allocation3 + $0x5a] sm:$0x3f] %vm2584_vm10, %v2567_v4  ;;  %2991 = vmatpush.msra.mxu3 %v2822_v43  ;;  %v3015_v4 = vld [vmem:[%s5463_s8] ss:$0 sm:$0xff] }
 0x546   :  { %v2739_v9 = vld.sshfl [vmem:[#allocation1] sm:$0xff pattern:$0x73625140]  ;;  %2889 = vmatpush.msra.mxu2 %v2821_v32 }
 0x547   :  { %2768 = vrot.lane.b32.xlu2 %v2739_v9, %s3025_s22  ;;  %2744 = vst [vmem:[#allocation1] ss:$4 sm:$0xff] %v4772_v42  ;;  %v2820_v42 = vld [vmem:[%s5462_s7 + $0x18] sm:$0xff]  ;;  %2992 = vmatpush.msra.mxu3 %v2821_v32 }
 0x548   :  { %2570 = vrot.lane.b32.xlu1 %v5173_v49, %s3024_s19  ;;  %2745 = vst [vmem:[#allocation1 + $0x1] ss:$4 sm:$0xff] %v4778_v51  ;;  %v2819_v51 = vld [vmem:[%s5462_s7 + $0x10] sm:$0xff]  ;;  %2890 = vmatpush.msra.mxu2 %v2820_v42 }
 0x549   :  { %2746 = vst [vmem:[#allocation1 + $0x2] ss:$4 sm:$0xff] %v4783_v54  ;;  %v2743_v38 = vld.sshfl [vmem:[#allocation1 + $0x20] sm:$0xff pattern:$0x73625140]  ;;  %2993 = vmatpush.msra.mxu3 %v2820_v42  ;;  %v2818_v54 = vld [vmem:[%s5462_s7 + $0x8] sm:$0xff] }
 0x54a   :  { %2748 = vst [vmem:[#allocation1 + $0x20] ss:$4 sm:$0xff] %v4787_v14  ;;  %v2657_v2 = vpop.permute.xlu2 %2656  ;;  %2891 = vmatpush.msra.mxu2 %v2819_v51 }
 0x54b   :  { %2749 = vst [vmem:[#allocation1 + $0x21] ss:$4 sm:$0xff] %v4791_v31  ;;  %2994 = vmatpush.msra.mxu3 %v2819_v51  ;;  %v2817_v31 = vld [vmem:[%s5462_s7] sm:$0xff] }
 0x54c   :  { %2750 = vst [vmem:[#allocation1 + $0x22] ss:$4 sm:$0xff] %v4795_v55  ;;  %2892 = vmatpush.msra.mxu2 %v2818_v54 }
 0x54d   :  { %2690 = vst.msk [vmem:[#allocation3 + $0x19] sm:$0x3f] %vm2686_vm12, %v2657_v2  ;;  %2995 = vmatpush.msra.mxu3 %v2818_v54 }
 0x54e   :  { %2893 = vmatpush.msra.mxu2 %v2817_v31 }
 0x54f   :  { %2354 = vrot.lane.b32.xlu2 %v5024_v6, %s3023_s16  ;;  %2996 = vmatpush.msra.mxu3 %v2817_v31 }
 0x550   :  { %2770 = vrot.lane.b32.xlu1 %v2743_v38, %s3025_s22  ;;  %v2747_v11 = vld.sshfl [vmem:[#allocation1] sm:$0xff pattern:$0x73625140] }
 0x551   :  { %2772 = vrot.lane.b32.xlu0 %v2747_v11, %s3025_s22 }
 0x553   :  { %v2751_v44 = vld.sshfl [vmem:[#allocation1 + $0x20] sm:$0xff pattern:$0x73625140] }
 0x555   :  { %v2651_v19 = vpop.permute.xlu0 %2650 }
 0x556   :  { %2687 = vst.msk [vmem:[#allocation3 + $0x1] sm:$0x3f] %vm2686_vm12, %v2651_v19 }
 0x557   :  { %2366 = vrot.lane.b32.xlu2 %v5055_v24, %s3023_s16 }
 0x558   :  { %2456 = vrot.lane.b32.xlu1 %v5084_v40, %s3033_s30 }
 0x559   :  { %2159 = vrot.lane.b32.xlu0 %v4928_v15, %s3022_s15 }
 0x55d   :  { %v2653_v23 = vpop.permute.xlu0 %2652 }
 0x55e   :  { %v2665_v25 = vpop.permute.xlu2 %2664  ;;  %2688 = vst.msk [vmem:[#allocation3 + $0x9] sm:$0x3f] %vm2686_vm12, %v2653_v23 }
 0x55f   :  { %2774 = vrot.lane.b32.xlu2 %v2751_v44, %s3025_s22  ;;  %2694 = vst.msk [vmem:[#allocation3 + $0x49] sm:$0x3f] %vm2686_vm12, %v2665_v25  ;;  %v2655_v61 = vpop.permute.xlu1 %2654 }
 0x560   :  { %2263 = vrot.lane.b32.xlu1 %v4993_v1, %s3032_s6  ;;  %2689 = vst.msk [vmem:[#allocation3 + $0x11] sm:$0x3f] %vm2686_vm12, %v2655_v61 }
 0x561   :  { %2149 = vrot.lane.b32.xlu0 %v4905_v21, %s3022_s15 }
 0x567   :  { %2560 = vrot.lane.b32.xlu2 %v5150_v29, %s3024_s19 }
 0x568   :  { %2468 = vrot.lane.b32.xlu1 %v5114_v63, %s3033_s30  ;;  %v2669_v47 = vpop.permute.xlu2 %2668 }
 0x569   :  { %2662 = vrot.lane.b32.xlu0 %v5210_v53, %s3034_s10  ;;  %2696 = vst.msk [vmem:[#allocation3 + $0x59] sm:$0x3f] %vm2686_vm12, %v2669_v47  ;;  %v2659_v27 = vpop.permute.xlu1 %2658 }
 0x56a   :  { %2691 = vst.msk [vmem:[#allocation3 + $0x21] sm:$0x3f] %vm2686_vm12, %v2659_v27 }
 0x56c   :  { %v2661_v45 = vpop.permute.xlu0 %2660 }
 0x56d   :  { %2692 = vst.msk [vmem:[#allocation3 + $0x29] sm:$0x3f] %vm2686_vm12, %v2661_v45 }
 0x56f   :  { %2764 = vrot.lane.b32.xlu2 %v2731_v41, %s3025_s22 }
 0x570   :  { %2161 = vrot.lane.b32.xlu1 %v4932_v35, %s3022_s15 }
 0x57d   :  { %v2667_v14 = vpop.permute.xlu0 %2666 }
 0x57e   :  { %2695 = vst.msk [vmem:[#allocation3 + $0x51] sm:$0x3f] %vm2686_vm12, %v2667_v14 }
 0x587   :  { %v2671_v55 = vpop.permute.xlu1 %2670 }
 0x588   :  { %2697 = vst.msk [vmem:[#allocation3 + $0x61] sm:$0x3f] %vm2686_vm12, %v2671_v55 }
 0x590   :  { %v2763_v21 = vpop.permute.xlu2 %2762 }
 0x591   :  { %2794 = vst.msk [vmem:[#allocation3 + $0x28] sm:$0x3f] %vm2788_vm13, %v2763_v21  ;;  %v2753_v15 = vpop.permute.xlu1 %2752 }
 0x592   :  { %2789 = vst.msk [vmem:[#allocation3] sm:$0x3f] %vm2788_vm13, %v2753_v15 }
 0x598   :  { %v2806_v59 = vld [vmem:[#allocation3 + $0x28] sm:$0xff] }
 0x599   :  { %v2755_v35 = vpop.permute.xlu1 %2754  ;;  %v2801_v1 = vld [vmem:[#allocation3] sm:$0xff] }
 0x59a   :  { %2790 = vst.msk [vmem:[#allocation3 + $0x8] sm:$0x3f] %vm2788_vm13, %v2755_v35  ;;  %2972 = vmatmul.msk.f32.vlgmr.msra.gmra.mxu2 %vm1853_vm4, %v2801_v1 }
 0x59b   :  { %v2757_v6 = vpop.permute.xlu0 %2756 }
 0x59c   :  { %2791 = vst.msk [vmem:[#allocation3 + $0x10] sm:$0x3f] %vm2788_vm13, %v2757_v6 }
 0x5a1   :  { %v2769_v24 = vpop.permute.xlu2 %2768  ;;  %v2759_v40 = vpop.permute.xlu1 %2758  ;;  %v2802_v63 = vld [vmem:[#allocation3 + $0x8] sm:$0xff] }
 0x5a2   :  { %2797 = vst.msk [vmem:[#allocation3 + $0x50] sm:$0x3f] %vm2788_vm13, %v2769_v24  ;;  %2973 = vmatmul.msk.f32.gmra.mxu2 %vm1853_vm4, %v2802_v63 }
 0x5a3   :  { %2792 = vst.msk [vmem:[#allocation3 + $0x18] sm:$0x3f] %vm2788_vm13, %v2759_v40  ;;  %v2803_v18 = vld [vmem:[#allocation3 + $0x10] sm:$0xff] }
 0x5a5   :  { %v2761_v29 = vpop.permute.xlu0 %2760 }
 0x5a6   :  { %2793 = vst.msk [vmem:[#allocation3 + $0x20] sm:$0x3f] %vm2788_vm13, %v2761_v29 }
 0x5a9   :  { %v2355_v49 = vpop.permute.xlu2 %2354  ;;  %v2811_v52 = vld [vmem:[#allocation3 + $0x50] sm:$0xff] }
 0x5aa   :  { %2386 = vst.msk [vmem:[#allocation3 + $0x31] sm:$0x3f] %vm2380_vm8, %v2355_v49  ;;  %2974 = vmatmul.msk.f32.gmra.mxu2 %vm1853_vm4, %v2803_v18  ;;  %v2804_v5 = vld [vmem:[#allocation3 + $0x18] sm:$0xff] }
 0x5ad   :  { %v2805_v53 = vld [vmem:[#allocation3 + $0x20] sm:$0xff]  ;;  %v2673_v20 = vpop.permute.xlu0 %2672 }
 0x5b1   :  { %v2367_v62 = vpop.permute.xlu2 %2366 }
 0x5b2   :  { %v2767_v17 = vpop.permute.xlu1 %2766  ;;  %2975 = vmatmul.msk.f32.gmra.mxu2 %vm1853_vm4, %v2804_v5 }
 0x5b3   :  { %2796 = vst.msk [vmem:[#allocation3 + $0x48] sm:$0x3f] %vm2788_vm13, %v2767_v17 }
 0x5b9   :  { %v2775_v8 = vpop.permute.xlu2 %2774 }
 0x5ba   :  { %v2571_v0 = vpop.permute.xlu1 %2570  ;;  %v2810_v36 = vld [vmem:[#allocation3 + $0x48] sm:$0xff]  ;;  %2976 = vmatmul.msk.f32.gmra.mxu2 %vm1853_vm4, %v2805_v53 }
 0x5bb   :  { %2596 = vst.msk [vmem:[#allocation3 + $0x6a] sm:$0x3f] %vm2584_vm10, %v2571_v0  ;;  %2981 = vmatmul.msk.f32.vlgmr.msra.gmra.mxu3 %vm1853_vm4, %v2810_v36 }
 0x5bc   :  { %2698 = vst.msk [vmem:[#allocation3 + $0x69] sm:$0x3f] %vm2686_vm12, %v2673_v20 }
 0x5bd   :  { %2800 = vst.msk [vmem:[#allocation3 + $0x68] sm:$0x3f] %vm2788_vm13, %v2775_v8 }
 0x5c1   :  { %v2561_v46 = vpop.permute.xlu2 %2560 }
 0x5c2   :  { %v2771_v10 = vpop.permute.xlu1 %2770  ;;  %2591 = vst.msk [vmem:[#allocation3 + $0x42] sm:$0x3f] %vm2584_vm10, %v2561_v46  ;;  %2977 = vmatmul.msk.f32.gmra.mxu2 %vm1853_vm4, %v2806_v59 }
 0x5c3   :  { %2798 = vst.msk [vmem:[#allocation3 + $0x58] sm:$0x3f] %vm2788_vm13, %v2771_v10  ;;  %v2773_v16 = vpop.permute.xlu0 %2772  ;;  %2982 = vmatmul.msk.f32.gmra.mxu3 %vm1853_vm4, %v2811_v52 }
 0x5c4   :  { %2799 = vst.msk [vmem:[#allocation3 + $0x60] sm:$0x3f] %vm2788_vm13, %v2773_v16  ;;  %v2814_v37 = vld [vmem:[#allocation3 + $0x68] sm:$0xff] }
 0x5c9   :  { %v2765_v3 = vpop.permute.xlu2 %2764 }
 0x5ca   :  { %v2457_v60 = vpop.permute.xlu1 %2456  ;;  %v2812_v34 = vld [vmem:[#allocation3 + $0x58] sm:$0xff] }
 0x5cb   :  { %2488 = vst.msk [vmem:[#allocation3 + $0x30] sm:$0x3f] %vm2482_vm9, %v2457_v60  ;;  %v2160_v56 = vpop.permute.xlu0 %2159  ;;  %2983 = vmatmul.msk.f32.gmra.mxu3 %vm1853_vm4, %v2812_v34  ;;  %v2813_v57 = vld [vmem:[#allocation3 + $0x60] sm:$0xff] }
 0x5cc   :  { %2186 = vst.msk [vmem:[#allocation3 + $0x70] sm:$0x3f] %vm2175_vm6, %v2160_v56 }
 0x5d2   :  { %v2264_v22 = vpop.permute.xlu1 %2263  ;;  %v2807_v12 = vld [vmem:[#allocation3 + $0x30] sm:$0xff] }
 0x5d3   :  { %2290 = vst.msk [vmem:[#allocation3 + $0x72] sm:$0x3f] %vm2278_vm7, %v2264_v22  ;;  %v2150_v48 = vpop.permute.xlu0 %2149  ;;  %2978 = vmatmul.msk.f32.gmra.mxu2 %vm1853_vm4, %v2807_v12  ;;  %2984 = vmatmul.msk.f32.gmra.mxu3 %vm1853_vm4, %v2813_v57 }
 0x5d4   :  { %2392 = vst.msk [vmem:[#allocation3 + $0x71] sm:$0x3f] %vm2380_vm8, %v2367_v62 }
 0x5d5   :  { %2181 = vst.msk [vmem:[#allocation3 + $0x38] sm:$0x3f] %vm2175_vm6, %v2150_v48 }
 0x5da   :  { %v2469_v33 = vpop.permute.xlu1 %2468 }
 0x5db   :  { %2494 = vst.msk [vmem:[#allocation3 + $0x70] sm:$0x3f] %vm2482_vm9, %v2469_v33  ;;  %v2663_v58 = vpop.permute.xlu0 %2662  ;;  %2985 = vmatmul.msk.f32.gmra.mxu3 %vm1853_vm4, %v2814_v37 }
 0x5dc   :  { %2693 = vst.msk [vmem:[#allocation3 + $0x41] sm:$0x3f] %vm2686_vm12, %v2663_v58  ;;  %v2808_v50 = vld [vmem:[#allocation3 + $0x38] sm:$0xff] }
 0x5dd   :  { %2795 = vst.msk [vmem:[#allocation3 + $0x40] sm:$0x3f] %vm2788_vm13, %v2765_v3  ;;  %2979 = vmatmul.msk.f32.gmra.mxu2 %vm1853_vm4, %v2808_v50 }
 0x5e2   :  { %v2162_v39 = vpop.permute.xlu1 %2161  ;;  %v2815_v41 = vld [vmem:[#allocation3 + $0x70] sm:$0xff] }
 0x5e3   :  { %2187 = vst.msk [vmem:[#allocation3 + $0x78] sm:$0x3f] %vm2175_vm6, %v2162_v39  ;;  %2986 = vmatmul.msk.f32.gmra.mxu3 %vm1853_vm4, %v2815_v41 }
 0x5e4   :  { %v2809_v13 = vld [vmem:[#allocation3 + $0x40] sm:$0xff] }
 0x5e5   :  { %2980 = vmatmul.msk.f32.gmra.mxu2 %vm1853_vm4, %v2809_v13 }
 0x5ea   :  { %v2816_v28 = vld [vmem:[#allocation3 + $0x78] sm:$0xff] }
 0x5eb   :  { %2987 = vmatmul.msk.f32.gmra.mxu3 %vm1853_vm4, %v2816_v28 }
 0x61d   :  { %v2895_v9 = vpop.f32.mrf.mxu2 }
 0x61e   :  { %v2896_v38 = vadd.f32 %v3015_v4, %v2895_v9 }
 0x620   :  { %2943 = vst.msk [vmem:[%s5464_s9] sm:$0xff] %vm753_vm11, %v2896_v38 }
 0x625   :  { %v2898_v2 = vpop.f32.mrf.mxu2 }
 0x626   :  { %v2899_v11 = vadd.f32 %v3015_v4, %v2898_v2 }
 0x628   :  { %2944 = vst.msk [vmem:[%s5464_s9 + $0x8] sm:$0xff] %vm753_vm11, %v2899_v11 }
 0x62d   :  { %v2901_v19 = vpop.f32.mrf.mxu2 }
 0x62e   :  { %v2902_v23 = vadd.f32 %v3015_v4, %v2901_v19 }
 0x630   :  { %2945 = vst.msk [vmem:[%s5464_s9 + $0x10] sm:$0xff] %vm753_vm11, %v2902_v23 }
 0x635   :  { %v2904_v44 = vpop.f32.mrf.mxu2 }
 0x636   :  { %v2905_v25 = vadd.f32 %v3015_v4, %v2904_v44 }
 0x638   :  { %2946 = vst.msk [vmem:[%s5464_s9 + $0x18] sm:$0xff] %vm753_vm11, %v2905_v25 }
 0x63d   :  { %v2907_v7 = vpop.f32.mrf.mxu2 }
 0x63e   :  { %v2922_v61 = vpop.f32.mrf.mxu3  ;;  %v2908_v47 = vadd.f32 %v3015_v4, %v2907_v7 }
 0x63f   :  { %v2923_v27 = vadd.f32 %v3015_v4, %v2922_v61 }
 0x640   :  { %2947 = vst.msk [vmem:[%s5464_s9 + $0x20] sm:$0xff] %vm753_vm11, %v2908_v47 }
 0x641   :  { %2952 = vst.msk [vmem:[%s5464_s9 + $0x48] sm:$0xff] %vm753_vm11, %v2923_v27 }
 0x645   :  { %v2910_v45 = vpop.f32.mrf.mxu2 }
 0x646   :  { %v2925_v26 = vpop.f32.mrf.mxu3  ;;  %v2911_v30 = vadd.f32 %v3015_v4, %v2910_v45 }
 0x647   :  { %v2926_v43 = vadd.f32 %v3015_v4, %v2925_v26 }
 0x648   :  { %2948 = vst.msk [vmem:[%s5464_s9 + $0x28] sm:$0xff] %vm753_vm11, %v2911_v30 }
 0x649   :  { %2953 = vst.msk [vmem:[%s5464_s9 + $0x50] sm:$0xff] %vm753_vm11, %v2926_v43 }
 0x64e   :  { %v2928_v32 = vpop.f32.mrf.mxu3 }
 0x64f   :  { %v2929_v42 = vadd.f32 %v3015_v4, %v2928_v32 }
 0x651   :  { %2954 = vst.msk [vmem:[%s5464_s9 + $0x58] sm:$0xff] %vm753_vm11, %v2929_v42 }
 0x656   :  { %v2913_v51 = vpop.f32.mrf.mxu2  ;;  %v2931_v54 = vpop.f32.mrf.mxu3 }
 0x657   :  { %v2914_v14 = vadd.f32 %v3015_v4, %v2913_v51  ;;  %v2932_v31 = vadd.f32 %v3015_v4, %v2931_v54 }
 0x659   :  { %2949 = vst.msk [vmem:[%s5464_s9 + $0x30] sm:$0xff] %vm753_vm11, %v2914_v14 }
 0x65a   :  { %2955 = vst.msk [vmem:[%s5464_s9 + $0x60] sm:$0xff] %vm753_vm11, %v2932_v31 }
 0x65e   :  { %v2934_v55 = vpop.f32.mrf.mxu3 }
 0x65f   :  { %v2935_v21 = vadd.f32 %v3015_v4, %v2934_v55 }
 0x660   :  { %v2916_v15 = vpop.f32.mrf.mxu2 }
 0x661   :  { %v2917_v35 = vadd.f32 %v3015_v4, %v2916_v15  ;;  %2956 = vst.msk [vmem:[%s5464_s9 + $0x68] sm:$0xff] %vm753_vm11, %v2935_v21 }
 0x663   :  { %2950 = vst.msk [vmem:[%s5464_s9 + $0x38] sm:$0xff] %vm753_vm11, %v2917_v35 }
 0x666   :  { %v2937_v1 = vpop.f32.mrf.mxu3 }
 0x667   :  { %v2938_v6 = vadd.f32 %v3015_v4, %v2937_v1 }
 0x668   :  { %v2919_v24 = vpop.f32.mrf.mxu2 }
 0x669   :  { %2957 = vst.msk [vmem:[%s5464_s9 + $0x70] sm:$0xff] %vm753_vm11, %v2938_v6  ;;  %v2920_v40 = vadd.f32 %v3015_v4, %v2919_v24 }
 0x66b   :  { %2951 = vst.msk [vmem:[%s5464_s9 + $0x40] sm:$0xff] %vm753_vm11, %v2920_v40 }
 0x66e   :  { %v2940_v63 = vpop.f32.mrf.mxu3 }
 0x66f   :  { %v2941_v29 = vadd.f32 %v3015_v4, %v2940_v63 }
 0x671   :  { %2958 = vst.msk [vmem:[%s5464_s9 + $0x78] sm:$0xff] %vm753_vm11, %v2941_v29 }

</bundles_post_ra>
